<compile_context>
chip_gen: v7x
topology: tpu7x:2x2x1
jax: 0.10.0
libtpu: 0.0.40
codegen_flags: <defaults>
</compile_context>

<pallas_src>
import math
from functools import partial

import jax
import jax.numpy as jnp
from jax.experimental import pallas as pl
from jax.experimental.pallas import tpu as pltpu

CPAD = 64  # lane-friendly channel width all intermediate activations use


def exponential_linspace_int(start, end, num, divisible_by=1):
    def _round(x):
        return int(round(x / divisible_by) * divisible_by)
    base = math.exp(math.log(end / start) / (num - 1))
    return [_round(start * base ** i) for i in range(num)]


def _erf_poly(x):
    """Abramowitz-Stegun 7.1.26 erf approximation (|abs err| < 1.5e-7).

    Uses only mul/add/exp/abs/where so it always lowers on Mosaic (support for
    lax.erf_p varies across versions); exp runs on the EUP slot (free-ish)."""
    p = 0.3275911
    a1, a2, a3, a4, a5 = (0.254829592, -0.284496736, 1.421413741,
                          -1.453152027, 1.061405429)
    ax = jnp.abs(x)
    t = 1.0 / (1.0 + p * ax)
    poly = ((((a5 * t + a4) * t + a3) * t + a2) * t + a1) * t
    e = 1.0 - poly * jnp.exp(-ax * ax)
    return jnp.where(x >= 0, e, -e)


def _gelu_exact(x):
    return 0.5 * x * (1.0 + _erf_poly(x * (1.0 / math.sqrt(2.0))))


# ----------------------------- fused Pallas kernel ---------------------------

def _dna_encoder_kernel(meta, halo, x_ref, *rest):
    """Runs the full encoder for one batch element, entirely on-chip.

    meta: static tuple of (K, cin_pad, residual, pool_after) per conv stage.
    rest: [w0, b0, w1, b1, ...] input refs, then o_ref, then 1 VMEM scratch ref.
    """
    n = len(meta)
    wb = rest[:2 * n]
    o_ref = rest[2 * n]
    xpad_ref = rest[2 * n + 1]            # (rows, CPAD) zero-padded activation slab

    act = x_ref[...].astype(jnp.float32)  # (L0, Cin0)
    L = act.shape[0]

    for si, (K, cin, residual, pool) in enumerate(meta):
        w_ref = wb[2 * si]                # (K, cin, CPAD)
        bias = wb[2 * si + 1][...]        # (1, CPAD)

        if K == 1:
            # pointwise conv: a single (L, C) x (C, CPAD) MXU matmul
            y = jnp.dot(act, w_ref[0], preferred_element_type=jnp.float32) + bias
        else:
            pad = K // 2
            # In-kernel 'same' padding: zero the slab, drop the activation at a
            # sublane-aligned offset; halo rows (and padded channels) stay 0.
            xpad_ref[...] = jnp.zeros_like(xpad_ref)
            xpad_ref[halo:halo + L, 0:cin] = act
            # Per-tap accumulation: every tap is a statically-shifted read plus
            # one MXU matmul; all offsets are Python ints (no dynamic gathers).
            y = jnp.dot(xpad_ref[halo - pad:halo - pad + L, 0:cin], w_ref[0],
                        preferred_element_type=jnp.float32) + bias
            for dk in range(1, K):
                start = halo - pad + dk
                y = y + jnp.dot(xpad_ref[start:start + L, 0:cin], w_ref[dk],
                                preferred_element_type=jnp.float32)

        y = _gelu_exact(y)                # exact erf GELU (PyTorch default)
        if residual:
            y = y + act
        if pool:
            # maxpool(k=2, s=2) without strided sublane gathers: pick even/odd
            # rows with two tiny selection matmuls and take the elementwise max.
            half = L // 2
            r = jax.lax.broadcasted_iota(jnp.int32, (half, L), 0)
            c = jax.lax.broadcasted_iota(jnp.int32, (half, L), 1)
            sel_even = (c == 2 * r).astype(jnp.float32)
            sel_odd = (c == 2 * r + 1).astype(jnp.float32)
            y = jnp.maximum(
                jnp.dot(sel_even, y, preferred_element_type=jnp.float32),
                jnp.dot(sel_odd, y, preferred_element_type=jnp.float32))
            L = half
        act = y

    o_ref[...] = act.astype(o_ref.dtype)


# ------------------------------ JAX wrapper ----------------------------------

def dna_encoder_forward(x, stages):
    """x: (B, L, 4) float32 -> (B, L / 2**num_pools, target_width) float32."""
    B, L, Cin = x.shape
    n_pool = sum(1 for s in stages if s["pool"])
    assert L % (2 ** n_pool) == 0
    L_out = L // (2 ** n_pool)

    meta = tuple((s["K"], s["cin_pad"], s["residual"], s["pool"]) for s in stages)
    pad_max = max(s["K"] // 2 for s in stages)
    halo = -(-pad_max // 8) * 8                       # sublane-aligned left halo
    xpad_rows = -(-(halo + L + pad_max) // 8) * 8

    in_specs = [pl.BlockSpec((None, L, Cin), lambda b: (b, 0, 0))]
    args = [x]
    for s in stages:
        in_specs.append(pl.BlockSpec(s["w_pad"].shape, lambda b: (0, 0, 0)))
        in_specs.append(pl.BlockSpec(s["b_pad"].shape, lambda b: (0, 0)))
        args.extend([s["w_pad"], s["b_pad"]])

    out = pl.pallas_call(
        partial(_dna_encoder_kernel, meta, halo),
        out_shape=jax.ShapeDtypeStruct((B, L_out, CPAD), jnp.float32),
        grid=(B,),
        in_specs=in_specs,
        out_specs=pl.BlockSpec((None, L_out, CPAD), lambda b: (b, 0, 0)),
        scratch_shapes=[pltpu.VMEM((xpad_rows, CPAD), jnp.float32)],
        compiler_params=pltpu.CompilerParams(
            dimension_semantics=("parallel",),        # batch across TCs
        ),
    )(*args)

    cout = stages[-1]["cout_true"]
    return out if cout == CPAD else out[..., :cout]


# ----------------------------- parameter setup -------------------------------

def init_dna_encoder_params(key, num_layers=3, target_width=64):
    """Per-conv-stage params.  Weights are kept both in the true layout
    (K, Cin, Cout) for the pure-JAX reference and zero-padded to
    (K, cin_pad, CPAD) (matmul-ready, lane-dense) for the fused kernel."""
    defs = []   # (K, din, dout, residual, pool_after)
    feat = [4, target_width // 2]
    for din, dout in zip(feat[:-1], feat[1:]):
        defs.append((15, din, dout, False, False))
        defs.append((1, dout, dout, True, False))
    tower = exponential_linspace_int(target_width // 2, target_width,
                                     num=num_layers + 1, divisible_by=2)
    for din, dout in zip(tower[:-1], tower[1:]):
        defs.append((5, din, dout, False, False))
        defs.append((1, dout, dout, True, True))
    assert all(dout <= CPAD for _, _, dout, _, _ in defs)

    stages = []
    keys = jax.random.split(key, len(defs))
    for i, ((K, din, dout, res, pool), k) in enumerate(zip(defs, keys)):
        kw, kb = jax.random.split(k)
        bound = 1.0 / math.sqrt(din * K)      # PyTorch Conv1d default init range
        w = jax.random.uniform(kw, (K, din, dout), jnp.float32, -bound, bound)
        b = jax.random.uniform(kb, (dout,), jnp.float32, -bound, bound)
        cin_pad = din if i == 0 else CPAD     # raw 4-ch input stays unpadded
        wp = jnp.zeros((K, cin_pad, CPAD), jnp.float32).at[:, :din, :dout].set(w)
        bp = jnp.zeros((CPAD,), jnp.float32).at[:dout].set(b)
        stages.append(dict(K=K, cin_pad=cin_pad, residual=res, pool=pool,
                           cout_true=dout, w_pad=wp, b_pad=bp.reshape(1, CPAD),
                           w_true=w, b_true=b))
    return stages


# --------------------------- pure-JAX reference -------------------------------

def reference_forward(x, stages):
    for s in stages:
        pad = s["K"] // 2
        y = jax.lax.conv_general_dilated(
            x, s["w_true"], window_strides=(1,), padding=((pad, pad),),
            dimension_numbers=("NWC", "WIO", "NWC"),
            precision=jax.lax.Precision.HIGHEST)
        y = jax.nn.gelu(y + s["b_true"][None, None, :], approximate=False)
        if s["residual"]:
            y = y + x
        if s["pool"]:
            b_, l_, d_ = y.shape
            y = jnp.max(y.reshape(b_, l_ // 2, 2, d_), axis=2)
        x = y
    return x


# ----------------------------------- main -------------------------------------

if __name__ == "__main__":
    key = jax.random.PRNGKey(0)
    kx, kp = jax.random.split(key)

    B, L = 2, 64                                   # 4 nucleotide channels
    x = jax.random.normal(kx, (B, L, 4), jnp.float32)

    stages = init_dna_encoder_params(kp, num_layers=3, target_width=64)

    fwd = jax.jit(lambda xx: dna_encoder_forward(xx, stages))
    y = jax.block_until_ready(fwd(x))

    # feature_layer keeps the length; 3 tower blocks each halve it -> L / 8.
    assert y.shape == (B, L // 8, 64), y.shape
    assert bool(jnp.isfinite(y).all())

    # validate the fused kernel against a pure-JAX reference of the same module
    y_ref = reference_forward(x, stages)
    err = float(jnp.max(jnp.abs(y - y_ref)))
    assert err < 1e-2, f"max abs err vs reference: {err}"

    print("KERNEL_OK")
</pallas_src>

<mosaic_0001>
module attributes {stable_mosaic.version = 11 : i64} {
  func.func @_dna_encoder_kernel(%arg0: i32, %arg1: memref<1x64x4xf32, #tpu.memory_space<vmem>>, %arg2: memref<15x4x64xf32, #tpu.memory_space<vmem>>, %arg3: memref<1x64xf32, #tpu.memory_space<vmem>>, %arg4: memref<1x64x64xf32, #tpu.memory_space<vmem>>, %arg5: memref<1x64xf32, #tpu.memory_space<vmem>>, %arg6: memref<5x64x64xf32, #tpu.memory_space<vmem>>, %arg7: memref<1x64xf32, #tpu.memory_space<vmem>>, %arg8: memref<1x64x64xf32, #tpu.memory_space<vmem>>, %arg9: memref<1x64xf32, #tpu.memory_space<vmem>>, %arg10: memref<5x64x64xf32, #tpu.memory_space<vmem>>, %arg11: memref<1x64xf32, #tpu.memory_space<vmem>>, %arg12: memref<1x64x64xf32, #tpu.memory_space<vmem>>, %arg13: memref<1x64xf32, #tpu.memory_space<vmem>>, %arg14: memref<5x64x64xf32, #tpu.memory_space<vmem>>, %arg15: memref<1x64xf32, #tpu.memory_space<vmem>>, %arg16: memref<1x64x64xf32, #tpu.memory_space<vmem>>, %arg17: memref<1x64xf32, #tpu.memory_space<vmem>>, %arg18: memref<1x8x64xf32, #tpu.memory_space<vmem>>, %arg19: memref<80x64xf32, #tpu.memory_space<vmem>>) attributes {dimension_semantics = [#tpu.dimension_semantics<parallel>], iteration_bounds = array<i64: 2>, scalar_prefetch = 0 : i64, scratch_operands = 1 : i64, tpu.core_type = #tpu.core_type<tc>, window_params = [{transform_indices = @transform_0, window_bounds = array<i64: 1, 64, 4>}, {pipeline_mode = #tpu.pipeline_mode<synchronous>, transform_indices = @transform_1, window_bounds = array<i64: 15, 4, 64>}, {pipeline_mode = #tpu.pipeline_mode<synchronous>, transform_indices = @transform_2, window_bounds = array<i64: 1, 64>}, {pipeline_mode = #tpu.pipeline_mode<synchronous>, transform_indices = @transform_3, window_bounds = array<i64: 1, 64, 64>}, {pipeline_mode = #tpu.pipeline_mode<synchronous>, transform_indices = @transform_4, window_bounds = array<i64: 1, 64>}, {pipeline_mode = #tpu.pipeline_mode<synchronous>, transform_indices = @transform_5, window_bounds = array<i64: 5, 64, 64>}, {pipeline_mode = #tpu.pipeline_mode<synchronous>, transform_indices = @transform_6, window_bounds = array<i64: 1, 64>}, {pipeline_mode = #tpu.pipeline_mode<synchronous>, transform_indices = @transform_7, window_bounds = array<i64: 1, 64, 64>}, {pipeline_mode = #tpu.pipeline_mode<synchronous>, transform_indices = @transform_8, window_bounds = array<i64: 1, 64>}, {pipeline_mode = #tpu.pipeline_mode<synchronous>, transform_indices = @transform_9, window_bounds = array<i64: 5, 64, 64>}, {pipeline_mode = #tpu.pipeline_mode<synchronous>, transform_indices = @transform_10, window_bounds = array<i64: 1, 64>}, {pipeline_mode = #tpu.pipeline_mode<synchronous>, transform_indices = @transform_11, window_bounds = array<i64: 1, 64, 64>}, {pipeline_mode = #tpu.pipeline_mode<synchronous>, transform_indices = @transform_12, window_bounds = array<i64: 1, 64>}, {pipeline_mode = #tpu.pipeline_mode<synchronous>, transform_indices = @transform_13, window_bounds = array<i64: 5, 64, 64>}, {pipeline_mode = #tpu.pipeline_mode<synchronous>, transform_indices = @transform_14, window_bounds = array<i64: 1, 64>}, {pipeline_mode = #tpu.pipeline_mode<synchronous>, transform_indices = @transform_15, window_bounds = array<i64: 1, 64, 64>}, {pipeline_mode = #tpu.pipeline_mode<synchronous>, transform_indices = @transform_16, window_bounds = array<i64: 1, 64>}, {transform_indices = @transform_17, window_bounds = array<i64: 1, 8, 64>}]} {
    %c0 = arith.constant 0 : index
    %c0_0 = arith.constant 0 : index
    %c0_1 = arith.constant 0 : index
    %0 = vector.load %arg1[%c0, %c0_0, %c0_1] : memref<1x64x4xf32, #tpu.memory_space<vmem>>, vector<1x64x4xf32>
    %1 = vector.shape_cast %0 : vector<1x64x4xf32> to vector<64x4xf32>
    %c0_2 = arith.constant 0 : index
    %c0_3 = arith.constant 0 : index
    %2 = vector.load %arg3[%c0_2, %c0_3] : memref<1x64xf32, #tpu.memory_space<vmem>>, vector<1x64xf32>
    %cst = arith.constant 0.000000e+00 : f32
    %3 = vector.broadcast %cst : f32 to vector<80x64xf32>
    %c0_4 = arith.constant 0 : index
    %c0_5 = arith.constant 0 : index
    %4 = vector.load %arg19[%c0_4, %c0_5] : memref<80x64xf32, #tpu.memory_space<vmem>>, vector<80x64xf32>
    tpu.vector_store %arg19[%c0_4, %c0_5], %3 {strides = array<i32>} : memref<80x64xf32, #tpu.memory_space<vmem>>, vector<80x64xf32>,
    %c8 = arith.constant 8 : index
    %c0_6 = arith.constant 0 : index
    %5 = vector.load %arg19[%c8, %c0_6] : memref<80x64xf32, #tpu.memory_space<vmem>>, vector<64x4xf32>
    tpu.vector_store %arg19[%c8, %c0_6], %1 {strides = array<i32>} : memref<80x64xf32, #tpu.memory_space<vmem>>, vector<64x4xf32>,
    %c1 = arith.constant 1 : index
    %c0_7 = arith.constant 0 : index
    %6 = vector.load %arg19[%c1, %c0_7] : memref<80x64xf32, #tpu.memory_space<vmem>>, vector<64x4xf32>
    %c0_8 = arith.constant 0 : index
    %c0_9 = arith.constant 0 : index
    %c0_10 = arith.constant 0 : index
    %7 = vector.load %arg2[%c0_8, %c0_9, %c0_10] : memref<15x4x64xf32, #tpu.memory_space<vmem>>, vector<1x4x64xf32>
    %8 = vector.shape_cast %7 : vector<1x4x64xf32> to vector<4x64xf32>
    %cst_11 = arith.constant dense<0.000000e+00> : vector<64x64xf32>
    %9 = tpu.matmul %6, %8, %cst_11 {dimension_numbers = #tpu.dot_dimension_numbers<[1], [0], [0], [1], [0, 0, 1, 1], [], []>} : vector<64x4xf32>, vector<4x64xf32>, vector<64x64xf32> -> vector<64x64xf32>
    %10 = vector.broadcast %2 : vector<1x64xf32> to vector<64x64xf32>
    %11 = arith.addf %9, %10 : vector<64x64xf32>
    %c2 = arith.constant 2 : index
    %c0_12 = arith.constant 0 : index
    %12 = vector.load %arg19[%c2, %c0_12] : memref<80x64xf32, #tpu.memory_space<vmem>>, vector<64x4xf32>
    %c1_13 = arith.constant 1 : index
    %c0_14 = arith.constant 0 : index
    %c0_15 = arith.constant 0 : index
    %13 = vector.load %arg2[%c1_13, %c0_14, %c0_15] : memref<15x4x64xf32, #tpu.memory_space<vmem>>, vector<1x4x64xf32>
    %14 = vector.shape_cast %13 : vector<1x4x64xf32> to vector<4x64xf32>
    %cst_16 = arith.constant dense<0.000000e+00> : vector<64x64xf32>
    %15 = tpu.matmul %12, %14, %cst_16 {dimension_numbers = #tpu.dot_dimension_numbers<[1], [0], [0], [1], [0, 0, 1, 1], [], []>} : vector<64x4xf32>, vector<4x64xf32>, vector<64x64xf32> -> vector<64x64xf32>
    %16 = arith.addf %11, %15 : vector<64x64xf32>
    %c3 = arith.constant 3 : index
    %c0_17 = arith.constant 0 : index
    %17 = vector.load %arg19[%c3, %c0_17] : memref<80x64xf32, #tpu.memory_space<vmem>>, vector<64x4xf32>
    %c2_18 = arith.constant 2 : index
    %c0_19 = arith.constant 0 : index
    %c0_20 = arith.constant 0 : index
    %18 = vector.load %arg2[%c2_18, %c0_19, %c0_20] : memref<15x4x64xf32, #tpu.memory_space<vmem>>, vector<1x4x64xf32>
    %19 = vector.shape_cast %18 : vector<1x4x64xf32> to vector<4x64xf32>
    %cst_21 = arith.constant dense<0.000000e+00> : vector<64x64xf32>
    %20 = tpu.matmul %17, %19, %cst_21 {dimension_numbers = #tpu.dot_dimension_numbers<[1], [0], [0], [1], [0, 0, 1, 1], [], []>} : vector<64x4xf32>, vector<4x64xf32>, vector<64x64xf32> -> vector<64x64xf32>
    %21 = arith.addf %16, %20 : vector<64x64xf32>
    %c4 = arith.constant 4 : index
    %c0_22 = arith.constant 0 : index
    %22 = vector.load %arg19[%c4, %c0_22] : memref<80x64xf32, #tpu.memory_space<vmem>>, vector<64x4xf32>
    %c3_23 = arith.constant 3 : index
    %c0_24 = arith.constant 0 : index
    %c0_25 = arith.constant 0 : index
    %23 = vector.load %arg2[%c3_23, %c0_24, %c0_25] : memref<15x4x64xf32, #tpu.memory_space<vmem>>, vector<1x4x64xf32>
    %24 = vector.shape_cast %23 : vector<1x4x64xf32> to vector<4x64xf32>
    %cst_26 = arith.constant dense<0.000000e+00> : vector<64x64xf32>
    %25 = tpu.matmul %22, %24, %cst_26 {dimension_numbers = #tpu.dot_dimension_numbers<[1], [0], [0], [1], [0, 0, 1, 1], [], []>} : vector<64x4xf32>, vector<4x64xf32>, vector<64x64xf32> -> vector<64x64xf32>
    %26 = arith.addf %21, %25 : vector<64x64xf32>
    %c5 = arith.constant 5 : index
    %c0_27 = arith.constant 0 : index
    %27 = vector.load %arg19[%c5, %c0_27] : memref<80x64xf32, #tpu.memory_space<vmem>>, vector<64x4xf32>
    %c4_28 = arith.constant 4 : index
    %c0_29 = arith.constant 0 : index
    %c0_30 = arith.constant 0 : index
    %28 = vector.load %arg2[%c4_28, %c0_29, %c0_30] : memref<15x4x64xf32, #tpu.memory_space<vmem>>, vector<1x4x64xf32>
    %29 = vector.shape_cast %28 : vector<1x4x64xf32> to vector<4x64xf32>
    %cst_31 = arith.constant dense<0.000000e+00> : vector<64x64xf32>
    %30 = tpu.matmul %27, %29, %cst_31 {dimension_numbers = #tpu.dot_dimension_numbers<[1], [0], [0], [1], [0, 0, 1, 1], [], []>} : vector<64x4xf32>, vector<4x64xf32>, vector<64x64xf32> -> vector<64x64xf32>
    %31 = arith.addf %26, %30 : vector<64x64xf32>
    %c6 = arith.constant 6 : index
    %c0_32 = arith.constant 0 : index
    %32 = vector.load %arg19[%c6, %c0_32] : memref<80x64xf32, #tpu.memory_space<vmem>>, vector<64x4xf32>
    %c5_33 = arith.constant 5 : index
    %c0_34 = arith.constant 0 : index
    %c0_35 = arith.constant 0 : index
    %33 = vector.load %arg2[%c5_33, %c0_34, %c0_35] : memref<15x4x64xf32, #tpu.memory_space<vmem>>, vector<1x4x64xf32>
    %34 = vector.shape_cast %33 : vector<1x4x64xf32> to vector<4x64xf32>
    %cst_36 = arith.constant dense<0.000000e+00> : vector<64x64xf32>
    %35 = tpu.matmul %32, %34, %cst_36 {dimension_numbers = #tpu.dot_dimension_numbers<[1], [0], [0], [1], [0, 0, 1, 1], [], []>} : vector<64x4xf32>, vector<4x64xf32>, vector<64x64xf32> -> vector<64x64xf32>
    %36 = arith.addf %31, %35 : vector<64x64xf32>
    %c7 = arith.constant 7 : index
    %c0_37 = arith.constant 0 : index
    %37 = vector.load %arg19[%c7, %c0_37] : memref<80x64xf32, #tpu.memory_space<vmem>>, vector<64x4xf32>
    %c6_38 = arith.constant 6 : index
    %c0_39 = arith.constant 0 : index
    %c0_40 = arith.constant 0 : index
    %38 = vector.load %arg2[%c6_38, %c0_39, %c0_40] : memref<15x4x64xf32, #tpu.memory_space<vmem>>, vector<1x4x64xf32>
    %39 = vector.shape_cast %38 : vector<1x4x64xf32> to vector<4x64xf32>
    %cst_41 = arith.constant dense<0.000000e+00> : vector<64x64xf32>
    %40 = tpu.matmul %37, %39, %cst_41 {dimension_numbers = #tpu.dot_dimension_numbers<[1], [0], [0], [1], [0, 0, 1, 1], [], []>} : vector<64x4xf32>, vector<4x64xf32>, vector<64x64xf32> -> vector<64x64xf32>
    %41 = arith.addf %36, %40 : vector<64x64xf32>
    %c8_42 = arith.constant 8 : index
    %c0_43 = arith.constant 0 : index
    %42 = vector.load %arg19[%c8_42, %c0_43] : memref<80x64xf32, #tpu.memory_space<vmem>>, vector<64x4xf32>
    %c7_44 = arith.constant 7 : index
    %c0_45 = arith.constant 0 : index
    %c0_46 = arith.constant 0 : index
    %43 = vector.load %arg2[%c7_44, %c0_45, %c0_46] : memref<15x4x64xf32, #tpu.memory_space<vmem>>, vector<1x4x64xf32>
    %44 = vector.shape_cast %43 : vector<1x4x64xf32> to vector<4x64xf32>
    %cst_47 = arith.constant dense<0.000000e+00> : vector<64x64xf32>
    %45 = tpu.matmul %42, %44, %cst_47 {dimension_numbers = #tpu.dot_dimension_numbers<[1], [0], [0], [1], [0, 0, 1, 1], [], []>} : vector<64x4xf32>, vector<4x64xf32>, vector<64x64xf32> -> vector<64x64xf32>
    %46 = arith.addf %41, %45 : vector<64x64xf32>
    %c9 = arith.constant 9 : index
    %c0_48 = arith.constant 0 : index
    %47 = vector.load %arg19[%c9, %c0_48] : memref<80x64xf32, #tpu.memory_space<vmem>>, vector<64x4xf32>
    %c8_49 = arith.constant 8 : index
    %c0_50 = arith.constant 0 : index
    %c0_51 = arith.constant 0 : index
    %48 = vector.load %arg2[%c8_49, %c0_50, %c0_51] : memref<15x4x64xf32, #tpu.memory_space<vmem>>, vector<1x4x64xf32>
    %49 = vector.shape_cast %48 : vector<1x4x64xf32> to vector<4x64xf32>
    %cst_52 = arith.constant dense<0.000000e+00> : vector<64x64xf32>
    %50 = tpu.matmul %47, %49, %cst_52 {dimension_numbers = #tpu.dot_dimension_numbers<[1], [0], [0], [1], [0, 0, 1, 1], [], []>} : vector<64x4xf32>, vector<4x64xf32>, vector<64x64xf32> -> vector<64x64xf32>
    %51 = arith.addf %46, %50 : vector<64x64xf32>
    %c10 = arith.constant 10 : index
    %c0_53 = arith.constant 0 : index
    %52 = vector.load %arg19[%c10, %c0_53] : memref<80x64xf32, #tpu.memory_space<vmem>>, vector<64x4xf32>
    %c9_54 = arith.constant 9 : index
    %c0_55 = arith.constant 0 : index
    %c0_56 = arith.constant 0 : index
    %53 = vector.load %arg2[%c9_54, %c0_55, %c0_56] : memref<15x4x64xf32, #tpu.memory_space<vmem>>, vector<1x4x64xf32>
    %54 = vector.shape_cast %53 : vector<1x4x64xf32> to vector<4x64xf32>
    %cst_57 = arith.constant dense<0.000000e+00> : vector<64x64xf32>
    %55 = tpu.matmul %52, %54, %cst_57 {dimension_numbers = #tpu.dot_dimension_numbers<[1], [0], [0], [1], [0, 0, 1, 1], [], []>} : vector<64x4xf32>, vector<4x64xf32>, vector<64x64xf32> -> vector<64x64xf32>
    %56 = arith.addf %51, %55 : vector<64x64xf32>
    %c11 = arith.constant 11 : index
    %c0_58 = arith.constant 0 : index
    %57 = vector.load %arg19[%c11, %c0_58] : memref<80x64xf32, #tpu.memory_space<vmem>>, vector<64x4xf32>
    %c10_59 = arith.constant 10 : index
    %c0_60 = arith.constant 0 : index
    %c0_61 = arith.constant 0 : index
    %58 = vector.load %arg2[%c10_59, %c0_60, %c0_61] : memref<15x4x64xf32, #tpu.memory_space<vmem>>, vector<1x4x64xf32>
    %59 = vector.shape_cast %58 : vector<1x4x64xf32> to vector<4x64xf32>
    %cst_62 = arith.constant dense<0.000000e+00> : vector<64x64xf32>
    %60 = tpu.matmul %57, %59, %cst_62 {dimension_numbers = #tpu.dot_dimension_numbers<[1], [0], [0], [1], [0, 0, 1, 1], [], []>} : vector<64x4xf32>, vector<4x64xf32>, vector<64x64xf32> -> vector<64x64xf32>
    %61 = arith.addf %56, %60 : vector<64x64xf32>
    %c12 = arith.constant 12 : index
    %c0_63 = arith.constant 0 : index
    %62 = vector.load %arg19[%c12, %c0_63] : memref<80x64xf32, #tpu.memory_space<vmem>>, vector<64x4xf32>
    %c11_64 = arith.constant 11 : index
    %c0_65 = arith.constant 0 : index
    %c0_66 = arith.constant 0 : index
    %63 = vector.load %arg2[%c11_64, %c0_65, %c0_66] : memref<15x4x64xf32, #tpu.memory_space<vmem>>, vector<1x4x64xf32>
    %64 = vector.shape_cast %63 : vector<1x4x64xf32> to vector<4x64xf32>
    %cst_67 = arith.constant dense<0.000000e+00> : vector<64x64xf32>
    %65 = tpu.matmul %62, %64, %cst_67 {dimension_numbers = #tpu.dot_dimension_numbers<[1], [0], [0], [1], [0, 0, 1, 1], [], []>} : vector<64x4xf32>, vector<4x64xf32>, vector<64x64xf32> -> vector<64x64xf32>
    %66 = arith.addf %61, %65 : vector<64x64xf32>
    %c13 = arith.constant 13 : index
    %c0_68 = arith.constant 0 : index
    %67 = vector.load %arg19[%c13, %c0_68] : memref<80x64xf32, #tpu.memory_space<vmem>>, vector<64x4xf32>
    %c12_69 = arith.constant 12 : index
    %c0_70 = arith.constant 0 : index
    %c0_71 = arith.constant 0 : index
    %68 = vector.load %arg2[%c12_69, %c0_70, %c0_71] : memref<15x4x64xf32, #tpu.memory_space<vmem>>, vector<1x4x64xf32>
    %69 = vector.shape_cast %68 : vector<1x4x64xf32> to vector<4x64xf32>
    %cst_72 = arith.constant dense<0.000000e+00> : vector<64x64xf32>
    %70 = tpu.matmul %67, %69, %cst_72 {dimension_numbers = #tpu.dot_dimension_numbers<[1], [0], [0], [1], [0, 0, 1, 1], [], []>} : vector<64x4xf32>, vector<4x64xf32>, vector<64x64xf32> -> vector<64x64xf32>
    %71 = arith.addf %66, %70 : vector<64x64xf32>
    %c14 = arith.constant 14 : index
    %c0_73 = arith.constant 0 : index
    %72 = vector.load %arg19[%c14, %c0_73] : memref<80x64xf32, #tpu.memory_space<vmem>>, vector<64x4xf32>
    %c13_74 = arith.constant 13 : index
    %c0_75 = arith.constant 0 : index
    %c0_76 = arith.constant 0 : index
    %73 = vector.load %arg2[%c13_74, %c0_75, %c0_76] : memref<15x4x64xf32, #tpu.memory_space<vmem>>, vector<1x4x64xf32>
    %74 = vector.shape_cast %73 : vector<1x4x64xf32> to vector<4x64xf32>
    %cst_77 = arith.constant dense<0.000000e+00> : vector<64x64xf32>
    %75 = tpu.matmul %72, %74, %cst_77 {dimension_numbers = #tpu.dot_dimension_numbers<[1], [0], [0], [1], [0, 0, 1, 1], [], []>} : vector<64x4xf32>, vector<4x64xf32>, vector<64x64xf32> -> vector<64x64xf32>
    %76 = arith.addf %71, %75 : vector<64x64xf32>
    %c15 = arith.constant 15 : index
    %c0_78 = arith.constant 0 : index
    %77 = vector.load %arg19[%c15, %c0_78] : memref<80x64xf32, #tpu.memory_space<vmem>>, vector<64x4xf32>
    %c14_79 = arith.constant 14 : index
    %c0_80 = arith.constant 0 : index
    %c0_81 = arith.constant 0 : index
    %78 = vector.load %arg2[%c14_79, %c0_80, %c0_81] : memref<15x4x64xf32, #tpu.memory_space<vmem>>, vector<1x4x64xf32>
    %79 = vector.shape_cast %78 : vector<1x4x64xf32> to vector<4x64xf32>
    %cst_82 = arith.constant dense<0.000000e+00> : vector<64x64xf32>
    %80 = tpu.matmul %77, %79, %cst_82 {dimension_numbers = #tpu.dot_dimension_numbers<[1], [0], [0], [1], [0, 0, 1, 1], [], []>} : vector<64x4xf32>, vector<4x64xf32>, vector<64x64xf32> -> vector<64x64xf32>
    %81 = arith.addf %76, %80 : vector<64x64xf32>
    %cst_83 = arith.constant 5.000000e-01 : f32
    %82 = vector.broadcast %cst_83 : f32 to vector<64x64xf32>
    %83 = arith.mulf %82, %81 : vector<64x64xf32>
    %cst_84 = arith.constant 0.707106769 : f32
    %84 = vector.broadcast %cst_84 : f32 to vector<64x64xf32>
    %85 = arith.mulf %81, %84 : vector<64x64xf32>
    %86 = math.absf %85 : vector<64x64xf32>
    %cst_85 = arith.constant 0.327591091 : f32
    %87 = vector.broadcast %cst_85 : f32 to vector<64x64xf32>
    %88 = arith.mulf %87, %86 : vector<64x64xf32>
    %cst_86 = arith.constant 1.000000e+00 : f32
    %89 = vector.broadcast %cst_86 : f32 to vector<64x64xf32>
    %90 = arith.addf %89, %88 : vector<64x64xf32>
    %cst_87 = arith.constant 1.000000e+00 : f32
    %91 = vector.broadcast %cst_87 : f32 to vector<64x64xf32>
    %92 = arith.divf %91, %90 : vector<64x64xf32>
    %cst_88 = arith.constant 1.06140542 : f32
    %93 = vector.broadcast %cst_88 : f32 to vector<64x64xf32>
    %94 = arith.mulf %93, %92 : vector<64x64xf32>
    %cst_89 = arith.constant -1.45315206 : f32
    %95 = vector.broadcast %cst_89 : f32 to vector<64x64xf32>
    %96 = arith.addf %94, %95 : vector<64x64xf32>
    %97 = arith.mulf %96, %92 : vector<64x64xf32>
    %cst_90 = arith.constant 1.42141378 : f32
    %98 = vector.broadcast %cst_90 : f32 to vector<64x64xf32>
    %99 = arith.addf %97, %98 : vector<64x64xf32>
    %100 = arith.mulf %99, %92 : vector<64x64xf32>
    %cst_91 = arith.constant -0.284496725 : f32
    %101 = vector.broadcast %cst_91 : f32 to vector<64x64xf32>
    %102 = arith.addf %100, %101 : vector<64x64xf32>
    %103 = arith.mulf %102, %92 : vector<64x64xf32>
    %cst_92 = arith.constant 0.254829586 : f32
    %104 = vector.broadcast %cst_92 : f32 to vector<64x64xf32>
    %105 = arith.addf %103, %104 : vector<64x64xf32>
    %106 = arith.mulf %105, %92 : vector<64x64xf32>
    %cst_93 = arith.constant 0.000000e+00 : f32
    %107 = vector.broadcast %cst_93 : f32 to vector<64x64xf32>
    %108 = arith.subf %107, %86 : vector<64x64xf32>
    %109 = arith.mulf %108, %86 : vector<64x64xf32>
    %110 = math.exp %109 : vector<64x64xf32>
    %111 = arith.mulf %106, %110 : vector<64x64xf32>
    %cst_94 = arith.constant 1.000000e+00 : f32
    %112 = vector.broadcast %cst_94 : f32 to vector<64x64xf32>
    %113 = arith.subf %112, %111 : vector<64x64xf32>
    %cst_95 = arith.constant 0.000000e+00 : f32
    %114 = vector.broadcast %cst_95 : f32 to vector<64x64xf32>
    %115 = arith.cmpf oge, %85, %114 : vector<64x64xf32>
    %cst_96 = arith.constant 0.000000e+00 : f32
    %116 = vector.broadcast %cst_96 : f32 to vector<64x64xf32>
    %117 = arith.subf %116, %113 : vector<64x64xf32>
    %118 = arith.select %115, %113, %117 : vector<64x64xi1>, vector<64x64xf32>
    %cst_97 = arith.constant 1.000000e+00 : f32
    %119 = vector.broadcast %cst_97 : f32 to vector<64x64xf32>
    %120 = arith.addf %119, %118 : vector<64x64xf32>
    %121 = arith.mulf %83, %120 : vector<64x64xf32>
    %c0_98 = arith.constant 0 : index
    %c0_99 = arith.constant 0 : index
    %122 = vector.load %arg5[%c0_98, %c0_99] : memref<1x64xf32, #tpu.memory_space<vmem>>, vector<1x64xf32>
    %c0_100 = arith.constant 0 : index
    %c0_101 = arith.constant 0 : index
    %c0_102 = arith.constant 0 : index
    %123 = vector.load %arg4[%c0_100, %c0_101, %c0_102] : memref<1x64x64xf32, #tpu.memory_space<vmem>>, vector<1x64x64xf32>
    %124 = vector.shape_cast %123 : vector<1x64x64xf32> to vector<64x64xf32>
    %cst_103 = arith.constant dense<0.000000e+00> : vector<64x64xf32>
    %125 = tpu.matmul %121, %124, %cst_103 {dimension_numbers = #tpu.dot_dimension_numbers<[1], [0], [0], [1], [0, 0, 1, 1], [], []>} : vector<64x64xf32>, vector<64x64xf32>, vector<64x64xf32> -> vector<64x64xf32>
    %126 = vector.broadcast %122 : vector<1x64xf32> to vector<64x64xf32>
    %127 = arith.addf %125, %126 : vector<64x64xf32>
    %cst_104 = arith.constant 5.000000e-01 : f32
    %128 = vector.broadcast %cst_104 : f32 to vector<64x64xf32>
    %129 = arith.mulf %128, %127 : vector<64x64xf32>
    %cst_105 = arith.constant 0.707106769 : f32
    %130 = vector.broadcast %cst_105 : f32 to vector<64x64xf32>
    %131 = arith.mulf %127, %130 : vector<64x64xf32>
    %132 = math.absf %131 : vector<64x64xf32>
    %cst_106 = arith.constant 0.327591091 : f32
    %133 = vector.broadcast %cst_106 : f32 to vector<64x64xf32>
    %134 = arith.mulf %133, %132 : vector<64x64xf32>
    %cst_107 = arith.constant 1.000000e+00 : f32
    %135 = vector.broadcast %cst_107 : f32 to vector<64x64xf32>
    %136 = arith.addf %135, %134 : vector<64x64xf32>
    %cst_108 = arith.constant 1.000000e+00 : f32
    %137 = vector.broadcast %cst_108 : f32 to vector<64x64xf32>
    %138 = arith.divf %137, %136 : vector<64x64xf32>
    %cst_109 = arith.constant 1.06140542 : f32
    %139 = vector.broadcast %cst_109 : f32 to vector<64x64xf32>
    %140 = arith.mulf %139, %138 : vector<64x64xf32>
    %cst_110 = arith.constant -1.45315206 : f32
    %141 = vector.broadcast %cst_110 : f32 to vector<64x64xf32>
    %142 = arith.addf %140, %141 : vector<64x64xf32>
    %143 = arith.mulf %142, %138 : vector<64x64xf32>
    %cst_111 = arith.constant 1.42141378 : f32
    %144 = vector.broadcast %cst_111 : f32 to vector<64x64xf32>
    %145 = arith.addf %143, %144 : vector<64x64xf32>
    %146 = arith.mulf %145, %138 : vector<64x64xf32>
    %cst_112 = arith.constant -0.284496725 : f32
    %147 = vector.broadcast %cst_112 : f32 to vector<64x64xf32>
    %148 = arith.addf %146, %147 : vector<64x64xf32>
    %149 = arith.mulf %148, %138 : vector<64x64xf32>
    %cst_113 = arith.constant 0.254829586 : f32
    %150 = vector.broadcast %cst_113 : f32 to vector<64x64xf32>
    %151 = arith.addf %149, %150 : vector<64x64xf32>
    %152 = arith.mulf %151, %138 : vector<64x64xf32>
    %cst_114 = arith.constant 0.000000e+00 : f32
    %153 = vector.broadcast %cst_114 : f32 to vector<64x64xf32>
    %154 = arith.subf %153, %132 : vector<64x64xf32>
    %155 = arith.mulf %154, %132 : vector<64x64xf32>
    %156 = math.exp %155 : vector<64x64xf32>
    %157 = arith.mulf %152, %156 : vector<64x64xf32>
    %cst_115 = arith.constant 1.000000e+00 : f32
    %158 = vector.broadcast %cst_115 : f32 to vector<64x64xf32>
    %159 = arith.subf %158, %157 : vector<64x64xf32>
    %cst_116 = arith.constant 0.000000e+00 : f32
    %160 = vector.broadcast %cst_116 : f32 to vector<64x64xf32>
    %161 = arith.cmpf oge, %131, %160 : vector<64x64xf32>
    %cst_117 = arith.constant 0.000000e+00 : f32
    %162 = vector.broadcast %cst_117 : f32 to vector<64x64xf32>
    %163 = arith.subf %162, %159 : vector<64x64xf32>
    %164 = arith.select %161, %159, %163 : vector<64x64xi1>, vector<64x64xf32>
    %cst_118 = arith.constant 1.000000e+00 : f32
    %165 = vector.broadcast %cst_118 : f32 to vector<64x64xf32>
    %166 = arith.addf %165, %164 : vector<64x64xf32>
    %167 = arith.mulf %129, %166 : vector<64x64xf32>
    %168 = arith.addf %167, %121 : vector<64x64xf32>
    %c0_119 = arith.constant 0 : index
    %c0_120 = arith.constant 0 : index
    %169 = vector.load %arg7[%c0_119, %c0_120] : memref<1x64xf32, #tpu.memory_space<vmem>>, vector<1x64xf32>
    %cst_121 = arith.constant 0.000000e+00 : f32
    %170 = vector.broadcast %cst_121 : f32 to vector<80x64xf32>
    %c0_122 = arith.constant 0 : index
    %c0_123 = arith.constant 0 : index
    %171 = vector.load %arg19[%c0_122, %c0_123] : memref<80x64xf32, #tpu.memory_space<vmem>>, vector<80x64xf32>
    tpu.vector_store %arg19[%c0_122, %c0_123], %170 {strides = array<i32>} : memref<80x64xf32, #tpu.memory_space<vmem>>, vector<80x64xf32>,
    %c8_124 = arith.constant 8 : index
    %c0_125 = arith.constant 0 : index
    %172 = vector.load %arg19[%c8_124, %c0_125] : memref<80x64xf32, #tpu.memory_space<vmem>>, vector<64x64xf32>
    tpu.vector_store %arg19[%c8_124, %c0_125], %168 {strides = array<i32>} : memref<80x64xf32, #tpu.memory_space<vmem>>, vector<64x64xf32>,
    %c6_126 = arith.constant 6 : index
    %c0_127 = arith.constant 0 : index
    %173 = vector.load %arg19[%c6_126, %c0_127] : memref<80x64xf32, #tpu.memory_space<vmem>>, vector<64x64xf32>
    %c0_128 = arith.constant 0 : index
    %c0_129 = arith.constant 0 : index
    %c0_130 = arith.constant 0 : index
    %174 = vector.load %arg6[%c0_128, %c0_129, %c0_130] : memref<5x64x64xf32, #tpu.memory_space<vmem>>, vector<1x64x64xf32>
    %175 = vector.shape_cast %174 : vector<1x64x64xf32> to vector<64x64xf32>
    %cst_131 = arith.constant dense<0.000000e+00> : vector<64x64xf32>
    %176 = tpu.matmul %173, %175, %cst_131 {dimension_numbers = #tpu.dot_dimension_numbers<[1], [0], [0], [1], [0, 0, 1, 1], [], []>} : vector<64x64xf32>, vector<64x64xf32>, vector<64x64xf32> -> vector<64x64xf32>
    %177 = vector.broadcast %169 : vector<1x64xf32> to vector<64x64xf32>
    %178 = arith.addf %176, %177 : vector<64x64xf32>
    %c7_132 = arith.constant 7 : index
    %c0_133 = arith.constant 0 : index
    %179 = vector.load %arg19[%c7_132, %c0_133] : memref<80x64xf32, #tpu.memory_space<vmem>>, vector<64x64xf32>
    %c1_134 = arith.constant 1 : index
    %c0_135 = arith.constant 0 : index
    %c0_136 = arith.constant 0 : index
    %180 = vector.load %arg6[%c1_134, %c0_135, %c0_136] : memref<5x64x64xf32, #tpu.memory_space<vmem>>, vector<1x64x64xf32>
    %181 = vector.shape_cast %180 : vector<1x64x64xf32> to vector<64x64xf32>
    %cst_137 = arith.constant dense<0.000000e+00> : vector<64x64xf32>
    %182 = tpu.matmul %179, %181, %cst_137 {dimension_numbers = #tpu.dot_dimension_numbers<[1], [0], [0], [1], [0, 0, 1, 1], [], []>} : vector<64x64xf32>, vector<64x64xf32>, vector<64x64xf32> -> vector<64x64xf32>
    %183 = arith.addf %178, %182 : vector<64x64xf32>
    %c8_138 = arith.constant 8 : index
    %c0_139 = arith.constant 0 : index
    %184 = vector.load %arg19[%c8_138, %c0_139] : memref<80x64xf32, #tpu.memory_space<vmem>>, vector<64x64xf32>
    %c2_140 = arith.constant 2 : index
    %c0_141 = arith.constant 0 : index
    %c0_142 = arith.constant 0 : index
    %185 = vector.load %arg6[%c2_140, %c0_141, %c0_142] : memref<5x64x64xf32, #tpu.memory_space<vmem>>, vector<1x64x64xf32>
    %186 = vector.shape_cast %185 : vector<1x64x64xf32> to vector<64x64xf32>
    %cst_143 = arith.constant dense<0.000000e+00> : vector<64x64xf32>
    %187 = tpu.matmul %184, %186, %cst_143 {dimension_numbers = #tpu.dot_dimension_numbers<[1], [0], [0], [1], [0, 0, 1, 1], [], []>} : vector<64x64xf32>, vector<64x64xf32>, vector<64x64xf32> -> vector<64x64xf32>
    %188 = arith.addf %183, %187 : vector<64x64xf32>
    %c9_144 = arith.constant 9 : index
    %c0_145 = arith.constant 0 : index
    %189 = vector.load %arg19[%c9_144, %c0_145] : memref<80x64xf32, #tpu.memory_space<vmem>>, vector<64x64xf32>
    %c3_146 = arith.constant 3 : index
    %c0_147 = arith.constant 0 : index
    %c0_148 = arith.constant 0 : index
    %190 = vector.load %arg6[%c3_146, %c0_147, %c0_148] : memref<5x64x64xf32, #tpu.memory_space<vmem>>, vector<1x64x64xf32>
    %191 = vector.shape_cast %190 : vector<1x64x64xf32> to vector<64x64xf32>
    %cst_149 = arith.constant dense<0.000000e+00> : vector<64x64xf32>
    %192 = tpu.matmul %189, %191, %cst_149 {dimension_numbers = #tpu.dot_dimension_numbers<[1], [0], [0], [1], [0, 0, 1, 1], [], []>} : vector<64x64xf32>, vector<64x64xf32>, vector<64x64xf32> -> vector<64x64xf32>
    %193 = arith.addf %188, %192 : vector<64x64xf32>
    %c10_150 = arith.constant 10 : index
    %c0_151 = arith.constant 0 : index
    %194 = vector.load %arg19[%c10_150, %c0_151] : memref<80x64xf32, #tpu.memory_space<vmem>>, vector<64x64xf32>
    %c4_152 = arith.constant 4 : index
    %c0_153 = arith.constant 0 : index
    %c0_154 = arith.constant 0 : index
    %195 = vector.load %arg6[%c4_152, %c0_153, %c0_154] : memref<5x64x64xf32, #tpu.memory_space<vmem>>, vector<1x64x64xf32>
    %196 = vector.shape_cast %195 : vector<1x64x64xf32> to vector<64x64xf32>
    %cst_155 = arith.constant dense<0.000000e+00> : vector<64x64xf32>
    %197 = tpu.matmul %194, %196, %cst_155 {dimension_numbers = #tpu.dot_dimension_numbers<[1], [0], [0], [1], [0, 0, 1, 1], [], []>} : vector<64x64xf32>, vector<64x64xf32>, vector<64x64xf32> -> vector<64x64xf32>
    %198 = arith.addf %193, %197 : vector<64x64xf32>
    %cst_156 = arith.constant 5.000000e-01 : f32
    %199 = vector.broadcast %cst_156 : f32 to vector<64x64xf32>
    %200 = arith.mulf %199, %198 : vector<64x64xf32>
    %cst_157 = arith.constant 0.707106769 : f32
    %201 = vector.broadcast %cst_157 : f32 to vector<64x64xf32>
    %202 = arith.mulf %198, %201 : vector<64x64xf32>
    %203 = math.absf %202 : vector<64x64xf32>
    %cst_158 = arith.constant 0.327591091 : f32
    %204 = vector.broadcast %cst_158 : f32 to vector<64x64xf32>
    %205 = arith.mulf %204, %203 : vector<64x64xf32>
    %cst_159 = arith.constant 1.000000e+00 : f32
    %206 = vector.broadcast %cst_159 : f32 to vector<64x64xf32>
    %207 = arith.addf %206, %205 : vector<64x64xf32>
    %cst_160 = arith.constant 1.000000e+00 : f32
    %208 = vector.broadcast %cst_160 : f32 to vector<64x64xf32>
    %209 = arith.divf %208, %207 : vector<64x64xf32>
    %cst_161 = arith.constant 1.06140542 : f32
    %210 = vector.broadcast %cst_161 : f32 to vector<64x64xf32>
    %211 = arith.mulf %210, %209 : vector<64x64xf32>
    %cst_162 = arith.constant -1.45315206 : f32
    %212 = vector.broadcast %cst_162 : f32 to vector<64x64xf32>
    %213 = arith.addf %211, %212 : vector<64x64xf32>
    %214 = arith.mulf %213, %209 : vector<64x64xf32>
    %cst_163 = arith.constant 1.42141378 : f32
    %215 = vector.broadcast %cst_163 : f32 to vector<64x64xf32>
    %216 = arith.addf %214, %215 : vector<64x64xf32>
    %217 = arith.mulf %216, %209 : vector<64x64xf32>
    %cst_164 = arith.constant -0.284496725 : f32
    %218 = vector.broadcast %cst_164 : f32 to vector<64x64xf32>
    %219 = arith.addf %217, %218 : vector<64x64xf32>
    %220 = arith.mulf %219, %209 : vector<64x64xf32>
    %cst_165 = arith.constant 0.254829586 : f32
    %221 = vector.broadcast %cst_165 : f32 to vector<64x64xf32>
    %222 = arith.addf %220, %221 : vector<64x64xf32>
    %223 = arith.mulf %222, %209 : vector<64x64xf32>
    %cst_166 = arith.constant 0.000000e+00 : f32
    %224 = vector.broadcast %cst_166 : f32 to vector<64x64xf32>
    %225 = arith.subf %224, %203 : vector<64x64xf32>
    %226 = arith.mulf %225, %203 : vector<64x64xf32>
    %227 = math.exp %226 : vector<64x64xf32>
    %228 = arith.mulf %223, %227 : vector<64x64xf32>
    %cst_167 = arith.constant 1.000000e+00 : f32
    %229 = vector.broadcast %cst_167 : f32 to vector<64x64xf32>
    %230 = arith.subf %229, %228 : vector<64x64xf32>
    %cst_168 = arith.constant 0.000000e+00 : f32
    %231 = vector.broadcast %cst_168 : f32 to vector<64x64xf32>
    %232 = arith.cmpf oge, %202, %231 : vector<64x64xf32>
    %cst_169 = arith.constant 0.000000e+00 : f32
    %233 = vector.broadcast %cst_169 : f32 to vector<64x64xf32>
    %234 = arith.subf %233, %230 : vector<64x64xf32>
    %235 = arith.select %232, %230, %234 : vector<64x64xi1>, vector<64x64xf32>
    %cst_170 = arith.constant 1.000000e+00 : f32
    %236 = vector.broadcast %cst_170 : f32 to vector<64x64xf32>
    %237 = arith.addf %236, %235 : vector<64x64xf32>
    %238 = arith.mulf %200, %237 : vector<64x64xf32>
    %c0_171 = arith.constant 0 : index
    %c0_172 = arith.constant 0 : index
    %239 = vector.load %arg9[%c0_171, %c0_172] : memref<1x64xf32, #tpu.memory_space<vmem>>, vector<1x64xf32>
    %c0_173 = arith.constant 0 : index
    %c0_174 = arith.constant 0 : index
    %c0_175 = arith.constant 0 : index
    %240 = vector.load %arg8[%c0_173, %c0_174, %c0_175] : memref<1x64x64xf32, #tpu.memory_space<vmem>>, vector<1x64x64xf32>
    %241 = vector.shape_cast %240 : vector<1x64x64xf32> to vector<64x64xf32>
    %cst_176 = arith.constant dense<0.000000e+00> : vector<64x64xf32>
    %242 = tpu.matmul %238, %241, %cst_176 {dimension_numbers = #tpu.dot_dimension_numbers<[1], [0], [0], [1], [0, 0, 1, 1], [], []>} : vector<64x64xf32>, vector<64x64xf32>, vector<64x64xf32> -> vector<64x64xf32>
    %243 = vector.broadcast %239 : vector<1x64xf32> to vector<64x64xf32>
    %244 = arith.addf %242, %243 : vector<64x64xf32>
    %cst_177 = arith.constant 5.000000e-01 : f32
    %245 = vector.broadcast %cst_177 : f32 to vector<64x64xf32>
    %246 = arith.mulf %245, %244 : vector<64x64xf32>
    %cst_178 = arith.constant 0.707106769 : f32
    %247 = vector.broadcast %cst_178 : f32 to vector<64x64xf32>
    %248 = arith.mulf %244, %247 : vector<64x64xf32>
    %249 = math.absf %248 : vector<64x64xf32>
    %cst_179 = arith.constant 0.327591091 : f32
    %250 = vector.broadcast %cst_179 : f32 to vector<64x64xf32>
    %251 = arith.mulf %250, %249 : vector<64x64xf32>
    %cst_180 = arith.constant 1.000000e+00 : f32
    %252 = vector.broadcast %cst_180 : f32 to vector<64x64xf32>
    %253 = arith.addf %252, %251 : vector<64x64xf32>
    %cst_181 = arith.constant 1.000000e+00 : f32
    %254 = vector.broadcast %cst_181 : f32 to vector<64x64xf32>
    %255 = arith.divf %254, %253 : vector<64x64xf32>
    %cst_182 = arith.constant 1.06140542 : f32
    %256 = vector.broadcast %cst_182 : f32 to vector<64x64xf32>
    %257 = arith.mulf %256, %255 : vector<64x64xf32>
    %cst_183 = arith.constant -1.45315206 : f32
    %258 = vector.broadcast %cst_183 : f32 to vector<64x64xf32>
    %259 = arith.addf %257, %258 : vector<64x64xf32>
    %260 = arith.mulf %259, %255 : vector<64x64xf32>
    %cst_184 = arith.constant 1.42141378 : f32
    %261 = vector.broadcast %cst_184 : f32 to vector<64x64xf32>
    %262 = arith.addf %260, %261 : vector<64x64xf32>
    %263 = arith.mulf %262, %255 : vector<64x64xf32>
    %cst_185 = arith.constant -0.284496725 : f32
    %264 = vector.broadcast %cst_185 : f32 to vector<64x64xf32>
    %265 = arith.addf %263, %264 : vector<64x64xf32>
    %266 = arith.mulf %265, %255 : vector<64x64xf32>
    %cst_186 = arith.constant 0.254829586 : f32
    %267 = vector.broadcast %cst_186 : f32 to vector<64x64xf32>
    %268 = arith.addf %266, %267 : vector<64x64xf32>
    %269 = arith.mulf %268, %255 : vector<64x64xf32>
    %cst_187 = arith.constant 0.000000e+00 : f32
    %270 = vector.broadcast %cst_187 : f32 to vector<64x64xf32>
    %271 = arith.subf %270, %249 : vector<64x64xf32>
    %272 = arith.mulf %271, %249 : vector<64x64xf32>
    %273 = math.exp %272 : vector<64x64xf32>
    %274 = arith.mulf %269, %273 : vector<64x64xf32>
    %cst_188 = arith.constant 1.000000e+00 : f32
    %275 = vector.broadcast %cst_188 : f32 to vector<64x64xf32>
    %276 = arith.subf %275, %274 : vector<64x64xf32>
    %cst_189 = arith.constant 0.000000e+00 : f32
    %277 = vector.broadcast %cst_189 : f32 to vector<64x64xf32>
    %278 = arith.cmpf oge, %248, %277 : vector<64x64xf32>
    %cst_190 = arith.constant 0.000000e+00 : f32
    %279 = vector.broadcast %cst_190 : f32 to vector<64x64xf32>
    %280 = arith.subf %279, %276 : vector<64x64xf32>
    %281 = arith.select %278, %276, %280 : vector<64x64xi1>, vector<64x64xf32>
    %cst_191 = arith.constant 1.000000e+00 : f32
    %282 = vector.broadcast %cst_191 : f32 to vector<64x64xf32>
    %283 = arith.addf %282, %281 : vector<64x64xf32>
    %284 = arith.mulf %246, %283 : vector<64x64xf32>
    %285 = arith.addf %284, %238 : vector<64x64xf32>
    %286 = tpu.iota {dimensions = array<i32: 0>} : vector<32x64xi32>
    %287 = tpu.iota {dimensions = array<i32: 1>} : vector<32x64xi32>
    %c2_i32 = arith.constant 2 : i32
    %288 = vector.broadcast %c2_i32 : i32 to vector<32x64xi32>
    %289 = arith.muli %288, %286 : vector<32x64xi32>
    %290 = arith.cmpi eq, %287, %289 : vector<32x64xi32>
    %291 = arith.extui %290 : vector<32x64xi1> to vector<32x64xi32>
    %292 = arith.sitofp %291 : vector<32x64xi32> to vector<32x64xf32>
    %c2_i32_192 = arith.constant 2 : i32
    %293 = vector.broadcast %c2_i32_192 : i32 to vector<32x64xi32>
    %294 = arith.muli %293, %286 : vector<32x64xi32>
    %c1_i32 = arith.constant 1 : i32
    %295 = vector.broadcast %c1_i32 : i32 to vector<32x64xi32>
    %296 = arith.addi %294, %295 : vector<32x64xi32>
    %297 = arith.cmpi eq, %287, %296 : vector<32x64xi32>
    %298 = arith.extui %297 : vector<32x64xi1> to vector<32x64xi32>
    %299 = arith.sitofp %298 : vector<32x64xi32> to vector<32x64xf32>
    %cst_193 = arith.constant dense<0.000000e+00> : vector<32x64xf32>
    %300 = tpu.matmul %292, %285, %cst_193 {dimension_numbers = #tpu.dot_dimension_numbers<[1], [0], [0], [1], [0, 0, 1, 1], [], []>} : vector<32x64xf32>, vector<64x64xf32>, vector<32x64xf32> -> vector<32x64xf32>
    %cst_194 = arith.constant dense<0.000000e+00> : vector<32x64xf32>
    %301 = tpu.matmul %299, %285, %cst_194 {dimension_numbers = #tpu.dot_dimension_numbers<[1], [0], [0], [1], [0, 0, 1, 1], [], []>} : vector<32x64xf32>, vector<64x64xf32>, vector<32x64xf32> -> vector<32x64xf32>
    %302 = arith.maximumf %300, %301 : vector<32x64xf32>
    %c0_195 = arith.constant 0 : index
    %c0_196 = arith.constant 0 : index
    %303 = vector.load %arg11[%c0_195, %c0_196] : memref<1x64xf32, #tpu.memory_space<vmem>>, vector<1x64xf32>
    %cst_197 = arith.constant 0.000000e+00 : f32
    %304 = vector.broadcast %cst_197 : f32 to vector<80x64xf32>
    %c0_198 = arith.constant 0 : index
    %c0_199 = arith.constant 0 : index
    %305 = vector.load %arg19[%c0_198, %c0_199] : memref<80x64xf32, #tpu.memory_space<vmem>>, vector<80x64xf32>
    tpu.vector_store %arg19[%c0_198, %c0_199], %304 {strides = array<i32>} : memref<80x64xf32, #tpu.memory_space<vmem>>, vector<80x64xf32>,
    %c8_200 = arith.constant 8 : index
    %c0_201 = arith.constant 0 : index
    %306 = vector.load %arg19[%c8_200, %c0_201] : memref<80x64xf32, #tpu.memory_space<vmem>>, vector<32x64xf32>
    tpu.vector_store %arg19[%c8_200, %c0_201], %302 {strides = array<i32>} : memref<80x64xf32, #tpu.memory_space<vmem>>, vector<32x64xf32>,
    %c6_202 = arith.constant 6 : index
    %c0_203 = arith.constant 0 : index
    %307 = vector.load %arg19[%c6_202, %c0_203] : memref<80x64xf32, #tpu.memory_space<vmem>>, vector<32x64xf32>
    %c0_204 = arith.constant 0 : index
    %c0_205 = arith.constant 0 : index
    %c0_206 = arith.constant 0 : index
    %308 = vector.load %arg10[%c0_204, %c0_205, %c0_206] : memref<5x64x64xf32, #tpu.memory_space<vmem>>, vector<1x64x64xf32>
    %309 = vector.shape_cast %308 : vector<1x64x64xf32> to vector<64x64xf32>
    %cst_207 = arith.constant dense<0.000000e+00> : vector<32x64xf32>
    %310 = tpu.matmul %307, %309, %cst_207 {dimension_numbers = #tpu.dot_dimension_numbers<[1], [0], [0], [1], [0, 0, 1, 1], [], []>} : vector<32x64xf32>, vector<64x64xf32>, vector<32x64xf32> -> vector<32x64xf32>
    %311 = vector.broadcast %303 : vector<1x64xf32> to vector<32x64xf32>
    %312 = arith.addf %310, %311 : vector<32x64xf32>
    %c7_208 = arith.constant 7 : index
    %c0_209 = arith.constant 0 : index
    %313 = vector.load %arg19[%c7_208, %c0_209] : memref<80x64xf32, #tpu.memory_space<vmem>>, vector<32x64xf32>
    %c1_210 = arith.constant 1 : index
    %c0_211 = arith.constant 0 : index
    %c0_212 = arith.constant 0 : index
    %314 = vector.load %arg10[%c1_210, %c0_211, %c0_212] : memref<5x64x64xf32, #tpu.memory_space<vmem>>, vector<1x64x64xf32>
    %315 = vector.shape_cast %314 : vector<1x64x64xf32> to vector<64x64xf32>
    %cst_213 = arith.constant dense<0.000000e+00> : vector<32x64xf32>
    %316 = tpu.matmul %313, %315, %cst_213 {dimension_numbers = #tpu.dot_dimension_numbers<[1], [0], [0], [1], [0, 0, 1, 1], [], []>} : vector<32x64xf32>, vector<64x64xf32>, vector<32x64xf32> -> vector<32x64xf32>
    %317 = arith.addf %312, %316 : vector<32x64xf32>
    %c8_214 = arith.constant 8 : index
    %c0_215 = arith.constant 0 : index
    %318 = vector.load %arg19[%c8_214, %c0_215] : memref<80x64xf32, #tpu.memory_space<vmem>>, vector<32x64xf32>
    %c2_216 = arith.constant 2 : index
    %c0_217 = arith.constant 0 : index
    %c0_218 = arith.constant 0 : index
    %319 = vector.load %arg10[%c2_216, %c0_217, %c0_218] : memref<5x64x64xf32, #tpu.memory_space<vmem>>, vector<1x64x64xf32>
    %320 = vector.shape_cast %319 : vector<1x64x64xf32> to vector<64x64xf32>
    %cst_219 = arith.constant dense<0.000000e+00> : vector<32x64xf32>
    %321 = tpu.matmul %318, %320, %cst_219 {dimension_numbers = #tpu.dot_dimension_numbers<[1], [0], [0], [1], [0, 0, 1, 1], [], []>} : vector<32x64xf32>, vector<64x64xf32>, vector<32x64xf32> -> vector<32x64xf32>
    %322 = arith.addf %317, %321 : vector<32x64xf32>
    %c9_220 = arith.constant 9 : index
    %c0_221 = arith.constant 0 : index
    %323 = vector.load %arg19[%c9_220, %c0_221] : memref<80x64xf32, #tpu.memory_space<vmem>>, vector<32x64xf32>
    %c3_222 = arith.constant 3 : index
    %c0_223 = arith.constant 0 : index
    %c0_224 = arith.constant 0 : index
    %324 = vector.load %arg10[%c3_222, %c0_223, %c0_224] : memref<5x64x64xf32, #tpu.memory_space<vmem>>, vector<1x64x64xf32>
    %325 = vector.shape_cast %324 : vector<1x64x64xf32> to vector<64x64xf32>
    %cst_225 = arith.constant dense<0.000000e+00> : vector<32x64xf32>
    %326 = tpu.matmul %323, %325, %cst_225 {dimension_numbers = #tpu.dot_dimension_numbers<[1], [0], [0], [1], [0, 0, 1, 1], [], []>} : vector<32x64xf32>, vector<64x64xf32>, vector<32x64xf32> -> vector<32x64xf32>
    %327 = arith.addf %322, %326 : vector<32x64xf32>
    %c10_226 = arith.constant 10 : index
    %c0_227 = arith.constant 0 : index
    %328 = vector.load %arg19[%c10_226, %c0_227] : memref<80x64xf32, #tpu.memory_space<vmem>>, vector<32x64xf32>
    %c4_228 = arith.constant 4 : index
    %c0_229 = arith.constant 0 : index
    %c0_230 = arith.constant 0 : index
    %329 = vector.load %arg10[%c4_228, %c0_229, %c0_230] : memref<5x64x64xf32, #tpu.memory_space<vmem>>, vector<1x64x64xf32>
    %330 = vector.shape_cast %329 : vector<1x64x64xf32> to vector<64x64xf32>
    %cst_231 = arith.constant dense<0.000000e+00> : vector<32x64xf32>
    %331 = tpu.matmul %328, %330, %cst_231 {dimension_numbers = #tpu.dot_dimension_numbers<[1], [0], [0], [1], [0, 0, 1, 1], [], []>} : vector<32x64xf32>, vector<64x64xf32>, vector<32x64xf32> -> vector<32x64xf32>
    %332 = arith.addf %327, %331 : vector<32x64xf32>
    %cst_232 = arith.constant 5.000000e-01 : f32
    %333 = vector.broadcast %cst_232 : f32 to vector<32x64xf32>
    %334 = arith.mulf %333, %332 : vector<32x64xf32>
    %cst_233 = arith.constant 0.707106769 : f32
    %335 = vector.broadcast %cst_233 : f32 to vector<32x64xf32>
    %336 = arith.mulf %332, %335 : vector<32x64xf32>
    %337 = math.absf %336 : vector<32x64xf32>
    %cst_234 = arith.constant 0.327591091 : f32
    %338 = vector.broadcast %cst_234 : f32 to vector<32x64xf32>
    %339 = arith.mulf %338, %337 : vector<32x64xf32>
    %cst_235 = arith.constant 1.000000e+00 : f32
    %340 = vector.broadcast %cst_235 : f32 to vector<32x64xf32>
    %341 = arith.addf %340, %339 : vector<32x64xf32>
    %cst_236 = arith.constant 1.000000e+00 : f32
    %342 = vector.broadcast %cst_236 : f32 to vector<32x64xf32>
    %343 = arith.divf %342, %341 : vector<32x64xf32>
    %cst_237 = arith.constant 1.06140542 : f32
    %344 = vector.broadcast %cst_237 : f32 to vector<32x64xf32>
    %345 = arith.mulf %344, %343 : vector<32x64xf32>
    %cst_238 = arith.constant -1.45315206 : f32
    %346 = vector.broadcast %cst_238 : f32 to vector<32x64xf32>
    %347 = arith.addf %345, %346 : vector<32x64xf32>
    %348 = arith.mulf %347, %343 : vector<32x64xf32>
    %cst_239 = arith.constant 1.42141378 : f32
    %349 = vector.broadcast %cst_239 : f32 to vector<32x64xf32>
    %350 = arith.addf %348, %349 : vector<32x64xf32>
    %351 = arith.mulf %350, %343 : vector<32x64xf32>
    %cst_240 = arith.constant -0.284496725 : f32
    %352 = vector.broadcast %cst_240 : f32 to vector<32x64xf32>
    %353 = arith.addf %351, %352 : vector<32x64xf32>
    %354 = arith.mulf %353, %343 : vector<32x64xf32>
    %cst_241 = arith.constant 0.254829586 : f32
    %355 = vector.broadcast %cst_241 : f32 to vector<32x64xf32>
    %356 = arith.addf %354, %355 : vector<32x64xf32>
    %357 = arith.mulf %356, %343 : vector<32x64xf32>
    %cst_242 = arith.constant 0.000000e+00 : f32
    %358 = vector.broadcast %cst_242 : f32 to vector<32x64xf32>
    %359 = arith.subf %358, %337 : vector<32x64xf32>
    %360 = arith.mulf %359, %337 : vector<32x64xf32>
    %361 = math.exp %360 : vector<32x64xf32>
    %362 = arith.mulf %357, %361 : vector<32x64xf32>
    %cst_243 = arith.constant 1.000000e+00 : f32
    %363 = vector.broadcast %cst_243 : f32 to vector<32x64xf32>
    %364 = arith.subf %363, %362 : vector<32x64xf32>
    %cst_244 = arith.constant 0.000000e+00 : f32
    %365 = vector.broadcast %cst_244 : f32 to vector<32x64xf32>
    %366 = arith.cmpf oge, %336, %365 : vector<32x64xf32>
    %cst_245 = arith.constant 0.000000e+00 : f32
    %367 = vector.broadcast %cst_245 : f32 to vector<32x64xf32>
    %368 = arith.subf %367, %364 : vector<32x64xf32>
    %369 = arith.select %366, %364, %368 : vector<32x64xi1>, vector<32x64xf32>
    %cst_246 = arith.constant 1.000000e+00 : f32
    %370 = vector.broadcast %cst_246 : f32 to vector<32x64xf32>
    %371 = arith.addf %370, %369 : vector<32x64xf32>
    %372 = arith.mulf %334, %371 : vector<32x64xf32>
    %c0_247 = arith.constant 0 : index
    %c0_248 = arith.constant 0 : index
    %373 = vector.load %arg13[%c0_247, %c0_248] : memref<1x64xf32, #tpu.memory_space<vmem>>, vector<1x64xf32>
    %c0_249 = arith.constant 0 : index
    %c0_250 = arith.constant 0 : index
    %c0_251 = arith.constant 0 : index
    %374 = vector.load %arg12[%c0_249, %c0_250, %c0_251] : memref<1x64x64xf32, #tpu.memory_space<vmem>>, vector<1x64x64xf32>
    %375 = vector.shape_cast %374 : vector<1x64x64xf32> to vector<64x64xf32>
    %cst_252 = arith.constant dense<0.000000e+00> : vector<32x64xf32>
    %376 = tpu.matmul %372, %375, %cst_252 {dimension_numbers = #tpu.dot_dimension_numbers<[1], [0], [0], [1], [0, 0, 1, 1], [], []>} : vector<32x64xf32>, vector<64x64xf32>, vector<32x64xf32> -> vector<32x64xf32>
    %377 = vector.broadcast %373 : vector<1x64xf32> to vector<32x64xf32>
    %378 = arith.addf %376, %377 : vector<32x64xf32>
    %cst_253 = arith.constant 5.000000e-01 : f32
    %379 = vector.broadcast %cst_253 : f32 to vector<32x64xf32>
    %380 = arith.mulf %379, %378 : vector<32x64xf32>
    %cst_254 = arith.constant 0.707106769 : f32
    %381 = vector.broadcast %cst_254 : f32 to vector<32x64xf32>
    %382 = arith.mulf %378, %381 : vector<32x64xf32>
    %383 = math.absf %382 : vector<32x64xf32>
    %cst_255 = arith.constant 0.327591091 : f32
    %384 = vector.broadcast %cst_255 : f32 to vector<32x64xf32>
    %385 = arith.mulf %384, %383 : vector<32x64xf32>
    %cst_256 = arith.constant 1.000000e+00 : f32
    %386 = vector.broadcast %cst_256 : f32 to vector<32x64xf32>
    %387 = arith.addf %386, %385 : vector<32x64xf32>
    %cst_257 = arith.constant 1.000000e+00 : f32
    %388 = vector.broadcast %cst_257 : f32 to vector<32x64xf32>
    %389 = arith.divf %388, %387 : vector<32x64xf32>
    %cst_258 = arith.constant 1.06140542 : f32
    %390 = vector.broadcast %cst_258 : f32 to vector<32x64xf32>
    %391 = arith.mulf %390, %389 : vector<32x64xf32>
    %cst_259 = arith.constant -1.45315206 : f32
    %392 = vector.broadcast %cst_259 : f32 to vector<32x64xf32>
    %393 = arith.addf %391, %392 : vector<32x64xf32>
    %394 = arith.mulf %393, %389 : vector<32x64xf32>
    %cst_260 = arith.constant 1.42141378 : f32
    %395 = vector.broadcast %cst_260 : f32 to vector<32x64xf32>
    %396 = arith.addf %394, %395 : vector<32x64xf32>
    %397 = arith.mulf %396, %389 : vector<32x64xf32>
    %cst_261 = arith.constant -0.284496725 : f32
    %398 = vector.broadcast %cst_261 : f32 to vector<32x64xf32>
    %399 = arith.addf %397, %398 : vector<32x64xf32>
    %400 = arith.mulf %399, %389 : vector<32x64xf32>
    %cst_262 = arith.constant 0.254829586 : f32
    %401 = vector.broadcast %cst_262 : f32 to vector<32x64xf32>
    %402 = arith.addf %400, %401 : vector<32x64xf32>
    %403 = arith.mulf %402, %389 : vector<32x64xf32>
    %cst_263 = arith.constant 0.000000e+00 : f32
    %404 = vector.broadcast %cst_263 : f32 to vector<32x64xf32>
    %405 = arith.subf %404, %383 : vector<32x64xf32>
    %406 = arith.mulf %405, %383 : vector<32x64xf32>
    %407 = math.exp %406 : vector<32x64xf32>
    %408 = arith.mulf %403, %407 : vector<32x64xf32>
    %cst_264 = arith.constant 1.000000e+00 : f32
    %409 = vector.broadcast %cst_264 : f32 to vector<32x64xf32>
    %410 = arith.subf %409, %408 : vector<32x64xf32>
    %cst_265 = arith.constant 0.000000e+00 : f32
    %411 = vector.broadcast %cst_265 : f32 to vector<32x64xf32>
    %412 = arith.cmpf oge, %382, %411 : vector<32x64xf32>
    %cst_266 = arith.constant 0.000000e+00 : f32
    %413 = vector.broadcast %cst_266 : f32 to vector<32x64xf32>
    %414 = arith.subf %413, %410 : vector<32x64xf32>
    %415 = arith.select %412, %410, %414 : vector<32x64xi1>, vector<32x64xf32>
    %cst_267 = arith.constant 1.000000e+00 : f32
    %416 = vector.broadcast %cst_267 : f32 to vector<32x64xf32>
    %417 = arith.addf %416, %415 : vector<32x64xf32>
    %418 = arith.mulf %380, %417 : vector<32x64xf32>
    %419 = arith.addf %418, %372 : vector<32x64xf32>
    %420 = tpu.iota {dimensions = array<i32: 0>} : vector<16x32xi32>
    %421 = tpu.iota {dimensions = array<i32: 1>} : vector<16x32xi32>
    %c2_i32_268 = arith.constant 2 : i32
    %422 = vector.broadcast %c2_i32_268 : i32 to vector<16x32xi32>
    %423 = arith.muli %422, %420 : vector<16x32xi32>
    %424 = arith.cmpi eq, %421, %423 : vector<16x32xi32>
    %425 = arith.extui %424 : vector<16x32xi1> to vector<16x32xi32>
    %426 = arith.sitofp %425 : vector<16x32xi32> to vector<16x32xf32>
    %c2_i32_269 = arith.constant 2 : i32
    %427 = vector.broadcast %c2_i32_269 : i32 to vector<16x32xi32>
    %428 = arith.muli %427, %420 : vector<16x32xi32>
    %c1_i32_270 = arith.constant 1 : i32
    %429 = vector.broadcast %c1_i32_270 : i32 to vector<16x32xi32>
    %430 = arith.addi %428, %429 : vector<16x32xi32>
    %431 = arith.cmpi eq, %421, %430 : vector<16x32xi32>
    %432 = arith.extui %431 : vector<16x32xi1> to vector<16x32xi32>
    %433 = arith.sitofp %432 : vector<16x32xi32> to vector<16x32xf32>
    %cst_271 = arith.constant dense<0.000000e+00> : vector<16x64xf32>
    %434 = tpu.matmul %426, %419, %cst_271 {dimension_numbers = #tpu.dot_dimension_numbers<[1], [0], [0], [1], [0, 0, 1, 1], [], []>} : vector<16x32xf32>, vector<32x64xf32>, vector<16x64xf32> -> vector<16x64xf32>
    %cst_272 = arith.constant dense<0.000000e+00> : vector<16x64xf32>
    %435 = tpu.matmul %433, %419, %cst_272 {dimension_numbers = #tpu.dot_dimension_numbers<[1], [0], [0], [1], [0, 0, 1, 1], [], []>} : vector<16x32xf32>, vector<32x64xf32>, vector<16x64xf32> -> vector<16x64xf32>
    %436 = arith.maximumf %434, %435 : vector<16x64xf32>
    %c0_273 = arith.constant 0 : index
    %c0_274 = arith.constant 0 : index
    %437 = vector.load %arg15[%c0_273, %c0_274] : memref<1x64xf32, #tpu.memory_space<vmem>>, vector<1x64xf32>
    %cst_275 = arith.constant 0.000000e+00 : f32
    %438 = vector.broadcast %cst_275 : f32 to vector<80x64xf32>
    %c0_276 = arith.constant 0 : index
    %c0_277 = arith.constant 0 : index
    %439 = vector.load %arg19[%c0_276, %c0_277] : memref<80x64xf32, #tpu.memory_space<vmem>>, vector<80x64xf32>
    tpu.vector_store %arg19[%c0_276, %c0_277], %438 {strides = array<i32>} : memref<80x64xf32, #tpu.memory_space<vmem>>, vector<80x64xf32>,
    %c8_278 = arith.constant 8 : index
    %c0_279 = arith.constant 0 : index
    %440 = vector.load %arg19[%c8_278, %c0_279] : memref<80x64xf32, #tpu.memory_space<vmem>>, vector<16x64xf32>
    tpu.vector_store %arg19[%c8_278, %c0_279], %436 {strides = array<i32>} : memref<80x64xf32, #tpu.memory_space<vmem>>, vector<16x64xf32>,
    %c6_280 = arith.constant 6 : index
    %c0_281 = arith.constant 0 : index
    %441 = vector.load %arg19[%c6_280, %c0_281] : memref<80x64xf32, #tpu.memory_space<vmem>>, vector<16x64xf32>
    %c0_282 = arith.constant 0 : index
    %c0_283 = arith.constant 0 : index
    %c0_284 = arith.constant 0 : index
    %442 = vector.load %arg14[%c0_282, %c0_283, %c0_284] : memref<5x64x64xf32, #tpu.memory_space<vmem>>, vector<1x64x64xf32>
    %443 = vector.shape_cast %442 : vector<1x64x64xf32> to vector<64x64xf32>
    %cst_285 = arith.constant dense<0.000000e+00> : vector<16x64xf32>
    %444 = tpu.matmul %441, %443, %cst_285 {dimension_numbers = #tpu.dot_dimension_numbers<[1], [0], [0], [1], [0, 0, 1, 1], [], []>} : vector<16x64xf32>, vector<64x64xf32>, vector<16x64xf32> -> vector<16x64xf32>
    %445 = vector.broadcast %437 : vector<1x64xf32> to vector<16x64xf32>
    %446 = arith.addf %444, %445 : vector<16x64xf32>
    %c7_286 = arith.constant 7 : index
    %c0_287 = arith.constant 0 : index
    %447 = vector.load %arg19[%c7_286, %c0_287] : memref<80x64xf32, #tpu.memory_space<vmem>>, vector<16x64xf32>
    %c1_288 = arith.constant 1 : index
    %c0_289 = arith.constant 0 : index
    %c0_290 = arith.constant 0 : index
    %448 = vector.load %arg14[%c1_288, %c0_289, %c0_290] : memref<5x64x64xf32, #tpu.memory_space<vmem>>, vector<1x64x64xf32>
    %449 = vector.shape_cast %448 : vector<1x64x64xf32> to vector<64x64xf32>
    %cst_291 = arith.constant dense<0.000000e+00> : vector<16x64xf32>
    %450 = tpu.matmul %447, %449, %cst_291 {dimension_numbers = #tpu.dot_dimension_numbers<[1], [0], [0], [1], [0, 0, 1, 1], [], []>} : vector<16x64xf32>, vector<64x64xf32>, vector<16x64xf32> -> vector<16x64xf32>
    %451 = arith.addf %446, %450 : vector<16x64xf32>
    %c8_292 = arith.constant 8 : index
    %c0_293 = arith.constant 0 : index
    %452 = vector.load %arg19[%c8_292, %c0_293] : memref<80x64xf32, #tpu.memory_space<vmem>>, vector<16x64xf32>
    %c2_294 = arith.constant 2 : index
    %c0_295 = arith.constant 0 : index
    %c0_296 = arith.constant 0 : index
    %453 = vector.load %arg14[%c2_294, %c0_295, %c0_296] : memref<5x64x64xf32, #tpu.memory_space<vmem>>, vector<1x64x64xf32>
    %454 = vector.shape_cast %453 : vector<1x64x64xf32> to vector<64x64xf32>
    %cst_297 = arith.constant dense<0.000000e+00> : vector<16x64xf32>
    %455 = tpu.matmul %452, %454, %cst_297 {dimension_numbers = #tpu.dot_dimension_numbers<[1], [0], [0], [1], [0, 0, 1, 1], [], []>} : vector<16x64xf32>, vector<64x64xf32>, vector<16x64xf32> -> vector<16x64xf32>
    %456 = arith.addf %451, %455 : vector<16x64xf32>
    %c9_298 = arith.constant 9 : index
    %c0_299 = arith.constant 0 : index
    %457 = vector.load %arg19[%c9_298, %c0_299] : memref<80x64xf32, #tpu.memory_space<vmem>>, vector<16x64xf32>
    %c3_300 = arith.constant 3 : index
    %c0_301 = arith.constant 0 : index
    %c0_302 = arith.constant 0 : index
    %458 = vector.load %arg14[%c3_300, %c0_301, %c0_302] : memref<5x64x64xf32, #tpu.memory_space<vmem>>, vector<1x64x64xf32>
    %459 = vector.shape_cast %458 : vector<1x64x64xf32> to vector<64x64xf32>
    %cst_303 = arith.constant dense<0.000000e+00> : vector<16x64xf32>
    %460 = tpu.matmul %457, %459, %cst_303 {dimension_numbers = #tpu.dot_dimension_numbers<[1], [0], [0], [1], [0, 0, 1, 1], [], []>} : vector<16x64xf32>, vector<64x64xf32>, vector<16x64xf32> -> vector<16x64xf32>
    %461 = arith.addf %456, %460 : vector<16x64xf32>
    %c10_304 = arith.constant 10 : index
    %c0_305 = arith.constant 0 : index
    %462 = vector.load %arg19[%c10_304, %c0_305] : memref<80x64xf32, #tpu.memory_space<vmem>>, vector<16x64xf32>
    %c4_306 = arith.constant 4 : index
    %c0_307 = arith.constant 0 : index
    %c0_308 = arith.constant 0 : index
    %463 = vector.load %arg14[%c4_306, %c0_307, %c0_308] : memref<5x64x64xf32, #tpu.memory_space<vmem>>, vector<1x64x64xf32>
    %464 = vector.shape_cast %463 : vector<1x64x64xf32> to vector<64x64xf32>
    %cst_309 = arith.constant dense<0.000000e+00> : vector<16x64xf32>
    %465 = tpu.matmul %462, %464, %cst_309 {dimension_numbers = #tpu.dot_dimension_numbers<[1], [0], [0], [1], [0, 0, 1, 1], [], []>} : vector<16x64xf32>, vector<64x64xf32>, vector<16x64xf32> -> vector<16x64xf32>
    %466 = arith.addf %461, %465 : vector<16x64xf32>
    %cst_310 = arith.constant 5.000000e-01 : f32
    %467 = vector.broadcast %cst_310 : f32 to vector<16x64xf32>
    %468 = arith.mulf %467, %466 : vector<16x64xf32>
    %cst_311 = arith.constant 0.707106769 : f32
    %469 = vector.broadcast %cst_311 : f32 to vector<16x64xf32>
    %470 = arith.mulf %466, %469 : vector<16x64xf32>
    %471 = math.absf %470 : vector<16x64xf32>
    %cst_312 = arith.constant 0.327591091 : f32
    %472 = vector.broadcast %cst_312 : f32 to vector<16x64xf32>
    %473 = arith.mulf %472, %471 : vector<16x64xf32>
    %cst_313 = arith.constant 1.000000e+00 : f32
    %474 = vector.broadcast %cst_313 : f32 to vector<16x64xf32>
    %475 = arith.addf %474, %473 : vector<16x64xf32>
    %cst_314 = arith.constant 1.000000e+00 : f32
    %476 = vector.broadcast %cst_314 : f32 to vector<16x64xf32>
    %477 = arith.divf %476, %475 : vector<16x64xf32>
    %cst_315 = arith.constant 1.06140542 : f32
    %478 = vector.broadcast %cst_315 : f32 to vector<16x64xf32>
    %479 = arith.mulf %478, %477 : vector<16x64xf32>
    %cst_316 = arith.constant -1.45315206 : f32
    %480 = vector.broadcast %cst_316 : f32 to vector<16x64xf32>
    %481 = arith.addf %479, %480 : vector<16x64xf32>
    %482 = arith.mulf %481, %477 : vector<16x64xf32>
    %cst_317 = arith.constant 1.42141378 : f32
    %483 = vector.broadcast %cst_317 : f32 to vector<16x64xf32>
    %484 = arith.addf %482, %483 : vector<16x64xf32>
    %485 = arith.mulf %484, %477 : vector<16x64xf32>
    %cst_318 = arith.constant -0.284496725 : f32
    %486 = vector.broadcast %cst_318 : f32 to vector<16x64xf32>
    %487 = arith.addf %485, %486 : vector<16x64xf32>
    %488 = arith.mulf %487, %477 : vector<16x64xf32>
    %cst_319 = arith.constant 0.254829586 : f32
    %489 = vector.broadcast %cst_319 : f32 to vector<16x64xf32>
    %490 = arith.addf %488, %489 : vector<16x64xf32>
    %491 = arith.mulf %490, %477 : vector<16x64xf32>
    %cst_320 = arith.constant 0.000000e+00 : f32
    %492 = vector.broadcast %cst_320 : f32 to vector<16x64xf32>
    %493 = arith.subf %492, %471 : vector<16x64xf32>
    %494 = arith.mulf %493, %471 : vector<16x64xf32>
    %495 = math.exp %494 : vector<16x64xf32>
    %496 = arith.mulf %491, %495 : vector<16x64xf32>
    %cst_321 = arith.constant 1.000000e+00 : f32
    %497 = vector.broadcast %cst_321 : f32 to vector<16x64xf32>
    %498 = arith.subf %497, %496 : vector<16x64xf32>
    %cst_322 = arith.constant 0.000000e+00 : f32
    %499 = vector.broadcast %cst_322 : f32 to vector<16x64xf32>
    %500 = arith.cmpf oge, %470, %499 : vector<16x64xf32>
    %cst_323 = arith.constant 0.000000e+00 : f32
    %501 = vector.broadcast %cst_323 : f32 to vector<16x64xf32>
    %502 = arith.subf %501, %498 : vector<16x64xf32>
    %503 = arith.select %500, %498, %502 : vector<16x64xi1>, vector<16x64xf32>
    %cst_324 = arith.constant 1.000000e+00 : f32
    %504 = vector.broadcast %cst_324 : f32 to vector<16x64xf32>
    %505 = arith.addf %504, %503 : vector<16x64xf32>
    %506 = arith.mulf %468, %505 : vector<16x64xf32>
    %c0_325 = arith.constant 0 : index
    %c0_326 = arith.constant 0 : index
    %507 = vector.load %arg17[%c0_325, %c0_326] : memref<1x64xf32, #tpu.memory_space<vmem>>, vector<1x64xf32>
    %c0_327 = arith.constant 0 : index
    %c0_328 = arith.constant 0 : index
    %c0_329 = arith.constant 0 : index
    %508 = vector.load %arg16[%c0_327, %c0_328, %c0_329] : memref<1x64x64xf32, #tpu.memory_space<vmem>>, vector<1x64x64xf32>
    %509 = vector.shape_cast %508 : vector<1x64x64xf32> to vector<64x64xf32>
    %cst_330 = arith.constant dense<0.000000e+00> : vector<16x64xf32>
    %510 = tpu.matmul %506, %509, %cst_330 {dimension_numbers = #tpu.dot_dimension_numbers<[1], [0], [0], [1], [0, 0, 1, 1], [], []>} : vector<16x64xf32>, vector<64x64xf32>, vector<16x64xf32> -> vector<16x64xf32>
    %511 = vector.broadcast %507 : vector<1x64xf32> to vector<16x64xf32>
    %512 = arith.addf %510, %511 : vector<16x64xf32>
    %cst_331 = arith.constant 5.000000e-01 : f32
    %513 = vector.broadcast %cst_331 : f32 to vector<16x64xf32>
    %514 = arith.mulf %513, %512 : vector<16x64xf32>
    %cst_332 = arith.constant 0.707106769 : f32
    %515 = vector.broadcast %cst_332 : f32 to vector<16x64xf32>
    %516 = arith.mulf %512, %515 : vector<16x64xf32>
    %517 = math.absf %516 : vector<16x64xf32>
    %cst_333 = arith.constant 0.327591091 : f32
    %518 = vector.broadcast %cst_333 : f32 to vector<16x64xf32>
    %519 = arith.mulf %518, %517 : vector<16x64xf32>
    %cst_334 = arith.constant 1.000000e+00 : f32
    %520 = vector.broadcast %cst_334 : f32 to vector<16x64xf32>
    %521 = arith.addf %520, %519 : vector<16x64xf32>
    %cst_335 = arith.constant 1.000000e+00 : f32
    %522 = vector.broadcast %cst_335 : f32 to vector<16x64xf32>
    %523 = arith.divf %522, %521 : vector<16x64xf32>
    %cst_336 = arith.constant 1.06140542 : f32
    %524 = vector.broadcast %cst_336 : f32 to vector<16x64xf32>
    %525 = arith.mulf %524, %523 : vector<16x64xf32>
    %cst_337 = arith.constant -1.45315206 : f32
    %526 = vector.broadcast %cst_337 : f32 to vector<16x64xf32>
    %527 = arith.addf %525, %526 : vector<16x64xf32>
    %528 = arith.mulf %527, %523 : vector<16x64xf32>
    %cst_338 = arith.constant 1.42141378 : f32
    %529 = vector.broadcast %cst_338 : f32 to vector<16x64xf32>
    %530 = arith.addf %528, %529 : vector<16x64xf32>
    %531 = arith.mulf %530, %523 : vector<16x64xf32>
    %cst_339 = arith.constant -0.284496725 : f32
    %532 = vector.broadcast %cst_339 : f32 to vector<16x64xf32>
    %533 = arith.addf %531, %532 : vector<16x64xf32>
    %534 = arith.mulf %533, %523 : vector<16x64xf32>
    %cst_340 = arith.constant 0.254829586 : f32
    %535 = vector.broadcast %cst_340 : f32 to vector<16x64xf32>
    %536 = arith.addf %534, %535 : vector<16x64xf32>
    %537 = arith.mulf %536, %523 : vector<16x64xf32>
    %cst_341 = arith.constant 0.000000e+00 : f32
    %538 = vector.broadcast %cst_341 : f32 to vector<16x64xf32>
    %539 = arith.subf %538, %517 : vector<16x64xf32>
    %540 = arith.mulf %539, %517 : vector<16x64xf32>
    %541 = math.exp %540 : vector<16x64xf32>
    %542 = arith.mulf %537, %541 : vector<16x64xf32>
    %cst_342 = arith.constant 1.000000e+00 : f32
    %543 = vector.broadcast %cst_342 : f32 to vector<16x64xf32>
    %544 = arith.subf %543, %542 : vector<16x64xf32>
    %cst_343 = arith.constant 0.000000e+00 : f32
    %545 = vector.broadcast %cst_343 : f32 to vector<16x64xf32>
    %546 = arith.cmpf oge, %516, %545 : vector<16x64xf32>
    %cst_344 = arith.constant 0.000000e+00 : f32
    %547 = vector.broadcast %cst_344 : f32 to vector<16x64xf32>
    %548 = arith.subf %547, %544 : vector<16x64xf32>
    %549 = arith.select %546, %544, %548 : vector<16x64xi1>, vector<16x64xf32>
    %cst_345 = arith.constant 1.000000e+00 : f32
    %550 = vector.broadcast %cst_345 : f32 to vector<16x64xf32>
    %551 = arith.addf %550, %549 : vector<16x64xf32>
    %552 = arith.mulf %514, %551 : vector<16x64xf32>
    %553 = arith.addf %552, %506 : vector<16x64xf32>
    %554 = tpu.iota {dimensions = array<i32: 0>} : vector<8x16xi32>
    %555 = tpu.iota {dimensions = array<i32: 1>} : vector<8x16xi32>
    %c2_i32_346 = arith.constant 2 : i32
    %556 = vector.broadcast %c2_i32_346 : i32 to vector<8x16xi32>
    %557 = arith.muli %556, %554 : vector<8x16xi32>
    %558 = arith.cmpi eq, %555, %557 : vector<8x16xi32>
    %559 = arith.extui %558 : vector<8x16xi1> to vector<8x16xi32>
    %560 = arith.sitofp %559 : vector<8x16xi32> to vector<8x16xf32>
    %c2_i32_347 = arith.constant 2 : i32
    %561 = vector.broadcast %c2_i32_347 : i32 to vector<8x16xi32>
    %562 = arith.muli %561, %554 : vector<8x16xi32>
    %c1_i32_348 = arith.constant 1 : i32
    %563 = vector.broadcast %c1_i32_348 : i32 to vector<8x16xi32>
    %564 = arith.addi %562, %563 : vector<8x16xi32>
    %565 = arith.cmpi eq, %555, %564 : vector<8x16xi32>
    %566 = arith.extui %565 : vector<8x16xi1> to vector<8x16xi32>
    %567 = arith.sitofp %566 : vector<8x16xi32> to vector<8x16xf32>
    %cst_349 = arith.constant dense<0.000000e+00> : vector<8x64xf32>
    %568 = tpu.matmul %560, %553, %cst_349 {dimension_numbers = #tpu.dot_dimension_numbers<[1], [0], [0], [1], [0, 0, 1, 1], [], []>} : vector<8x16xf32>, vector<16x64xf32>, vector<8x64xf32> -> vector<8x64xf32>
    %cst_350 = arith.constant dense<0.000000e+00> : vector<8x64xf32>
    %569 = tpu.matmul %567, %553, %cst_350 {dimension_numbers = #tpu.dot_dimension_numbers<[1], [0], [0], [1], [0, 0, 1, 1], [], []>} : vector<8x16xf32>, vector<16x64xf32>, vector<8x64xf32> -> vector<8x64xf32>
    %570 = arith.maximumf %568, %569 : vector<8x64xf32>
    %c0_351 = arith.constant 0 : index
    %c0_352 = arith.constant 0 : index
    %c0_353 = arith.constant 0 : index
    %571 = vector.load %arg18[%c0_351, %c0_352, %c0_353] : memref<1x8x64xf32, #tpu.memory_space<vmem>>, vector<1x8x64xf32>
    %572 = vector.shape_cast %571 : vector<1x8x64xf32> to vector<8x64xf32>
    %573 = vector.shape_cast %570 : vector<8x64xf32> to vector<1x8x64xf32>
    tpu.vector_store %arg18[%c0_351, %c0_352, %c0_353], %573 {strides = array<i32>} : memref<1x8x64xf32, #tpu.memory_space<vmem>>, vector<1x8x64xf32>,
    return
  }
  func.func @transform_0(%arg0: i32) -> (i32, i32, i32) {
    %c0_i32 = arith.constant 0 : i32
    %c0_i32_0 = arith.constant 0 : i32
    %c0_i32_1 = arith.constant 0 : i32
    return %arg0, %c0_i32, %c0_i32_0 : i32, i32, i32
  }
  func.func @transform_1(%arg0: i32) -> (i32, i32, i32) {
    %c0_i32 = arith.constant 0 : i32
    %c0_i32_0 = arith.constant 0 : i32
    %c0_i32_1 = arith.constant 0 : i32
    %c0_i32_2 = arith.constant 0 : i32
    return %c0_i32, %c0_i32_0, %c0_i32_1 : i32, i32, i32
  }
  func.func @transform_2(%arg0: i32) -> (i32, i32) {
    %c0_i32 = arith.constant 0 : i32
    %c0_i32_0 = arith.constant 0 : i32
    %c0_i32_1 = arith.constant 0 : i32
    return %c0_i32, %c0_i32_0 : i32, i32
  }
  func.func @transform_3(%arg0: i32) -> (i32, i32, i32) {
    %c0_i32 = arith.constant 0 : i32
    %c0_i32_0 = arith.constant 0 : i32
    %c0_i32_1 = arith.constant 0 : i32
    %c0_i32_2 = arith.constant 0 : i32
    return %c0_i32, %c0_i32_0, %c0_i32_1 : i32, i32, i32
  }
  func.func @transform_4(%arg0: i32) -> (i32, i32) {
    %c0_i32 = arith.constant 0 : i32
    %c0_i32_0 = arith.constant 0 : i32
    %c0_i32_1 = arith.constant 0 : i32
    return %c0_i32, %c0_i32_0 : i32, i32
  }
  func.func @transform_5(%arg0: i32) -> (i32, i32, i32) {
    %c0_i32 = arith.constant 0 : i32
    %c0_i32_0 = arith.constant 0 : i32
    %c0_i32_1 = arith.constant 0 : i32
    %c0_i32_2 = arith.constant 0 : i32
    return %c0_i32, %c0_i32_0, %c0_i32_1 : i32, i32, i32
  }
  func.func @transform_6(%arg0: i32) -> (i32, i32) {
    %c0_i32 = arith.constant 0 : i32
    %c0_i32_0 = arith.constant 0 : i32
    %c0_i32_1 = arith.constant 0 : i32
    return %c0_i32, %c0_i32_0 : i32, i32
  }
  func.func @transform_7(%arg0: i32) -> (i32, i32, i32) {
    %c0_i32 = arith.constant 0 : i32
    %c0_i32_0 = arith.constant 0 : i32
    %c0_i32_1 = arith.constant 0 : i32
    %c0_i32_2 = arith.constant 0 : i32
    return %c0_i32, %c0_i32_0, %c0_i32_1 : i32, i32, i32
  }
  func.func @transform_8(%arg0: i32) -> (i32, i32) {
    %c0_i32 = arith.constant 0 : i32
    %c0_i32_0 = arith.constant 0 : i32
    %c0_i32_1 = arith.constant 0 : i32
    return %c0_i32, %c0_i32_0 : i32, i32
  }
  func.func @transform_9(%arg0: i32) -> (i32, i32, i32) {
    %c0_i32 = arith.constant 0 : i32
    %c0_i32_0 = arith.constant 0 : i32
    %c0_i32_1 = arith.constant 0 : i32
    %c0_i32_2 = arith.constant 0 : i32
    return %c0_i32, %c0_i32_0, %c0_i32_1 : i32, i32, i32
  }
  func.func @transform_10(%arg0: i32) -> (i32, i32) {
    %c0_i32 = arith.constant 0 : i32
    %c0_i32_0 = arith.constant 0 : i32
    %c0_i32_1 = arith.constant 0 : i32
    return %c0_i32, %c0_i32_0 : i32, i32
  }
  func.func @transform_11(%arg0: i32) -> (i32, i32, i32) {
    %c0_i32 = arith.constant 0 : i32
    %c0_i32_0 = arith.constant 0 : i32
    %c0_i32_1 = arith.constant 0 : i32
    %c0_i32_2 = arith.constant 0 : i32
    return %c0_i32, %c0_i32_0, %c0_i32_1 : i32, i32, i32
  }
  func.func @transform_12(%arg0: i32) -> (i32, i32) {
    %c0_i32 = arith.constant 0 : i32
    %c0_i32_0 = arith.constant 0 : i32
    %c0_i32_1 = arith.constant 0 : i32
    return %c0_i32, %c0_i32_0 : i32, i32
  }
  func.func @transform_13(%arg0: i32) -> (i32, i32, i32) {
    %c0_i32 = arith.constant 0 : i32
    %c0_i32_0 = arith.constant 0 : i32
    %c0_i32_1 = arith.constant 0 : i32
    %c0_i32_2 = arith.constant 0 : i32
    return %c0_i32, %c0_i32_0, %c0_i32_1 : i32, i32, i32
  }
  func.func @transform_14(%arg0: i32) -> (i32, i32) {
    %c0_i32 = arith.constant 0 : i32
    %c0_i32_0 = arith.constant 0 : i32
    %c0_i32_1 = arith.constant 0 : i32
    return %c0_i32, %c0_i32_0 : i32, i32
  }
  func.func @transform_15(%arg0: i32) -> (i32, i32, i32) {
    %c0_i32 = arith.constant 0 : i32
    %c0_i32_0 = arith.constant 0 : i32
    %c0_i32_1 = arith.constant 0 : i32
    %c0_i32_2 = arith.constant 0 : i32
    return %c0_i32, %c0_i32_0, %c0_i32_1 : i32, i32, i32
  }
  func.func @transform_16(%arg0: i32) -> (i32, i32) {
    %c0_i32 = arith.constant 0 : i32
    %c0_i32_0 = arith.constant 0 : i32
    %c0_i32_1 = arith.constant 0 : i32
    return %c0_i32, %c0_i32_0 : i32, i32
  }
  func.func @transform_17(%arg0: i32) -> (i32, i32, i32) {
    %c0_i32 = arith.constant 0 : i32
    %c0_i32_0 = arith.constant 0 : i32
    %c0_i32_1 = arith.constant 0 : i32
    return %arg0, %c0_i32, %c0_i32_0 : i32, i32, i32
  }
}

</mosaic_0001>

<bundles_post_ra>
// kernel: _lambda_.1
= control target key start
LH: loop header
LB: loop body
LE: loop exit
PB: predicated region body
PF: predicated region fallthrough
CT: control target
= control target key end

     0   :  { %s11560_s0 = inlined_call_operand.vmem [shape: f32[2,64,4], index: 0, kind: input, shape index: {}]   ;;  %s11561_s1 = inlined_call_operand.hbm [shape: f32[15,4,64], index: 1, kind: input, shape index: {}]   ;;  %s11562_s2 = inlined_call_operand.vmem [shape: f32[1,64], index: 2, kind: input, shape index: {}]   ;;  %s11563_s3 = inlined_call_operand.hbm [shape: f32[1,64,64], index: 3, kind: input, shape index: {}]   ;;  %s11564_s4 = inlined_call_operand.vmem [shape: f32[1,64], index: 4, kind: input, shape index: {}]   ;;  %s11565_s5 = inlined_call_operand.hbm [shape: f32[5,64,64], index: 5, kind: input, shape index: {}]   ;;  %s11566_s6 = inlined_call_operand.vmem [shape: f32[1,64], index: 6, kind: input, shape index: {}]   ;;  %s11567_s7 = inlined_call_operand.hbm [shape: f32[1,64,64], index: 7, kind: input, shape index: {}]   ;;  %s11568_s8 = inlined_call_operand.vmem [shape: f32[1,64], index: 8, kind: input, shape index: {}]   ;;  %s11569_s9 = inlined_call_operand.hbm [shape: f32[5,64,64], index: 9, kind: input, shape index: {}]   ;;  %s11570_s10 = inlined_call_operand.vmem [shape: f32[1,64], index: 10, kind: input, shape index: {}]   ;;  %s11571_s11 = inlined_call_operand.vmem [shape: f32[1,64,64], index: 11, kind: input, shape index: {}]   ;;  %s11572_s12 = inlined_call_operand.vmem [shape: f32[1,64], index: 12, kind: input, shape index: {}]   ;;  %s11573_s13 = inlined_call_operand.hbm [shape: f32[5,64,64], index: 13, kind: input, shape index: {}]   ;;  %s11574_s14 = inlined_call_operand.vmem [shape: f32[1,64], index: 14, kind: input, shape index: {}]   ;;  %s11575_s15 = inlined_call_operand.vmem [shape: f32[1,64,64], index: 15, kind: input, shape index: {}]   ;;  %s11576_s16 = inlined_call_operand.vmem [shape: f32[1,64], index: 16, kind: input, shape index: {}]   ;;  %s11577_s17 = inlined_call_operand.hbm [shape: f32[2,8,64], index: 17, kind: output, shape index: {}]  }
   0x1   :  { %11605 = sst [smem:[#allocation31_spill]] %s11560_s0 }
   0x2   :  { %11606 = sst [smem:[#allocation32_spill]] %s11561_s1 }
   0x3   :  { %11607 = sst [smem:[#allocation33_spill]] %s11563_s3 }
   0x4   :  { %11608 = sst [smem:[#allocation34_spill]] %s11567_s7 }
   0x5   :  { %11609 = sst [smem:[#allocation35_spill]] %s11574_s14 }
   0x6   :  { %11610 = sst [smem:[#allocation36_spill]] %s11575_s15 }
   0x7   :  { %11611 = sst [smem:[#allocation37_spill]] %s11576_s16 }
   0x8   :  { %11612 = sst [smem:[#allocation38_spill]] %s11577_s17 }
   0x9   :  { %22 = vsyncpa [#allocation4], 0 }
   0xa   :  { %23 = vsyncpa [#allocation7], 0 }
   0xb   :  { %24 = vsyncpa [#allocation10], 0 }
   0xc   :  { %25 = vsyncpa [#allocation13], 0 }
   0xd   :  { %26 = vsyncpa [#allocation5], 0 }
   0xe   :  { %28 = vsyncpa [#allocation5 + $0x1], 0  ;;  %s9771_s24 = smov 0   ;;  %s9773_s25 = smov 0  }
   0xf   :  { %s9775_s26 = smov 0   ;;  %s9777_s27 = smov 0  }
  0x10 LB: > { %11613 = sst [smem:[#allocation20_spill]] %s9653_s24  ;;  %s9792_s28 = sadd.s32 4294967295, %s9665_s27   ;;  %s9665_s27 = sphi %s9777_s27, %s11669_s27   ;;  %s9661_s26 = sphi %s9775_s26, %s11672_s26   ;;  %s9657_s25 = sphi %s9773_s25, %s11671_s25   ;;  %s9653_s24 = sphi %s9771_s24, %s11670_s24  }
  0x11   : > { %11614 = sst [smem:[#allocation21_spill]] %s9657_s25  ;;  %s7154_s29 = sadd.s32 4294967294, %s9665_s27  }
  0x12   : > { %11615 = sst [smem:[#allocation22_spill]] %s9661_s26  ;;  %s9796_s0 = sadd.s32 1, %s9665_s27  }
  0x13   : > { %11616 = sst [smem:[#allocation23_spill]] %s9665_s27  ;;  %s403_s30 = sadd.s32 1, %s9661_s26 }
  0x14   : > { %11617 = sst [smem:[#allocation24_spill]] %s9796_s0  ;;  %s400_s18 = ssub.s32 %s9665_s27, %s9796_s0 }
  0x15   : > { %p413_p0 = scmp.ne.s32.totalorder %s9661_s26, %s9657_s25  ;;  %p401_p1 = scmp.eq.s32.totalorder %s400_s18, 0 }
  0x16   : > { %p414_p2 = scmp.eq.s32.totalorder %s9792_s28, 1  ;;  %p419_p3 = scmp.ne.s32.totalorder %s9657_s25, %s9653_s24 }
  0x17   : > { %p420_p4 = scmp.eq.s32.totalorder %s7154_s29, 1  ;;  %p7155_p7 = scmp.ge.s32.totalorder %s9665_s27, 1 }
  0x18   : > { %s9807_s19 = scalar_select %p401_p1, %s9661_s26, %s403_s30  }
  0x19   : > { %p9809_p5 = por %p414_p2, %p413_p0  ;;  %p9813_p6 = por %p420_p4, %p419_p3 }
  0x1a   : > { %11618 = sst [smem:[#allocation25_spill]] %s9807_s19  ;;  %p427_p8 = scmp.lt.s32.totalorder %s9665_s27, 3 }
  0x1b   : > { %s11619_s1 = scalar_select %p9809_p5, 1, 0 }
  0x1c   : > { %s11621_s20 = scalar_select %p9813_p6, 1, 0 }
  0x1d   : > { %11620 = sst [smem:[#allocation26_spill]] %s11619_s1  ;;  %p11586_p9 = scmp.eq.s32.totalorder %s9792_s28, 0 }
  0x1e   : > { %11622 = sst [smem:[#allocation27_spill]] %s11621_s20  ;;  %p9820_p10 = pnand %p7155_p7, %p427_p8 }
  0x1f   : > { %s9667_s22 = smov [#allocation6]   ;;  %s9668_s30 = smov [#allocation9]  }
  0x20   : > { %s11623_s21 = scalar_select %p9820_p10, 1, 0 }
  0x21   : > { %s455_s23 = sshll.u32 %s9667_s22, 4  ;;  %p9162_p11 = pneg %p9820_p10  ;;  %s9826_s23 = int_to_ptr.vmem [resolvable:$true] %s455_s23 }
  0x22   : > { %s487_s18 = sshll.u32 %s9668_s30, 4  ;;  %s9669_s19 = smov [#allocation3]   ;;  %s9834_s18 = int_to_ptr.vmem [resolvable:$true] %s487_s18 }
  0x23   : > { %p9830_p12 = pnand %p11586_p9, %p9162_p11  ;;  %s9836_s26 = sshll.u32 %s9669_s19, 4  ;;  %s440_s26 = int_to_ptr.vmem [resolvable:$true] %s9836_s26 }
  0x24   : > { %s11625_s3 = sld [smem:[#allocation33_spill]] }
  0x25   : > { %p9846_p0 = pneg %p9830_p12 }
  0x2a   : > { %s9419_s22 = scalar_lea.hbm %s11625_s3, 1024 }
  0x2b   : > { %p9420_p13 = scmp.ne.s32.totalorder %s11625_s3, %s9419_s22  ;;  %p9426_p3 = scmp.lt.u32.totalorder %s9419_s22, %s11625_s3 }
  0x2d   : > { %p9422_p1 = pnand %p9846_p0, %p9420_p13 }
  0x2f   : > { %p9423_p2 = pneg %p9422_p1 }
  0x31   : > { %p9428_p4 = pnand %p9426_p3, %p9423_p2 }
  0x33   : > { %9431 = shalt.err (!%p9428_p4)
}
  0x34   : > { %s9432_s24 = scalar_lea.vmem %s9826_s23, 1024  ;;  %p9440_p9 = scmp.lt.s32.totalorder %s9826_s23, %s9826_s23 }
  0x35   : > { %p9433_p7 = scmp.ne.s32.totalorder %s9826_s23, %s9432_s24  ;;  %p9441_p6 = scmp.lt.s32.totalorder %s9432_s24, %s9432_s24 }
  0x37   : > { %p9435_p8 = pnand %p9433_p7, %p9846_p0  ;;  %p9442_p13 = por %p9441_p6, %p9440_p9 }
  0x39   : > { %p9436_p11 = pneg %p9435_p8 }
  0x3b   : > { %p9443_p1 = pnand %p9442_p13, %p9436_p11 }
  0x3d   : > { %9446 = shalt.err (!%p9443_p1)
}
  0x3e   : > { %s11592_s27 = smov 128   ;;  %s11594_s0 = smov 8  }
  0x3f   : > { %9168 = dma.hbm_to_vmem [thread:$0]  (!%p9830_p12), %s11625_s3, 1024, %s9826_s23, [#allocation7], %s11592_s27, %s11592_s27, %s11594_s0  }
  0x40   : > { %s11627_s7 = sld [smem:[#allocation34_spill]] }
  0x46   : > { %s9447_s24 = scalar_lea.hbm %s11627_s7, 1024 }
  0x47   : > { %p9448_p6 = scmp.ne.s32.totalorder %s11627_s7, %s9447_s24  ;;  %p9454_p3 = scmp.lt.u32.totalorder %s9447_s24, %s11627_s7 }
  0x49   : > { %p9450_p9 = pnand %p9448_p6, %p9846_p0 }
  0x4b   : > { %p9451_p2 = pneg %p9450_p9 }
  0x4d   : > { %p9456_p4 = pnand %p9454_p3, %p9451_p2 }
  0x4f   : > { %9459 = shalt.err (!%p9456_p4)
}
  0x50   : > { %s9460_s23 = scalar_lea.vmem %s9834_s18, 1024  ;;  %p9468_p13 = scmp.lt.s32.totalorder %s9834_s18, %s9834_s18 }
  0x51   : > { %p9461_p7 = scmp.ne.s32.totalorder %s9834_s18, %s9460_s23  ;;  %p9469_p1 = scmp.lt.s32.totalorder %s9460_s23, %s9460_s23 }
  0x53   : > { %p9463_p8 = pnand %p9461_p7, %p9846_p0  ;;  %p9470_p6 = por %p9469_p1, %p9468_p13 }
  0x55   : > { %p9464_p11 = pneg %p9463_p8 }
  0x57   : > { %p9471_p9 = pnand %p9470_p6, %p9464_p11 }
  0x59   : > { %9474 = shalt.err (!%p9471_p9)
}
  0x5a   : > { %9174 = dma.hbm_to_vmem [thread:$0]  (!%p9830_p12), %s11627_s7, 1024, %s9834_s18, [#allocation10], %s11592_s27, %s11592_s27, %s11594_s0  }
  0x5b   : > { %s11628_s20 = sld [smem:[#allocation32_spill]] }
  0x61   : > { %s9475_s22 = scalar_lea.hbm %s11628_s20, 960 }
  0x62   : > { %p9476_p2 = scmp.ne.s32.totalorder %s11628_s20, %s9475_s22  ;;  %p9482_p7 = scmp.lt.u32.totalorder %s9475_s22, %s11628_s20 }
  0x64   : > { %p9478_p3 = pnand %p9476_p2, %p9846_p0 }
  0x66   : > { %p9479_p4 = pneg %p9478_p3 }
  0x68   : > { %p9484_p8 = pnand %p9482_p7, %p9479_p4 }
  0x6a   : > { %9487 = shalt.err (!%p9484_p8)
}
  0x6b   : > { %s9488_s14 = scalar_lea.vmem %s440_s26, 960  ;;  %p9496_p6 = scmp.lt.s32.totalorder %s440_s26, %s440_s26 }
  0x6c   : > { %p9489_p11 = scmp.ne.s32.totalorder %s440_s26, %s9488_s14  ;;  %p9497_p9 = scmp.lt.s32.totalorder %s9488_s14, %s9488_s14 }
  0x6e   : > { %p9491_p13 = pnand %p9489_p11, %p9846_p0  ;;  %p9498_p5 = por %p9497_p9, %p9496_p6 }
  0x70   : > { %p9492_p1 = pneg %p9491_p13 }
  0x72   : > { %p9499_p10 = pnand %p9498_p5, %p9492_p1 }
  0x74   : > { %9502 = shalt.err (!%p9499_p10)
}
  0x75   : > { %s9672_s18 = smov 64   ;;  %s9673_s16 = smov 4  }
  0x76   : > { %9165 = dma.hbm_to_vmem [thread:$0]  (!%p9830_p12), %s11628_s20, 960, %s440_s26, [#allocation4], %s9672_s18, %s9672_s18, %s9673_s16  }
  0x77   : > { %s9674_s22 = smov [#allocation8]   ;;  %s9675_s19 = smov [#allocation11]  }
  0x78   : > { %s471_s30 = sshll.u32 %s9674_s22, 4  ;;  %s503_s24 = sshll.u32 %s9675_s19, 4  ;;  %s472_s30 = int_to_ptr.vmem [resolvable:$true] %s471_s30  ;;  %s504_s24 = int_to_ptr.vmem [resolvable:$true] %s503_s24 }
  0x79   : > { %s9503_s14 = scalar_lea.hbm %s11565_s5, 5120 }
  0x7a   : > { %p9504_p5 = scmp.ne.s32.totalorder %s11565_s5, %s9503_s14  ;;  %p9510_p3 = scmp.lt.u32.totalorder %s9503_s14, %s11565_s5 }
  0x7c   : > { %p9506_p10 = pnand %p9504_p5, %p9846_p0 }
  0x7e   : > { %p9507_p2 = pneg %p9506_p10 }
  0x80   : > { %p9512_p4 = pnand %p9510_p3, %p9507_p2 }
  0x82   : > { %9515 = shalt.err (!%p9512_p4)
}
  0x83   : > { %s9516_s26 = scalar_lea.vmem %s472_s30, 5120  ;;  %p9524_p13 = scmp.lt.s32.totalorder %s472_s30, %s472_s30 }
  0x84   : > { %p9517_p7 = scmp.ne.s32.totalorder %s472_s30, %s9516_s26  ;;  %p9525_p1 = scmp.lt.s32.totalorder %s9516_s26, %s9516_s26 }
  0x86   : > { %p9519_p8 = pnand %p9517_p7, %p9846_p0  ;;  %p9526_p6 = por %p9525_p1, %p9524_p13 }
  0x88   : > { %p9520_p11 = pneg %p9519_p8 }
  0x8a   : > { %p9527_p9 = pnand %p9526_p6, %p9520_p11 }
  0x8c   : > { %9530 = shalt.err (!%p9527_p9)
}
  0x8d   : > { %s11629_s3 = smov 8   ;;  %s11630_s27 = smov 128  }
  0x8e   : > { %9171 = dma.hbm_to_vmem [thread:$0]  (!%p9830_p12), %s11565_s5, 5120, %s472_s30, [#allocation7], %s11630_s27, %s11630_s27, %s11629_s3  }
  0x8f   : > { %s9531_s16 = scalar_lea.hbm %s11569_s9, 5120 }
  0x90   : > { %p9532_p5 = scmp.ne.s32.totalorder %s11569_s9, %s9531_s16  ;;  %p9538_p3 = scmp.lt.u32.totalorder %s9531_s16, %s11569_s9 }
  0x92   : > { %p9534_p10 = pnand %p9532_p5, %p9846_p0 }
  0x94   : > { %p9535_p2 = pneg %p9534_p10 }
  0x96   : > { %p9540_p4 = pnand %p9538_p3, %p9535_p2 }
  0x98   : > { %9543 = shalt.err (!%p9540_p4)
}
  0x99   : > { %s9544_s23 = scalar_lea.vmem %s504_s24, 5120  ;;  %p9552_p13 = scmp.lt.s32.totalorder %s504_s24, %s504_s24 }
  0x9a   : > { %p9545_p7 = scmp.ne.s32.totalorder %s504_s24, %s9544_s23  ;;  %p9553_p1 = scmp.lt.s32.totalorder %s9544_s23, %s9544_s23 }
  0x9c   : > { %p9547_p8 = pnand %p9545_p7, %p9846_p0  ;;  %p9554_p6 = por %p9553_p1, %p9552_p13 }
  0x9e   : > { %p9548_p11 = pneg %p9547_p8 }
  0xa0   : > { %p9555_p9 = pnand %p9554_p6, %p9548_p11 }
  0xa2   : > { %9558 = shalt.err (!%p9555_p9)
}
  0xa3   : > { %9177 = dma.hbm_to_vmem [thread:$0]  (!%p9830_p12), %s11569_s9, 5120, %s504_s24, [#allocation10], %s11630_s27, %s11630_s27, %s11629_s3  }
  0xa4   : > { %s9676_s26 = smov [#allocation12]   ;;  %s9559_s18 = scalar_lea.hbm %s11573_s13, 5120 }
  0xa5   : > { %s525_s7 = sshll.u32 %s9676_s26, 4  ;;  %p9560_p5 = scmp.ne.s32.totalorder %s11573_s13, %s9559_s18  ;;  %s526_s7 = int_to_ptr.vmem [resolvable:$true] %s525_s7 }
  0xa6   : > { %p9566_p3 = scmp.lt.u32.totalorder %s9559_s18, %s11573_s13 }
  0xa7   : > { %p9562_p10 = pnand %p9560_p5, %p9846_p0 }
  0xa9   : > { %p9563_p2 = pneg %p9562_p10 }
  0xab   : > { %p9568_p4 = pnand %p9566_p3, %p9563_p2 }
  0xad   : > { %9571 = shalt.err (!%p9568_p4)
}
  0xae   : > { %s9572_s24 = scalar_lea.vmem %s526_s7, 5120  ;;  %p9580_p13 = scmp.lt.s32.totalorder %s526_s7, %s526_s7 }
  0xaf   : > { %p9573_p7 = scmp.ne.s32.totalorder %s526_s7, %s9572_s24  ;;  %p9581_p1 = scmp.lt.s32.totalorder %s9572_s24, %s9572_s24 }
  0xb1   : > { %p9575_p8 = pnand %p9573_p7, %p9846_p0  ;;  %p9582_p6 = por %p9581_p1, %p9580_p13 }
  0xb3   : > { %p9576_p11 = pneg %p9575_p8 }
  0xb5   : > { %p9583_p9 = pnand %p9582_p6, %p9576_p11 }
  0xb7   : > { %9586 = shalt.err (!%p9583_p9)
}
  0xb8   : > { %9180 = dma.hbm_to_vmem [thread:$0]  (!%p9830_p12), %s11573_s13, 5120, %s526_s7, [#allocation13], %s11630_s27, %s11630_s27, %s11629_s3  }
  0xb9   : > { %p11631_p5 = scmp.ne.s32.totalorder %s11623_s21, 0 }
  0xbb   : > { %558 = sbr.rel (%p11631_p5) target bundleno = 3486 (0xd9e), region = 88 }
  0xc2   : > { %p11632_p0 = scmp.eq.s32.totalorder %s9792_s28, 0 }
  0xc4   : > { %9632 = dma.done.wait (%p11632_p0), [#allocation4], 960   ;;  %p11633_p10 = pmov %p11632_p0 }
  0xc5   : > { %p11634_p2 = pmov %p11632_p0 }
  0xc6   : > { %9634 = vsyncadd (%p11633_p10), [#allocation4], 4294966336 }
  0xc7   : > { %9636 = dma.done.wait (%p11634_p2), [#allocation7], 6144   ;;  %p11635_p3 = pmov %p11632_p0 }
  0xc8   : > { %p11636_p4 = pmov %p11632_p0 }
  0xc9   : > { %9638 = vsyncadd (%p11635_p3), [#allocation7], 4294961152 }
  0xca   : > { %9640 = dma.done.wait (%p11636_p4), [#allocation10], 6144   ;;  %p11637_p12 = pmov %p11632_p0 }
  0xcb   : > { %p11638_p7 = pmov %p11632_p0 }
  0xcc   : > { %9642 = vsyncadd (%p11637_p12), [#allocation10], 4294961152 }
  0xcd   : > { %9644 = dma.done.wait (%p11638_p7), [#allocation13], 5120   ;;  %p11639_p8 = pmov %p11632_p0 }
  0xce   : > { %p630_p11 = scmp.lt.s32.totalorder %s9792_s28, 1  ;;  %vm644_vm0 = vcmask 523264   ;;  %v11597_v0 = vmov 0.0   ;;  %vm703_vm1 = vcmask 1043456   ;;  %s11640_s27 = sld [smem:[#allocation31_spill]]  ;;  %vm655_vm2 = vcmask 31744  }
  0xcf   : > { %9646 = vsyncadd (%p11639_p8), [#allocation13], 4294962176  ;;  %645 = vst.msk [vmem:[#allocation2] sm:$0xff] %vm644_vm0, %v11597_v0  ;;  %v971_v1 = vld [vmem:[#allocation3 + $0x8] sm:$0xf]  ;;  %s11658_s19 = sld [smem:[#allocation36_spill]] }
  0xd0   : > { %646 = vst.msk [vmem:[#allocation2 + $0x8] sm:$0xff] %vm644_vm0, %v11597_v0  ;;  %647 = vst.msk [vmem:[#allocation2 + $0x10] sm:$0xff] %vm644_vm0, %v11597_v0  ;;  %s631_s17 = scalar_select %p630_p11, %s9792_s28, 1  ;;  %7884 = vmatprep.subr.msk.mxu0 %vm703_vm1, %v971_v1  ;;  %v1121_v8 = vld [vmem:[#allocation3 + $0xc] sm:$0xf] }
  0xd1   : > { %648 = vst.msk [vmem:[#allocation2 + $0x18] sm:$0xff] %vm644_vm0, %v11597_v0  ;;  %649 = vst.msk [vmem:[#allocation2 + $0x20] sm:$0xff] %vm644_vm0, %v11597_v0  ;;  %7885 = vmatpush3.msk.msra.mxu0 %vm703_vm1, %v971_v1  ;;  %v1271_v14 = vld [vmem:[#allocation3 + $0x10] sm:$0xf]  ;;  %v10068_v23 = vld [vmem:[#allocation3 + $0x14] sm:$0xf] }
  0xd2   : > { %650 = vst.msk [vmem:[#allocation2 + $0x28] sm:$0xff] %vm644_vm0, %v11597_v0  ;;  %651 = vst.msk [vmem:[#allocation2 + $0x30] sm:$0xff] %vm644_vm0, %v11597_v0  ;;  %s7434_s21 = sshll.u32 %s631_s17, 6  ;;  %7898 = vmatprep.subr.msk.mxu0 %vm703_vm1, %v1121_v8  ;;  %s11659_s22 = sld [smem:[#allocation35_spill]] }
  0xd3   : > { %652 = vst.msk [vmem:[#allocation2 + $0x38] sm:$0xff] %vm644_vm0, %v11597_v0  ;;  %653 = vst.msk [vmem:[#allocation2 + $0x40] sm:$0xff] %vm644_vm0, %v11597_v0  ;;  %s11660_s17 = sld [smem:[#allocation37_spill]]  ;;  %s11663_s0 = sld [smem:[#allocation38_spill]] }
  0xd4   : > { %654 = vst.msk [vmem:[#allocation2 + $0x48] sm:$0xff] %vm644_vm0, %v11597_v0  ;;  %s634_s30 = scalar_lea.vmem %s11640_s27, %s7434_s21  ;;  %s11661_s21 = sld [smem:[#allocation21_spill]] }
  0xd5   : > { %v635_v2 = vld [vmem:[%s634_s30] sm:$0xff]  ;;  %v636_v3 = vld [vmem:[%s634_s30 + $0x8] sm:$0xff]  ;;  %v637_v4 = vld [vmem:[%s634_s30 + $0x10] sm:$0xff]  ;;  %s11662_s3 = sld [smem:[#allocation26_spill]] }
  0xd6   : > { %656 = vst.msk [vmem:[#allocation2 + $0x8] sm:$0xff] %vm655_vm2, %v635_v2  ;;  %657 = vst.msk [vmem:[#allocation2 + $0x10] sm:$0xff] %vm655_vm2, %v636_v3  ;;  %v638_v5 = vld [vmem:[%s634_s30 + $0x18] sm:$0xff]  ;;  %v639_v6 = vld [vmem:[%s634_s30 + $0x20] sm:$0xff] }
  0xd7   : > { %658 = vst.msk [vmem:[#allocation2 + $0x18] sm:$0xff] %vm655_vm2, %v637_v4  ;;  %659 = vst.msk [vmem:[#allocation2 + $0x20] sm:$0xff] %vm655_vm2, %v638_v5  ;;  %v640_v7 = vld [vmem:[%s634_s30 + $0x28] sm:$0xff]  ;;  %v641_v9 = vld [vmem:[%s634_s30 + $0x30] sm:$0xff] }
  0xd8   : > { %660 = vst.msk [vmem:[#allocation2 + $0x28] sm:$0xff] %vm655_vm2, %v639_v6  ;;  %661 = vst.msk [vmem:[#allocation2 + $0x30] sm:$0xff] %vm655_vm2, %v640_v7  ;;  %v642_v10 = vld [vmem:[%s634_s30 + $0x38] sm:$0xff]  ;;  %v672_v7 = vld [vmem:[#allocation3] sm:$0xf]  ;;  %s7431_s30 = sshll.u32 %s9792_s28, 7 }
  0xd9   : > { %662 = vst.msk [vmem:[#allocation2 + $0x38] sm:$0xff] %vm655_vm2, %v641_v9  ;;  %663 = vst.msk [vmem:[#allocation2 + $0x40] sm:$0xff] %vm655_vm2, %v642_v10  ;;  %7856 = vmatprep.subr.msk.mxu1 %vm703_vm1, %v672_v7  ;;  %v1571_v10 = vld [vmem:[#allocation3 + $0x18] sm:$0xf]  ;;  %s11517_s18 = scalar_lea.hbm %s11663_s0, %s7431_s30  ;;  %s9680_s28 = smov [#allocation14]  }
  0xda   : > { %7857 = vmatpush3.msk.msra.mxu1 %vm703_vm1, %v672_v7  ;;  %s627_s29 = sand.u32 1, %s11661_s21   ;;  %s9591_s1 = sshll.u32 %s9680_s28, 4  ;;  %s9592_s1 = int_to_ptr.vmem [resolvable:$false] %s9591_s1 }
  0xdb   : > { %s7170_s27 = sshll.u32 %s627_s29, 3  ;;  %s7022_s16 = scalar_lea.sflag [#allocation5], %s627_s29 }
  0xdc   : > { %s629_s14 = scalar_lea.vmem [#allocation14], %s7170_s27  ;;  %p11664_p1 = scmp.ne.s32.totalorder %s11662_s3, 0 }
  0xdd   : > { %v962_v11 = vld [vmem:[#allocation2 + $0x3] sm:$0xff]  ;;  %v10032_v12 = vld [vmem:[#allocation2 + $0xb] sm:$0xff]  ;;  %s7035_s26 = sshll.u32 %s629_s14, 4  ;;  %s11519_s26 = int_to_ptr.vmem [resolvable:$true] %s7035_s26 }
  0xde   : > { %7886 = vmatprep.mubr.msk.f32.mxu0 %vm655_vm2, %v962_v11  ;;  %v10035_v13 = vld [vmem:[#allocation2 + $0x13] sm:$0xff]  ;;  %v10041_v15 = vld [vmem:[#allocation2 + $0x1b] sm:$0xff]  ;;  %v1112_v20 = vld [vmem:[#allocation2 + $0x4] sm:$0xff]  ;;  %s9587_s25 = scalar_lea.vmem %s11519_s26, 128  ;;  %p9594_p5 = scmp.lt.s32.totalorder %s11519_s26, %s9592_s1 }
  0xdf   : > { %7887 = vmatmul.mubr.msk.f32.vlgmr.msra.gmra.mrb[0].mxu0 %vm655_vm2, %v10032_v12  ;;  %v10044_v16 = vld [vmem:[#allocation2 + $0x23] sm:$0xff]  ;;  %v10051_v17 = vld [vmem:[#allocation2 + $0x2b] sm:$0xff]  ;;  %v10066_v22 = vld [vmem:[#allocation2 + $0x14] sm:$0xff]  ;;  %p9588_p13 = scmp.ne.s32.totalorder %s11519_s26, %s9587_s25 }
  0xe0   : > { %7889 = vmatprep.mubr.msk.f32.mxu0 %vm655_vm2, %v10035_v13  ;;  %7899 = vmatpush3.msk.msra.mxu0 %vm703_vm1, %v1121_v8  ;;  %v10053_v18 = vld [vmem:[#allocation2 + $0x33] sm:$0xff]  ;;  %v10059_v19 = vld [vmem:[#allocation2 + $0x3b] sm:$0xff]  ;;  %v10072_v25 = vld [vmem:[#allocation2 + $0x24] sm:$0xff] }
  0xe1   : > { %7912 = vmatprep.subr.msk.mxu0 %vm703_vm1, %v1271_v14  ;;  %v10064_v21 = vld [vmem:[#allocation2 + $0xc] sm:$0xff]  ;;  %v10070_v24 = vld [vmem:[#allocation2 + $0x1c] sm:$0xff]  ;;  %v10116_v46 = vld [vmem:[#allocation2 + $0x34] sm:$0xff]  ;;  %p9589_p6 = pnand %p9588_p13, %p11664_p1 }
  0xe2   : > { %v10074_v26 = vld [vmem:[#allocation2 + $0xd] sm:$0xff]  ;;  %v10076_v27 = vld [vmem:[#allocation2 + $0x15] sm:$0xff]  ;;  %v10078_v28 = vld [vmem:[#allocation2 + $0x1d] sm:$0xff] }
  0xe3   : > { %7890 = vmatmul.mubr.msk.f32.gmra.mrb[2].mxu0 %vm655_vm2, %v10041_v15  ;;  %v10080_v29 = vld [vmem:[#allocation2 + $0x25] sm:$0xff]  ;;  %v10082_v30 = vld [vmem:[#allocation2 + $0xe] sm:$0xff]  ;;  %v10084_v31 = vld [vmem:[#allocation2 + $0x16] sm:$0xff]  ;;  %p9590_p9 = pneg %p9589_p6 }
  0xe4   : > { %7892 = vmatprep.mubr.msk.f32.mxu0 %vm655_vm2, %v10044_v16  ;;  %v10086_v32 = vld [vmem:[#allocation2 + $0x1e] sm:$0xff]  ;;  %v10088_v33 = vld [vmem:[#allocation2 + $0x26] sm:$0xff]  ;;  %v10090_v34 = vld [vmem:[#allocation2 + $0xf] sm:$0xff] }
  0xe5   : > { %v10092_v35 = vld [vmem:[#allocation2 + $0x17] sm:$0xff]  ;;  %v10094_v36 = vld [vmem:[#allocation2 + $0x1f] sm:$0xff]  ;;  %v10096_v37 = vld [vmem:[#allocation2 + $0x27] sm:$0xff] }
  0xe6   : > { %11641 = vst [vmem:[#allocation28_spill] sm:$0xff] %v10092_v35  ;;  %11642 = vst [vmem:[#allocation29_spill] sm:$0xff] %v10094_v36  ;;  %v10098_v38 = vld [vmem:[#allocation2 + $0x10] sm:$0xff]  ;;  %v10100_v39 = vld [vmem:[#allocation2 + $0x18] sm:$0xff] }
  0xe7   : > { %7893 = vmatmul.mubr.msk.f32.gmra.mrb[4].mxu0 %vm655_vm2, %v10051_v17  ;;  %v10102_v40 = vld [vmem:[#allocation2 + $0x20] sm:$0xff]  ;;  %v10104_v41 = vld [vmem:[#allocation2 + $0x9] sm:$0xff]  ;;  %v10106_v42 = vld [vmem:[#allocation2 + $0x11] sm:$0xff] }
  0xe8   : > { %7895 = vmatprep.mubr.msk.f32.mxu0 %vm655_vm2, %v10053_v18  ;;  %v10108_v43 = vld [vmem:[#allocation2 + $0x19] sm:$0xff]  ;;  %v10110_v44 = vld [vmem:[#allocation2 + $0x21] sm:$0xff]  ;;  %v10114_v45 = vld [vmem:[#allocation2 + $0x2c] sm:$0xff] }
  0xe9   : > { %v10118_v47 = vld [vmem:[#allocation2 + $0x3c] sm:$0xff]  ;;  %v10120_v48 = vld [vmem:[#allocation2 + $0x2d] sm:$0xff]  ;;  %v1262_v9 = vld [vmem:[#allocation2 + $0x5] sm:$0xff] }
  0xea   : > { %v10122_v49 = vld [vmem:[#allocation2 + $0x35] sm:$0xff]  ;;  %v10124_v50 = vld [vmem:[#allocation2 + $0x3d] sm:$0xff]  ;;  %v10138_v57 = vld [vmem:[#allocation2 + $0x28] sm:$0xff] }
  0xeb   : > { %7896 = vmatmul.mubr.msk.f32.gmra.mrb[6].mxu0 %vm655_vm2, %v10059_v19  ;;  %v10126_v51 = vld [vmem:[#allocation2 + $0x2e] sm:$0xff]  ;;  %v10128_v52 = vld [vmem:[#allocation2 + $0x36] sm:$0xff]  ;;  %v10130_v53 = vld [vmem:[#allocation2 + $0x3e] sm:$0xff] }
  0xec   : > { %7900 = vmatprep.mubr.msk.f32.mxu0 %vm655_vm2, %v1112_v20  ;;  %v10132_v54 = vld [vmem:[#allocation2 + $0x2f] sm:$0xff]  ;;  %v10134_v55 = vld [vmem:[#allocation2 + $0x37] sm:$0xff]  ;;  %v10136_v56 = vld [vmem:[#allocation2 + $0x3f] sm:$0xff] }
  0xed   : > { %11643 = vst [vmem:[#allocation30_spill] sm:$0xff] %v10132_v54  ;;  %v10140_v58 = vld [vmem:[#allocation2 + $0x30] sm:$0xff]  ;;  %v10142_v59 = vld [vmem:[#allocation2 + $0x38] sm:$0xff]  ;;  %v10159_v3 = vld [vmem:[#allocation2 + $0x22] sm:$0xff] }
  0xee   : > { %v10144_v60 = vld [vmem:[#allocation2 + $0x29] sm:$0xff]  ;;  %v10146_v61 = vld [vmem:[#allocation2 + $0x31] sm:$0xff]  ;;  %v10148_v62 = vld [vmem:[#allocation2 + $0x39] sm:$0xff] }
  0xef   : > { %7901 = vmatmul.mubr.msk.f32.vlgmr.msra.gmra.mrb[0].mxu0 %vm655_vm2, %v10064_v21  ;;  %v10150_v63 = vld [vmem:[#allocation2 + $0xa] sm:$0xff]  ;;  %v10155_v1 = vld [vmem:[#allocation2 + $0x12] sm:$0xff]  ;;  %v10157_v2 = vld [vmem:[#allocation2 + $0x1a] sm:$0xff] }
  0xf0   : > { %7903 = vmatprep.mubr.msk.f32.mxu0 %vm655_vm2, %v10066_v22  ;;  %7913 = vmatpush3.msk.msra.mxu0 %vm703_vm1, %v1271_v14  ;;  %v10163_v4 = vld [vmem:[#allocation2 + $0x2a] sm:$0xff]  ;;  %v10165_v5 = vld [vmem:[#allocation2 + $0x32] sm:$0xff]  ;;  %v10167_v6 = vld [vmem:[#allocation2 + $0x3a] sm:$0xff]  ;;  %3499 = vst.msk [vmem:[#allocation2 + $0x10] sm:$0xff] %vm644_vm0, %v11597_v0 }
  0xf1   : > { %7926 = vmatprep.subr.msk.mxu0 %vm703_vm1, %v10068_v23  ;;  %3500 = vst.msk [vmem:[#allocation2 + $0x18] sm:$0xff] %vm644_vm0, %v11597_v0  ;;  %3501 = vst.msk [vmem:[#allocation2 + $0x20] sm:$0xff] %vm644_vm0, %v11597_v0  ;;  %v664_v8 = vld [vmem:[#allocation2 + $0x1] sm:$0xff]  ;;  %v821_v14 = vld [vmem:[#allocation3 + $0x4] sm:$0xf] }
  0xf2   : > { %3502 = vst.msk [vmem:[#allocation2 + $0x28] sm:$0xff] %vm644_vm0, %v11597_v0  ;;  %3503 = vst.msk [vmem:[#allocation2 + $0x30] sm:$0xff] %vm644_vm0, %v11597_v0  ;;  %7858 = vmatprep.mubr.msk.f32.mxu1 %vm655_vm2, %v664_v8  ;;  %v1412_v11 = vld [vmem:[#allocation2 + $0x6] sm:$0xff]  ;;  %7870 = vmatprep.subr.msk.mxu1 %vm703_vm1, %v821_v14 }
  0xf3   : > { %3504 = vst.msk [vmem:[#allocation2 + $0x38] sm:$0xff] %vm644_vm0, %v11597_v0  ;;  %7904 = vmatmul.mubr.msk.f32.gmra.mrb[2].mxu0 %vm655_vm2, %v10070_v24  ;;  %7859 = vmatmul.mubr.msk.f32.vlgmr.msra.gmra.mrb[0].mxu1 %vm655_vm2, %v10104_v41  ;;  %v1562_v20 = vld [vmem:[#allocation2 + $0x7] sm:$0xff] }
  0xf4   : > { %7906 = vmatprep.mubr.msk.f32.mxu0 %vm655_vm2, %v10072_v25  ;;  %7861 = vmatprep.mubr.msk.f32.mxu1 %vm655_vm2, %v10106_v42  ;;  %v812_v7 = vld [vmem:[#allocation2 + $0x2] sm:$0xff]  ;;  %v1721_v8 = vld [vmem:[#allocation3 + $0x1c] sm:$0xf] }
  0xf5   : > { %7871 = vmatpush3.msk.msra.mxu1 %vm703_vm1, %v821_v14  ;;  %3497 = vst.msk [vmem:[#allocation2] sm:$0xff] %vm644_vm0, %v11597_v0  ;;  %v2019_v14 = vld [vmem:[#allocation2 + $0x42] sm:$0xff] }
  0xf7   : > { %7907 = vmatmul.mubr.msk.f32.gmra.mrb[4].mxu0 %vm655_vm2, %v10114_v45  ;;  %7862 = vmatmul.mubr.msk.f32.gmra.mrb[2].mxu1 %vm655_vm2, %v10108_v43 }
  0xf8   : > { %7909 = vmatprep.mubr.msk.f32.mxu0 %vm655_vm2, %v10116_v46  ;;  %7864 = vmatprep.mubr.msk.f32.mxu1 %vm655_vm2, %v10110_v44 }
  0xfb   : > { %7910 = vmatmul.mubr.msk.f32.gmra.mrb[6].mxu0 %vm655_vm2, %v10118_v47  ;;  %7865 = vmatmul.mubr.msk.f32.gmra.mrb[4].mxu1 %vm655_vm2, %v10144_v60 }
  0xfc   : > { %7914 = vmatprep.mubr.msk.f32.mxu0 %vm655_vm2, %v1262_v9  ;;  %7867 = vmatprep.mubr.msk.f32.mxu1 %vm655_vm2, %v10146_v61  ;;  %v1871_v9 = vld [vmem:[#allocation3 + $0x20] sm:$0xf] }
  0xff   : > { %7915 = vmatmul.mubr.msk.f32.vlgmr.msra.gmra.mrb[0].mxu0 %vm655_vm2, %v10074_v26  ;;  %7868 = vmatmul.mubr.msk.f32.gmra.mrb[6].mxu1 %vm655_vm2, %v10148_v62 }
 0x100   : > { %7917 = vmatprep.mubr.msk.f32.mxu0 %vm655_vm2, %v10076_v27  ;;  %7927 = vmatpush3.msk.msra.mxu0 %vm703_vm1, %v10068_v23  ;;  %v1712_v23 = vld [vmem:[#allocation2 + $0x8] sm:$0xff] }
 0x101   : > { %7940 = vmatprep.subr.msk.mxu0 %vm703_vm1, %v1571_v10  ;;  %7872 = vmatprep.mubr.msk.f32.mxu1 %vm655_vm2, %v812_v7  ;;  %3498 = vst.msk [vmem:[#allocation2 + $0x8] sm:$0xff] %vm644_vm0, %v11597_v0  ;;  %v2319_v7 = vld [vmem:[#allocation2 + $0x44] sm:$0xff] }
 0x102   : > { %v10281_v0 = vld [vmem:[#allocation2 + $0x46] sm:$0xff] }
 0x103   : > { %7918 = vmatmul.mubr.msk.f32.gmra.mrb[2].mxu0 %vm655_vm2, %v10078_v28  ;;  %7873 = vmatmul.mubr.msk.f32.vlgmr.msra.gmra.mrb[0].mxu1 %vm655_vm2, %v10150_v63 }
 0x104   : > { %7920 = vmatprep.mubr.msk.f32.mxu0 %vm655_vm2, %v10080_v29  ;;  %7875 = vmatprep.mubr.msk.f32.mxu1 %vm655_vm2, %v10155_v1 }
 0x107   : > { %7921 = vmatmul.mubr.msk.f32.gmra.mrb[4].mxu0 %vm655_vm2, %v10120_v48  ;;  %7876 = vmatmul.mubr.msk.f32.gmra.mrb[2].mxu1 %vm655_vm2, %v10157_v2 }
 0x108   : > { %7923 = vmatprep.mubr.msk.f32.mxu0 %vm655_vm2, %v10122_v49  ;;  %7878 = vmatprep.mubr.msk.f32.mxu1 %vm655_vm2, %v10159_v3 }
 0x10b   : > { %7924 = vmatmul.mubr.msk.f32.gmra.mrb[6].mxu0 %vm655_vm2, %v10124_v50  ;;  %7879 = vmatmul.mubr.msk.f32.gmra.mrb[4].mxu1 %vm655_vm2, %v10163_v4 }
 0x10c   : > { %7928 = vmatprep.mubr.msk.f32.mxu0 %vm655_vm2, %v1412_v11  ;;  %7881 = vmatprep.mubr.msk.f32.mxu1 %vm655_vm2, %v10165_v5  ;;  %v1869_v11 = vld [vmem:[#allocation2 + $0x41] sm:$0xff] }
 0x10f   : > { %7929 = vmatmul.mubr.msk.f32.vlgmr.msra.gmra.mrb[0].mxu0 %vm655_vm2, %v10082_v30  ;;  %7882 = vmatmul.mubr.msk.f32.gmra.mrb[6].mxu1 %vm655_vm2, %v10167_v6 }
 0x110   : > { %7931 = vmatprep.mubr.msk.f32.mxu0 %vm655_vm2, %v10084_v31  ;;  %7941 = vmatpush3.msk.msra.mxu0 %vm703_vm1, %v1571_v10  ;;  %v1719_v10 = vld [vmem:[#allocation2 + $0x40] sm:$0xff] }
 0x111   : > { %7954 = vmatprep.subr.msk.mxu0 %vm703_vm1, %v1721_v8 }
 0x113   : > { %7932 = vmatmul.mubr.msk.f32.gmra.mrb[2].mxu0 %vm655_vm2, %v10086_v32 }
 0x114   : > { %7934 = vmatprep.mubr.msk.f32.mxu0 %vm655_vm2, %v10088_v33 }
 0x117   : > { %7935 = vmatmul.mubr.msk.f32.gmra.mrb[4].mxu0 %vm655_vm2, %v10126_v51 }
 0x118   : > { %7937 = vmatprep.mubr.msk.f32.mxu0 %vm655_vm2, %v10128_v52 }
 0x11b   : > { %7938 = vmatmul.mubr.msk.f32.gmra.mrb[6].mxu0 %vm655_vm2, %v10130_v53 }
 0x11c   : > { %7942 = vmatprep.mubr.msk.f32.mxu0 %vm655_vm2, %v1562_v20  ;;  %v2169_v20 = vld [vmem:[#allocation2 + $0x43] sm:$0xff] }
 0x11f   : > { %7943 = vmatmul.mubr.msk.f32.vlgmr.msra.gmra.mrb[0].mxu0 %vm655_vm2, %v10090_v34 }
 0x120   : > { %7945 = vmatprep.mubr.msk.f32.mxu0 %vm655_vm2, %v10092_v35  ;;  %7955 = vmatpush3.msk.msra.mxu0 %vm703_vm1, %v1721_v8  ;;  %v10279_v8 = vld [vmem:[#allocation2 + $0x45] sm:$0xff] }
 0x121   : > { %7968 = vmatprep.subr.msk.mxu0 %vm703_vm1, %v1871_v9  ;;  %v10283_v35 = vld [vmem:[#allocation2 + $0x47] sm:$0xff] }
 0x123   : > { %7946 = vmatmul.mubr.msk.f32.gmra.mrb[2].mxu0 %vm655_vm2, %v10094_v36  ;;  %v11644_v36 = vmov 0.0  }
 0x124   : > { %7948 = vmatprep.mubr.msk.f32.mxu0 %vm655_vm2, %v10096_v37  ;;  %3505 = vst.msk [vmem:[#allocation2 + $0x40] sm:$0xff] %vm644_vm0, %v11644_v36  ;;  %3506 = vst.msk [vmem:[#allocation2 + $0x48] sm:$0xff] %vm644_vm0, %v11644_v36 }
 0x127   : > { %7949 = vmatmul.mubr.msk.f32.gmra.mrb[4].mxu0 %vm655_vm2, %v10132_v54  ;;  %v2021_v54 = vld [vmem:[#allocation3 + $0x24] sm:$0xf] }
 0x128   : > { %7951 = vmatprep.mubr.msk.f32.mxu0 %vm655_vm2, %v10134_v55 }
 0x12b   : > { %7952 = vmatmul.mubr.msk.f32.gmra.mrb[6].mxu0 %vm655_vm2, %v10136_v56 }
 0x12c   : > { %7956 = vmatprep.mubr.msk.f32.mxu0 %vm655_vm2, %v1712_v23 }
 0x12f   : > { %7957 = vmatmul.mubr.msk.f32.vlgmr.msra.gmra.mrb[0].mxu0 %vm655_vm2, %v10098_v38  ;;  %v2171_v38 = vld [vmem:[#allocation3 + $0x28] sm:$0xf] }
 0x130   : > { %7959 = vmatprep.mubr.msk.f32.mxu0 %vm655_vm2, %v10100_v39  ;;  %7969 = vmatpush3.msk.msra.mxu0 %vm703_vm1, %v1871_v9  ;;  %v2321_v39 = vld [vmem:[#allocation3 + $0x2c] sm:$0xf] }
 0x131   : > { %7982 = vmatprep.subr.msk.mxu0 %vm703_vm1, %v2021_v54 }
 0x133   : > { %7960 = vmatmul.mubr.msk.f32.gmra.mrb[2].mxu0 %vm655_vm2, %v10102_v40  ;;  %v2471_v40 = vld [vmem:[#allocation3 + $0x30] sm:$0xf] }
 0x134   : > { %7962 = vmatprep.mubr.msk.f32.mxu0 %vm655_vm2, %v10138_v57 }
 0x137   : > { %7963 = vmatmul.mubr.msk.f32.gmra.mrb[4].mxu0 %vm655_vm2, %v10140_v58 }
 0x138   : > { %7965 = vmatprep.mubr.msk.f32.mxu0 %vm655_vm2, %v10142_v59 }
 0x13b   : > { %7966 = vmatmul.mubr.msk.f32.gmra.mrb[6].mxu0 %vm655_vm2, %v1719_v10 }
 0x13c   : > { %7970 = vmatprep.mubr.msk.f32.mxu0 %vm655_vm2, %v10104_v41  ;;  %v3136_v41 = vld [vmem:[#allocation6 + $0x38] sm:$0xff] }
 0x13f   : > { %7971 = vmatmul.mubr.msk.f32.vlgmr.msra.gmra.mrb[0].mxu0 %vm655_vm2, %v10106_v42 }
 0x140   : > { %7973 = vmatprep.mubr.msk.f32.mxu0 %vm655_vm2, %v10108_v43  ;;  %7983 = vmatpush3.msk.msra.mxu0 %vm703_vm1, %v2021_v54  ;;  %v7173_v43 = vld [vmem:[%s11562_s2] ss:$0 sm:$0xff] }
 0x141   : > { %7996 = vmatprep.subr.msk.mxu0 %vm703_vm1, %v2171_v38 }
 0x143   : > { %7974 = vmatmul.mubr.msk.f32.gmra.mrb[2].mxu0 %vm655_vm2, %v10110_v44 }
 0x144   : > { %7976 = vmatprep.mubr.msk.f32.mxu0 %vm655_vm2, %v10144_v60 }
 0x147   : > { %7977 = vmatmul.mubr.msk.f32.gmra.mrb[4].mxu0 %vm655_vm2, %v10146_v61 }
 0x148   : > { %7979 = vmatprep.mubr.msk.f32.mxu0 %vm655_vm2, %v10148_v62 }
 0x14b   : > { %7980 = vmatmul.mubr.msk.f32.gmra.mrb[6].mxu0 %vm655_vm2, %v1869_v11 }
 0x14c   : > { %7984 = vmatprep.mubr.msk.f32.mxu0 %vm655_vm2, %v10150_v63 }
 0x14f   : > { %7985 = vmatmul.mubr.msk.f32.vlgmr.msra.gmra.mrb[0].mxu0 %vm655_vm2, %v10155_v1 }
 0x150   : > { %7987 = vmatprep.mubr.msk.f32.mxu0 %vm655_vm2, %v10157_v2  ;;  %7997 = vmatpush3.msk.msra.mxu0 %vm703_vm1, %v2171_v38 }
 0x151   : > { %8010 = vmatprep.subr.msk.mxu0 %vm703_vm1, %v2321_v39 }
 0x153   : > { %7988 = vmatmul.mubr.msk.f32.gmra.mrb[2].mxu0 %vm655_vm2, %v10159_v3 }
 0x154   : > { %7990 = vmatprep.mubr.msk.f32.mxu0 %vm655_vm2, %v10163_v4 }
 0x157   : > { %7991 = vmatmul.mubr.msk.f32.gmra.mrb[4].mxu0 %vm655_vm2, %v10165_v5 }
 0x158   : > { %7993 = vmatprep.mubr.msk.f32.mxu0 %vm655_vm2, %v10167_v6 }
 0x15b   : > { %7994 = vmatmul.mubr.msk.f32.gmra.mrb[6].mxu0 %vm655_vm2, %v2019_v14 }
 0x15c   : > { %7998 = vmatprep.mubr.msk.f32.mxu0 %vm655_vm2, %v10032_v12  ;;  %v2621_v12 = vld [vmem:[#allocation3 + $0x34] sm:$0xf] }
 0x15f   : > { %7999 = vmatmul.mubr.msk.f32.vlgmr.msra.gmra.mrb[0].mxu0 %vm655_vm2, %v10035_v13  ;;  %v2771_v13 = vld [vmem:[#allocation3 + $0x38] sm:$0xf] }
 0x160   : > { %8001 = vmatprep.mubr.msk.f32.mxu0 %vm655_vm2, %v10041_v15  ;;  %8011 = vmatpush3.msk.msra.mxu0 %vm703_vm1, %v2321_v39  ;;  %v11645_v15 = vld [vmem:[#allocation28_spill] sm:$0xff] }
 0x161   : > { %8024 = vmatprep.subr.msk.mxu0 %vm703_vm1, %v2471_v40 }
 0x163   : > { %8002 = vmatmul.mubr.msk.f32.gmra.mrb[2].mxu0 %vm655_vm2, %v10044_v16  ;;  %v11646_v16 = vld [vmem:[#allocation29_spill] sm:$0xff] }
 0x164   : > { %8004 = vmatprep.mubr.msk.f32.mxu0 %vm655_vm2, %v10051_v17  ;;  %v11647_v17 = vld [vmem:[#allocation30_spill] sm:$0xff] }
 0x167   : > { %8005 = vmatmul.mubr.msk.f32.gmra.mrb[4].mxu0 %vm655_vm2, %v10053_v18 }
 0x168   : > { %8007 = vmatprep.mubr.msk.f32.mxu0 %vm655_vm2, %v10059_v19 }
 0x16b   : > { %8008 = vmatmul.mubr.msk.f32.gmra.mrb[6].mxu0 %vm655_vm2, %v2169_v20 }
 0x16c   : > { %8012 = vmatprep.mubr.msk.f32.mxu0 %vm655_vm2, %v10064_v21 }
 0x16f   : > { %8013 = vmatmul.mubr.msk.f32.vlgmr.msra.gmra.mrb[0].mxu0 %vm655_vm2, %v10066_v22 }
 0x170   : > { %8015 = vmatprep.mubr.msk.f32.mxu0 %vm655_vm2, %v10070_v24  ;;  %8025 = vmatpush3.msk.msra.mxu0 %vm703_vm1, %v2471_v40 }
 0x171   : > { %8038 = vmatprep.subr.msk.mxu0 %vm703_vm1, %v2621_v12 }
 0x173   : > { %8016 = vmatmul.mubr.msk.f32.gmra.mrb[2].mxu0 %vm655_vm2, %v10072_v25 }
 0x174   : > { %8018 = vmatprep.mubr.msk.f32.mxu0 %vm655_vm2, %v10114_v45 }
 0x177   : > { %8019 = vmatmul.mubr.msk.f32.gmra.mrb[4].mxu0 %vm655_vm2, %v10116_v46 }
 0x178   : > { %8021 = vmatprep.mubr.msk.f32.mxu0 %vm655_vm2, %v10118_v47 }
 0x17b   : > { %8022 = vmatmul.mubr.msk.f32.gmra.mrb[6].mxu0 %vm655_vm2, %v2319_v7 }
 0x17c   : > { %8026 = vmatprep.mubr.msk.f32.mxu0 %vm655_vm2, %v10074_v26 }
 0x17f   : > { %8027 = vmatmul.mubr.msk.f32.vlgmr.msra.gmra.mrb[0].mxu0 %vm655_vm2, %v10076_v27  ;;  %v3129_v27 = vld [vmem:[#allocation6] sm:$0xff] }
 0x180   : > { %8029 = vmatprep.mubr.msk.f32.mxu0 %vm655_vm2, %v10078_v28  ;;  %8039 = vmatpush3.msk.msra.mxu0 %vm703_vm1, %v2621_v12  ;;  %v3130_v28 = vld [vmem:[#allocation6 + $0x8] sm:$0xff] }
 0x181   : > { %8052 = vmatprep.subr.msk.mxu0 %vm703_vm1, %v2771_v13 }
 0x183   : > { %8030 = vmatmul.mubr.msk.f32.gmra.mrb[2].mxu0 %vm655_vm2, %v10080_v29  ;;  %v8588_v29 = vpack.c.bf16 %v3130_v28, %v3129_v27 }
 0x184   : > { %8032 = vmatprep.mubr.msk.f32.mxu0 %vm655_vm2, %v10120_v48 }
 0x185   : > { %8589 = vmatprep.subr.bf16.mxu1 %v8588_v29 }
 0x186   : > { %8591 = vmatpush3.bf16.msra.mxu1 %v8588_v29 }
 0x187   : > { %8033 = vmatmul.mubr.msk.f32.gmra.mrb[4].mxu0 %vm655_vm2, %v10122_v49 }
 0x188   : > { %8035 = vmatprep.mubr.msk.f32.mxu0 %vm655_vm2, %v10124_v50 }
 0x18b   : > { %8036 = vmatmul.mubr.msk.f32.gmra.mrb[6].mxu0 %vm655_vm2, %v10279_v8 }
 0x18c   : > { %8040 = vmatprep.mubr.msk.f32.mxu0 %vm655_vm2, %v10082_v30  ;;  %v3131_v30 = vld [vmem:[#allocation6 + $0x10] sm:$0xff] }
 0x18f   : > { %8041 = vmatmul.mubr.msk.f32.vlgmr.msra.gmra.mrb[0].mxu0 %vm655_vm2, %v10084_v31  ;;  %v3132_v31 = vld [vmem:[#allocation6 + $0x18] sm:$0xff] }
 0x190   : > { %8043 = vmatprep.mubr.msk.f32.mxu0 %vm655_vm2, %v10086_v32  ;;  %8053 = vmatpush3.msk.msra.mxu0 %vm703_vm1, %v2771_v13  ;;  %v8592_v32 = vpack.c.bf16 %v3132_v31, %v3131_v30 }
 0x192   : > { %8593 = vmatprep.subr.bf16.mxu1 %v8592_v32 }
 0x193   : > { %8044 = vmatmul.mubr.msk.f32.gmra.mrb[2].mxu0 %vm655_vm2, %v10088_v33  ;;  %8595 = vmatpush3.bf16.msra.mxu1 %v8592_v32  ;;  %v3133_v33 = vld [vmem:[#allocation6 + $0x20] sm:$0xff] }
 0x194   : > { %8046 = vmatprep.mubr.msk.f32.mxu0 %vm655_vm2, %v10126_v51 }
 0x197   : > { %8047 = vmatmul.mubr.msk.f32.gmra.mrb[4].mxu0 %vm655_vm2, %v10128_v52 }
 0x198   : > { %8049 = vmatprep.mubr.msk.f32.mxu0 %vm655_vm2, %v10130_v53 }
 0x19b   : > { %8050 = vmatmul.mubr.msk.f32.gmra.mrb[6].mxu0 %vm655_vm2, %v10281_v0 }
 0x19c   : > { %8054 = vmatprep.mubr.msk.f32.mxu0 %vm655_vm2, %v10090_v34  ;;  %v3134_v34 = vld [vmem:[#allocation6 + $0x28] sm:$0xff] }
 0x19f   : > { %8055 = vmatmul.mubr.msk.f32.vlgmr.msra.gmra.mrb[0].mxu0 %vm655_vm2, %v11645_v15 }
 0x1a0   : > { %8057 = vmatprep.mubr.msk.f32.mxu0 %vm655_vm2, %v11646_v16 }
 0x1a3   : > { %8058 = vmatmul.mubr.msk.f32.gmra.mrb[2].mxu0 %vm655_vm2, %v10096_v37  ;;  %v3135_v37 = vld [vmem:[#allocation6 + $0x30] sm:$0xff] }
 0x1a4   : > { %8060 = vmatprep.mubr.msk.f32.mxu0 %vm655_vm2, %v11647_v17  ;;  %v8600_v42 = vpack.c.bf16 %v3136_v41, %v3135_v37 }
 0x1a7   : > { %8061 = vmatmul.mubr.msk.f32.gmra.mrb[4].mxu0 %vm655_vm2, %v10134_v55 }
 0x1a8   : > { %8063 = vmatprep.mubr.msk.f32.mxu0 %vm655_vm2, %v10136_v56 }
 0x1ab   : > { %8064 = vmatmul.mubr.msk.f32.gmra.mrb[6].mxu0 %vm655_vm2, %v10283_v35  ;;  %v8596_v35 = vpack.c.bf16 %v3134_v34, %v3133_v33 }
 0x1ad   : > { %8597 = vmatprep.subr.bf16.mxu1 %v8596_v35 }
 0x1ae   : > { %8599 = vmatpush3.bf16.msra.mxu1 %v8596_v35 }
 0x1af   : > { %8601 = vmatprep.subr.bf16.mxu1 %v8600_v42 }
 0x1b2   : > { %8603 = vmatpush3.bf16.msra.mxu1 %v8600_v42 }
 0x1d6   : > { %v7874_v0 = vpop.f32.mrb[0].mxu1 }
 0x1d7   : > { %v915_v18 = vpop.f32.mrb[1].mxu1  ;;  %v8946_v44 = vadd.f32 %v7874_v0, %v7173_v43 }
 0x1d8   : > { %v8948_v45 = vadd.f32 %v7173_v43, %v915_v18 }
 0x1da   : > { %v7877_v19 = vpop.f32.mrb[2].mxu1 }
 0x1db   : > { %v925_v21 = vpop.f32.mrb[3].mxu1  ;;  %v8950_v50 = vadd.f32 %v7877_v19, %v7173_v43 }
 0x1dc   : > { %v8952_v52 = vadd.f32 %v7173_v43, %v925_v21 }
 0x1de   : > { %v7880_v22 = vpop.f32.mrb[4].mxu1 }
 0x1df   : > { %v935_v24 = vpop.f32.mrb[5].mxu1  ;;  %v8954_v23 = vadd.f32 %v7880_v22, %v7173_v43 }
 0x1e0   : > { %v8956_v10 = vadd.f32 %v7173_v43, %v935_v24 }
 0x1e2   : > { %v10426_v25 = vpop.f32.mrb[6].mxu1 }
 0x1e3   : > { %v10428_v26 = vpop.f32.mrb[7].mxu1  ;;  %v8958_v13 = vadd.f32 %v10426_v25, %v7173_v43 }
 0x1e4   : > { %v8960_v17 = vadd.f32 %v7173_v43, %v10428_v26 }
 0x272   : > { %v8056_v46 = vpop.f32.mrb[0].mxu0 }
 0x273   : > { %v8947_v47 = vadd.f32 %v8946_v44, %v8056_v46  ;;  %v2865_v48 = vpop.f32.mrb[1].mxu0 }
 0x274   : > { %v10433_v49 = vadd.f32 %v8948_v45, %v2865_v48 }
 0x275   : > { %v10435_v51 = vmul.f32 0.70710677, %v8947_v47  ;;  %v10472_v28 = vmul.f32 0.5, %v8947_v47 }
 0x276   : > { %v10438_v53 = vmul.f32 0.70710677, %v10433_v49  ;;  %v8059_v54 = vpop.f32.mrb[2].mxu0 }
 0x277   : > { %v2929_v55 = vand.u32 2147483647, %v10435_v51  ;;  %v10441_v56 = vadd.f32 %v8950_v50, %v8059_v54  ;;  %v2875_v57 = vpop.f32.mrb[3].mxu0  ;;  %vm3089_vm3 = vcmp.ge.f32.partialorder %v10435_v51, 0.0 }
 0x278   : > { %v2928_v58 = vand.u32 2147483647, %v10438_v53  ;;  %v10444_v59 = vadd.f32 %v8952_v52, %v2875_v57  ;;  %vm3088_vm4 = vcmp.ge.f32.partialorder %v10438_v53, 0.0 }
 0x279   : > { %v2937_v60 = vmul.f32 0.3275911, %v2929_v55  ;;  %v10447_v61 = vmul.f32 0.70710677, %v10441_v56  ;;  %v3041_v11 = vsub.f32 0.0, %v2929_v55 }
 0x27a   : > { %v2936_v62 = vmul.f32 0.3275911, %v2928_v58  ;;  %v10450_v63 = vmul.f32 0.70710677, %v10444_v59  ;;  %v8062_v3 = vpop.f32.mrb[4].mxu0  ;;  %v3040_v7 = vsub.f32 0.0, %v2928_v58 }
 0x27b   : > { %v2945_v1 = vadd.f32 1.0, %v2937_v60  ;;  %v2931_v2 = vand.u32 2147483647, %v10447_v61  ;;  %v2885_v6 = vpop.f32.mrb[5].mxu0  ;;  %v10454_v38 = vadd.f32 %v8954_v23, %v8062_v3  ;;  %v3049_v0 = vmul.f32 %v3041_v11, %v2929_v55 }
 0x27c   : > { %v2944_v4 = vadd.f32 1.0, %v2936_v62  ;;  %v2930_v5 = vand.u32 2147483647, %v10450_v63  ;;  %v10456_v12 = vadd.f32 %v8956_v10, %v2885_v6  ;;  %v3048_v19 = vmul.f32 %v3040_v7, %v2928_v58 }
 0x27d   : > { %9243 = vrcp.f32 %v2945_v1  ;;  %v2939_v9 = vmul.f32 0.3275911, %v2931_v2  ;;  %v3043_v15 = vsub.f32 0.0, %v2931_v2  ;;  %v10460_v16 = vmul.f32 0.70710677, %v10454_v38 }
 0x27e   : > { %9245 = vrcp.f32 %v2944_v4  ;;  %v2938_v14 = vmul.f32 0.3275911, %v2930_v5  ;;  %v8065_v20 = vpop.f32.mrb[6].mxu0  ;;  %v10464_v18 = vmul.f32 0.70710677, %v10456_v12  ;;  %v3042_v21 = vsub.f32 0.0, %v2930_v5 }
 0x27f   : > { %v2947_v8 = vadd.f32 1.0, %v2939_v9  ;;  %v2895_v39 = vpop.f32.mrb[7].mxu0  ;;  %v2933_v22 = vand.u32 2147483647, %v10460_v16  ;;  %v10467_v24 = vadd.f32 %v8958_v13, %v8065_v20  ;;  %v3051_v29 = vmul.f32 %v3043_v15, %v2931_v2 }
 0x280   : > { %v2946_v40 = vadd.f32 1.0, %v2938_v14  ;;  %v2932_v25 = vand.u32 2147483647, %v10464_v18  ;;  %v10470_v27 = vadd.f32 %v8960_v17, %v2895_v39  ;;  %v3058_v31 = vmul.f32 1.442695, %v3049_v0 }
 0x281   : > { %9247 = vrcp.f32 %v2947_v8  ;;  %v2941_v30 = vmul.f32 0.3275911, %v2933_v22  ;;  %v10475_v26 = vmul.f32 0.70710677, %v10467_v24  ;;  %v3056_v35 = vmul.f32 1.442695, %v3048_v19 }
 0x282   : > { %9249 = vrcp.f32 %v2946_v40  ;;  %v2940_v32 = vmul.f32 0.3275911, %v2932_v25  ;;  %v10478_v33 = vmul.f32 0.70710677, %v10470_v27  ;;  %v3050_v37 = vmul.f32 %v3042_v21, %v2930_v5 }
 0x283   : > { %v2949_v41 = vadd.f32 1.0, %v2941_v30  ;;  %v2935_v42 = vand.u32 2147483647, %v10475_v26  ;;  %v3045_v45 = vsub.f32 0.0, %v2933_v22  ;;  %v3062_v50 = vmul.f32 1.442695, %v3051_v29 }
 0x284   : > { %v2948_v46 = vadd.f32 1.0, %v2940_v32  ;;  %v2934_v47 = vand.u32 2147483647, %v10478_v33  ;;  %v3044_v55 = vsub.f32 0.0, %v2932_v25  ;;  %v3060_v5 = vmul.f32 1.442695, %v3050_v37 }
 0x285   : > { %9251 = vrcp.f32 %v2949_v41  ;;  %v2943_v52 = vmul.f32 0.3275911, %v2935_v42  ;;  %v3047_v57 = vsub.f32 0.0, %v2935_v42  ;;  %v3053_v6 = vmul.f32 %v3045_v45, %v2933_v22 }
 0x286   : > { %9253 = vrcp.f32 %v2948_v46  ;;  %v2942_v1 = vmul.f32 0.3275911, %v2934_v47  ;;  %v3052_v20 = vmul.f32 %v3044_v55, %v2932_v25  ;;  %v3046_v40 = vsub.f32 0.0, %v2934_v47 }
 0x287   : > { %v10480_v34 = vpop.eup %9243  ;;  %9255 = vpow2.f32 %v3058_v31  ;;  %v2951_v62 = vadd.f32 1.0, %v2943_v52  ;;  %v3055_v7 = vmul.f32 %v3047_v57, %v2935_v42  ;;  %v3066_v17 = vmul.f32 1.442695, %v3053_v6 }
 0x288   : > { %v10483_v43 = vpop.eup %9245  ;;  %v2969_v44 = vmul.f32 1.0614054, %v10480_v34  ;;  %v2950_v10 = vadd.f32 1.0, %v2942_v1  ;;  %v10499_v0 = vmul.f32 0.5, %v10433_v49  ;;  %v3054_v22 = vmul.f32 %v3046_v40, %v2934_v47 }
 0x289   : > { %v2968_v48 = vmul.f32 1.0614054, %v10483_v43  ;;  %9257 = vrcp.f32 %v2951_v62  ;;  %v3064_v30 = vmul.f32 1.442695, %v3052_v20  ;;  %vm3091_vm5 = vcmp.ge.f32.partialorder %v10447_v61, 0.0 }
 0x28a   : > { %v2977_v54 = vadd.f32 -1.4531521, %v2969_v44  ;;  %9259 = vrcp.f32 %v2950_v10  ;;  %vm3090_vm6 = vcmp.ge.f32.partialorder %v10450_v63, 0.0  ;;  %v2915_v61 = vmul.f32 0.5, %v10441_v56 }
 0x28b   : > { %v10488_v58 = vpop.eup %9247  ;;  %v2976_v60 = vadd.f32 -1.4531521, %v2968_v48  ;;  %9261 = vpow2.f32 %v3056_v35  ;;  %v3070_v35 = vmul.f32 1.442695, %v3055_v7  ;;  %vm3093_vm7 = vcmp.ge.f32.partialorder %v10460_v16, 0.0 }
 0x28c   : > { %v10490_v2 = vpop.eup %9249  ;;  %v2985_v3 = vmul.f32 %v10480_v34, %v2977_v54  ;;  %v2971_v4 = vmul.f32 1.0614054, %v10488_v58  ;;  %9263 = vpow2.f32 %v3062_v50  ;;  %v3068_v50 = vmul.f32 1.442695, %v3054_v22 }
 0x28d   : > { %v2984_v23 = vmul.f32 %v10483_v43, %v2976_v60  ;;  %v2970_v9 = vmul.f32 1.0614054, %v10490_v2  ;;  %9265 = vpow2.f32 %v3060_v5  ;;  %vm3092_vm8 = vcmp.ge.f32.partialorder %v10464_v18, 0.0 }
 0x28e   : > { %v2993_v11 = vadd.f32 1.4214138, %v2985_v3  ;;  %v2979_v14 = vadd.f32 -1.4531521, %v2971_v4  ;;  %9267 = vpow2.f32 %v3066_v17  ;;  %vm3095_vm9 = vcmp.ge.f32.partialorder %v10475_v26, 0.0 }
 0x28f   : > { %v2992_v8 = vadd.f32 1.4214138, %v2984_v23  ;;  %v2978_v39 = vadd.f32 -1.4531521, %v2970_v9  ;;  %v10503_v31 = vpop.eup %9251  ;;  %9269 = vpow2.f32 %v3064_v30  ;;  %vm3094_vm10 = vcmp.ge.f32.partialorder %v10478_v33, 0.0 }
 0x290   : > { %v3001_v13 = vmul.f32 %v10480_v34, %v2993_v11  ;;  %v2987_v15 = vmul.f32 %v10488_v58, %v2979_v14  ;;  %v10505_v41 = vpop.eup %9253  ;;  %v2973_v44 = vmul.f32 1.0614054, %v10503_v31  ;;  %9271 = vpow2.f32 %v3070_v35 }
 0x291   : > { %v3000_v19 = vmul.f32 %v10483_v43, %v2992_v8  ;;  %v2986_v21 = vmul.f32 %v10490_v2, %v2978_v39  ;;  %v9256_v45 = vpop.eup %9255  ;;  %v2972_v48 = vmul.f32 1.0614054, %v10505_v41  ;;  %9273 = vpow2.f32 %v3068_v50 }
 0x292   : > { %v3009_v25 = vadd.f32 -0.28449672, %v3001_v13  ;;  %v2995_v29 = vadd.f32 1.4214138, %v2987_v15  ;;  %v2981_v55 = vadd.f32 -1.4531521, %v2973_v44 }
 0x293   : > { %v3008_v32 = vadd.f32 -0.28449672, %v3000_v19  ;;  %v2994_v37 = vadd.f32 1.4214138, %v2986_v21  ;;  %v10513_v57 = vpop.eup %9257  ;;  %v2980_v1 = vadd.f32 -1.4531521, %v2972_v48 }
 0x294   : > { %v3017_v49 = vmul.f32 %v10480_v34, %v3009_v25  ;;  %v3003_v42 = vmul.f32 %v10488_v58, %v2995_v29  ;;  %v2989_v5 = vmul.f32 %v10503_v31, %v2981_v55  ;;  %v2975_v6 = vmul.f32 1.0614054, %v10513_v57  ;;  %v10521_v23 = vpop.eup %9259 }
 0x295   : > { %v3016_v46 = vmul.f32 %v10483_v43, %v3008_v32  ;;  %v3002_v47 = vmul.f32 %v10490_v2, %v2994_v37  ;;  %v2988_v11 = vmul.f32 %v10505_v41, %v2980_v1  ;;  %v9262_v14 = vpop.eup %9261  ;;  %v2974_v15 = vmul.f32 1.0614054, %v10521_v23 }
 0x296   : > { %v3025_v52 = vadd.f32 0.2548296, %v3017_v49  ;;  %v3011_v54 = vadd.f32 -0.28449672, %v3003_v42  ;;  %v2997_v7 = vadd.f32 1.4214138, %v2989_v5  ;;  %v9264_v17 = vpop.eup %9263 }
 0x297   : > { %v3024_v60 = vadd.f32 0.2548296, %v3016_v46  ;;  %v3010_v62 = vadd.f32 -0.28449672, %v3002_v47  ;;  %v2983_v8 = vadd.f32 -1.4531521, %v2975_v6  ;;  %v9266_v25 = vpop.eup %9265 }
 0x298   : > { %v3033_v3 = vmul.f32 %v10480_v34, %v3025_v52  ;;  %v3019_v4 = vmul.f32 %v10488_v58, %v3011_v54  ;;  %v2996_v13 = vadd.f32 1.4214138, %v2988_v11  ;;  %v3005_v21 = vmul.f32 %v10503_v31, %v2997_v7  ;;  %v9268_v35 = vpop.eup %9267 }
 0x299   : > { %v3032_v9 = vmul.f32 %v10483_v43, %v3024_v60  ;;  %v3018_v10 = vmul.f32 %v10490_v2, %v3010_v62  ;;  %v2991_v22 = vmul.f32 %v10513_v57, %v2983_v8  ;;  %v2982_v37 = vadd.f32 -1.4531521, %v2974_v15  ;;  %v9270_v50 = vpop.eup %9269 }
 0x29a   : > { %v3073_v20 = vmul.f32 %v9256_v45, %v3033_v3  ;;  %v3027_v34 = vadd.f32 0.2548296, %v3019_v4  ;;  %v3004_v32 = vmul.f32 %v10505_v41, %v2996_v13  ;;  %v3013_v44 = vadd.f32 -0.28449672, %v3005_v21  ;;  %v9272_v60 = vpop.eup %9271 }
 0x29b   : > { %v3072_v39 = vmul.f32 %v9262_v14, %v3032_v9  ;;  %v3026_v40 = vadd.f32 0.2548296, %v3018_v10  ;;  %v2999_v45 = vadd.f32 1.4214138, %v2991_v22  ;;  %v2990_v48 = vmul.f32 %v10521_v23, %v2982_v37  ;;  %v9274_v11 = vpop.eup %9273 }
 0x29c   : > { %v3081_v19 = vsub.f32 1.0, %v3073_v20  ;;  %v3035_v43 = vmul.f32 %v10488_v58, %v3027_v34  ;;  %v3012_v47 = vadd.f32 -0.28449672, %v3004_v32 }
 0x29d   : > { %v3080_v29 = vsub.f32 1.0, %v3072_v39  ;;  %v3034_v30 = vmul.f32 %v10490_v2, %v3026_v40  ;;  %v3021_v2 = vmul.f32 %v10503_v31, %v3013_v44  ;;  %v3007_v55 = vmul.f32 %v10513_v57, %v2999_v45 }
 0x29e   : > { %v3097_v49 = vsub.f32 0.0, %v3081_v19  ;;  %v3075_v42 = vmul.f32 %v9264_v17, %v3035_v43  ;;  %v3020_v4 = vmul.f32 %v10505_v41, %v3012_v47  ;;  %v2998_v34 = vadd.f32 1.4214138, %v2990_v48 }
 0x29f   : > { %v3096_v46 = vsub.f32 0.0, %v3080_v29  ;;  %v3074_v58 = vmul.f32 %v9266_v25, %v3034_v30  ;;  %v3029_v9 = vadd.f32 0.2548296, %v3021_v2  ;;  %v3015_v10 = vadd.f32 -0.28449672, %v3007_v55 }
 0x2a0   : > { %v3105_v52 = vsel %vm3089_vm3, %v3081_v19, %v3097_v49  ;;  %v3083_v54 = vsub.f32 1.0, %v3075_v42  ;;  %v3028_v20 = vadd.f32 0.2548296, %v3020_v4  ;;  %v3006_v15 = vmul.f32 %v10521_v23, %v2998_v34 }
 0x2a1   : > { %v3113_v62 = vadd.f32 1.0, %v3105_v52  ;;  %v3104_v1 = vsel %vm3088_vm4, %v3080_v29, %v3096_v46  ;;  %v3082_v3 = vsub.f32 1.0, %v3074_v58  ;;  %v3037_v8 = vmul.f32 %v10503_v31, %v3029_v9  ;;  %v3529_v9 = vld [vmem:[#allocation8 + $0x30] sm:$0xff] }
 0x2a2   : > { %v3112_v5 = vadd.f32 1.0, %v3104_v1  ;;  %v3099_v6 = vsub.f32 0.0, %v3083_v54  ;;  %v3023_v39 = vmul.f32 %v10513_v57, %v3015_v10  ;;  %v2914_v17 = vmul.f32 0.5, %v10444_v59  ;;  %v3524_v1 = vld [vmem:[#allocation8 + $0x8] sm:$0xff]  ;;  %v3530_v10 = vld [vmem:[#allocation8 + $0x38] sm:$0xff] }
 0x2a3   : > { %v10543_v51 = vmul.f32 %v3113_v62, %v10472_v28  ;;  %v3098_v14 = vsub.f32 0.0, %v3082_v3  ;;  %v3036_v28 = vmul.f32 %v10505_v41, %v3028_v20  ;;  %v3014_v21 = vadd.f32 -0.28449672, %v3006_v15  ;;  %v3523_v62 = vld [vmem:[#allocation8] sm:$0xff]  ;;  %v3676_v20 = vld [vmem:[#allocation8 + $0x48] sm:$0xff] }
 0x2a4   : > { %v10546_v7 = vmul.f32 %v3112_v5, %v10499_v0  ;;  %v3107_v53 = vsel %vm3091_vm5, %v3083_v54, %v3099_v6  ;;  %v3077_v0 = vmul.f32 %v9268_v35, %v3037_v8  ;;  %v3031_v43 = vadd.f32 0.2548296, %v3023_v39  ;;  %v3528_v5 = vld [vmem:[#allocation8 + $0x28] sm:$0xff] }
 0x2a5   : > { %v3115_v40 = vadd.f32 1.0, %v3107_v53  ;;  %v3106_v13 = vsel %vm3090_vm6, %v3082_v3, %v3098_v14  ;;  %v3076_v31 = vmul.f32 %v9270_v50, %v3036_v28  ;;  %v3022_v29 = vmul.f32 %v10521_v23, %v3014_v21  ;;  %v3525_v3 = vld [vmem:[#allocation8 + $0x10] sm:$0xff]  ;;  %v3675_v14 = vld [vmem:[#allocation8 + $0x40] sm:$0xff] }
 0x2a6   : > { %v3114_v19 = vadd.f32 1.0, %v3106_v13  ;;  %8082 = vmatprep.mubr.msk.f32.mxu1 %vm644_vm0, %v10546_v7  ;;  %v3085_v41 = vsub.f32 1.0, %v3077_v0  ;;  %v3039_v22 = vmul.f32 %v10513_v57, %v3031_v43  ;;  %v2916_v45 = vmul.f32 0.5, %v10456_v12  ;;  %v7309_v53 = vld [vmem:[%s11564_s4] ss:$0 sm:$0xff] }
 0x2a7   : > { %8083 = vmatmul.mubr.msk.f32.vlgmr.msra.gmra.mrb[8].mxu1 %vm644_vm0, %v10543_v51  ;;  %v10565_v25 = vmul.f32 %v3115_v40, %v2915_v61  ;;  %v3084_v59 = vsub.f32 1.0, %v3076_v31  ;;  %v3030_v37 = vadd.f32 0.2548296, %v3022_v29  ;;  %v2917_v47 = vmul.f32 0.5, %v10454_v38 }
 0x2a8   : > { %v10562_v63 = vmul.f32 %v3114_v19, %v2914_v17  ;;  %v3101_v30 = vsub.f32 0.0, %v3085_v41  ;;  %v3079_v32 = vmul.f32 %v9272_v60, %v3039_v22  ;;  %v2919_v55 = vmul.f32 0.5, %v10467_v24  ;;  %v3527_v24 = vld [vmem:[#allocation8 + $0x20] sm:$0xff] }
 0x2a9   : > { %v3100_v56 = vsub.f32 0.0, %v3084_v59  ;;  %v3038_v44 = vmul.f32 %v10521_v23, %v3030_v37  ;;  %v2918_v23 = vmul.f32 0.5, %v10470_v27  ;;  %v8604_v33 = vpack.c.bf16 %v3524_v1, %v3523_v62  ;;  %v3526_v27 = vld [vmem:[#allocation8 + $0x18] sm:$0xff] }
 0x2aa   : > { %8085 = vmatprep.mubr.msk.f32.mxu1 %vm644_vm0, %v10562_v63  ;;  %v3109_v35 = vsel %vm3093_vm7, %v3085_v41, %v3101_v30  ;;  %v3087_v57 = vsub.f32 1.0, %v3079_v32  ;;  %v8608_v4 = vpack.c.bf16 %v3526_v27, %v3525_v3  ;;  %v8612_v6 = vpack.c.bf16 %v3528_v5, %v3527_v24 }
 0x2ab   : > { %8086 = vmatmul.mubr.msk.f32.gmra.mrb[10].mxu1 %vm644_vm0, %v10565_v25  ;;  %v3117_v49 = vadd.f32 1.0, %v3109_v35  ;;  %v3108_v42 = vsel %vm3092_vm8, %v3084_v59, %v3100_v56  ;;  %v3078_v16 = vmul.f32 %v9274_v11, %v3038_v44  ;;  %8605 = vmatprep.subr.bf16.mxu1 %v8604_v33  ;;  %v8616_v11 = vpack.c.bf16 %v3530_v10, %v3529_v9 }
 0x2ac   : > { %v3116_v46 = vadd.f32 1.0, %v3108_v42  ;;  %v3103_v58 = vsub.f32 0.0, %v3087_v57  ;;  %8607 = vmatpush3.bf16.msra.mxu1 %v8604_v33  ;;  %v10597_v34 = vpack.c.bf16 %v3676_v20, %v3675_v14 }
 0x2ad   : > { %v10579_v50 = vmul.f32 %v3117_v49, %v2917_v47  ;;  %v3086_v52 = vsub.f32 1.0, %v3078_v16  ;;  %8609 = vmatprep.subr.bf16.mxu1 %v8608_v4 }
 0x2ae   : > { %v10577_v48 = vmul.f32 %v3116_v46, %v2916_v45  ;;  %v3111_v18 = vsel %vm3095_vm9, %v3087_v57, %v3103_v58 }
 0x2af   : > { %v3102_v54 = vsub.f32 0.0, %v3086_v52  ;;  %v3119_v12 = vadd.f32 1.0, %v3111_v18 }
 0x2b0   : > { %8088 = vmatprep.mubr.msk.f32.mxu1 %vm644_vm0, %v10577_v48  ;;  %8611 = vmatpush3.bf16.msra.mxu1 %v8608_v4 }
 0x2b1   : > { %8089 = vmatmul.mubr.msk.f32.gmra.mrb[12].mxu1 %vm644_vm0, %v10579_v50  ;;  %v3110_v38 = vsel %vm3094_vm10, %v3086_v52, %v3102_v54  ;;  %v10591_v26 = vmul.f32 %v3119_v12, %v2919_v55  ;;  %8613 = vmatprep.subr.bf16.mxu1 %v8612_v6 }
 0x2b2   : > { %v3118_v2 = vadd.f32 1.0, %v3110_v38 }
 0x2b4   : > { %v10589_v60 = vmul.f32 %v3118_v2, %v2918_v23  ;;  %8615 = vmatpush3.bf16.msra.mxu1 %v8612_v6 }
 0x2b5   : > { %8617 = vmatprep.subr.bf16.mxu1 %v8616_v11 }
 0x2b6   : > { %8091 = vmatprep.mubr.msk.f32.mxu1 %vm644_vm0, %v10589_v60 }
 0x2b7   : > { %8092 = vmatmul.mubr.msk.f32.gmra.mrb[14].mxu1 %vm644_vm0, %v10591_v26 }
 0x2b8   : > { %8619 = vmatpush3.bf16.msra.mxu1 %v8616_v11 }
 0x2b9   : > { %8621 = vmatprep.subr.bf16.mxu1 %v10597_v34 }
 0x37a   : > { %v8084_v8 = vpop.f32.mrb[8].mxu1 }
 0x37b   : > { %v3239_v39 = vadd.f32 %v8084_v8, %v7309_v53  ;;  %v3233_v40 = vpop.f32.mrb[9].mxu1 }
 0x37c   : > { %v3234_v13 = vadd.f32 %v7309_v53, %v3233_v40 }
 0x37d   : > { %v10603_v28 = vmul.f32 0.70710677, %v3239_v39  ;;  %v10627_v62 = vmul.f32 0.5, %v3239_v39 }
 0x37e   : > { %v10605_v15 = vmul.f32 0.70710677, %v3234_v13  ;;  %v8087_v17 = vpop.f32.mrb[10].mxu1  ;;  %v10629_v33 = vmul.f32 0.5, %v3234_v13 }
 0x37f   : > { %v3289_v19 = vand.u32 2147483647, %v10603_v28  ;;  %v3249_v0 = vadd.f32 %v8087_v17, %v7309_v53  ;;  %v3243_v43 = vpop.f32.mrb[11].mxu1  ;;  %vm3449_vm11 = vcmp.ge.f32.partialorder %v10603_v28, 0.0 }
 0x380   : > { %v3288_v61 = vand.u32 2147483647, %v10605_v15  ;;  %v3244_v31 = vadd.f32 %v7309_v53, %v3243_v43  ;;  %vm3448_vm12 = vcmp.ge.f32.partialorder %v10605_v15, 0.0 }
 0x381   : > { %v3297_v21 = vmul.f32 0.3275911, %v3289_v19  ;;  %v10609_v41 = vmul.f32 0.70710677, %v3249_v0  ;;  %v3401_v30 = vsub.f32 0.0, %v3289_v19  ;;  %v10631_v3 = vmul.f32 0.5, %v3249_v0 }
 0x382   : > { %v3296_v22 = vmul.f32 0.3275911, %v3288_v61  ;;  %v10611_v59 = vmul.f32 0.70710677, %v3244_v31  ;;  %v3400_v44 = vsub.f32 0.0, %v3288_v61  ;;  %v10643_v17 = vmul.f32 0.5, %v3244_v31 }
 0x383   : > { %v3305_v29 = vadd.f32 1.0, %v3297_v21  ;;  %v3291_v32 = vand.u32 2147483647, %v10609_v41  ;;  %v3409_v42 = vmul.f32 %v3401_v30, %v3289_v19  ;;  %vm3451_vm13 = vcmp.ge.f32.partialorder %v10609_v41, 0.0 }
 0x384   : > { %v3304_v56 = vadd.f32 1.0, %v3296_v22  ;;  %v3290_v37 = vand.u32 2147483647, %v10611_v59  ;;  %v8090_v49 = vpop.f32.mrb[12].mxu1  ;;  %v3408_v38 = vmul.f32 %v3400_v44, %v3288_v61  ;;  %vm3450_vm14 = vcmp.ge.f32.partialorder %v10611_v59, 0.0 }
 0x385   : > { %9275 = vrcp.f32 %v3305_v29  ;;  %v3299_v35 = vmul.f32 0.3275911, %v3291_v32  ;;  %v10615_v46 = vadd.f32 %v8090_v49, %v7309_v53  ;;  %v3253_v58 = vpop.f32.mrb[13].mxu1  ;;  %v3403_v18 = vsub.f32 0.0, %v3291_v32 }
 0x386   : > { %9277 = vrcp.f32 %v3304_v56  ;;  %v3298_v57 = vmul.f32 0.3275911, %v3290_v37  ;;  %v10617_v16 = vadd.f32 %v7309_v53, %v3253_v58  ;;  %v3418_v12 = vmul.f32 1.442695, %v3409_v42 }
 0x387   : > { %v3307_v45 = vadd.f32 1.0, %v3299_v35  ;;  %v10620_v52 = vmul.f32 0.70710677, %v10615_v46  ;;  %v3402_v2 = vsub.f32 0.0, %v3290_v37  ;;  %v3411_v27 = vmul.f32 %v3403_v18, %v3291_v32 }
 0x388   : > { %v3306_v47 = vadd.f32 1.0, %v3298_v57  ;;  %v10623_v54 = vmul.f32 0.70710677, %v10617_v16  ;;  %v3416_v6 = vmul.f32 1.442695, %v3408_v38 }
 0x389   : > { %9279 = vrcp.f32 %v3307_v45  ;;  %v3293_v23 = vand.u32 2147483647, %v10620_v52  ;;  %v3410_v8 = vmul.f32 %v3402_v2, %v3290_v37  ;;  %v3422_v43 = vmul.f32 1.442695, %v3411_v27 }
 0x38a   : > { %9281 = vrcp.f32 %v3306_v47  ;;  %v3292_v55 = vand.u32 2147483647, %v10623_v54  ;;  %v8093_v24 = vpop.f32.mrb[14].mxu1  ;;  %vm3453_vm15 = vcmp.ge.f32.partialorder %v10620_v52, 0.0  ;;  %vm3452_vm1 = vcmp.ge.f32.partialorder %v10623_v54, 0.0 }
 0x38b   : > { %v3301_v1 = vmul.f32 0.3275911, %v3293_v23  ;;  %9283 = vpow2.f32 %v3418_v12  ;;  %v10635_v10 = vadd.f32 %v8093_v24, %v7309_v53  ;;  %v3263_v11 = vpop.f32.mrb[15].mxu1  ;;  %v3405_v19 = vsub.f32 0.0, %v3293_v23 }
 0x38c   : > { %v3300_v4 = vmul.f32 0.3275911, %v3292_v55  ;;  %v10640_v40 = vadd.f32 %v7309_v53, %v3263_v11  ;;  %v3404_v29 = vsub.f32 0.0, %v3292_v55  ;;  %v3420_v56 = vmul.f32 1.442695, %v3410_v8 }
 0x38d   : > { %v3309_v9 = vadd.f32 1.0, %v3301_v1  ;;  %v10646_v61 = vmul.f32 0.70710677, %v10635_v10  ;;  %v3413_v49 = vmul.f32 %v3405_v19, %v3293_v23 }
 0x38e   : > { %v3308_v39 = vadd.f32 1.0, %v3300_v4  ;;  %v10651_v53 = vmul.f32 0.70710677, %v10640_v40  ;;  %v3412_v12 = vmul.f32 %v3404_v29, %v3292_v55 }
 0x38f   : > { %v10633_v5 = vpop.eup %9275  ;;  %9285 = vrcp.f32 %v3309_v9  ;;  %v3295_v37 = vand.u32 2147483647, %v10646_v61  ;;  %v3426_v9 = vmul.f32 1.442695, %v3413_v49  ;;  %vm3455_vm2 = vcmp.ge.f32.partialorder %v10646_v61, 0.0 }
 0x390   : > { %v10637_v14 = vpop.eup %9277  ;;  %v3329_v20 = vmul.f32 1.0614054, %v10633_v5  ;;  %9287 = vrcp.f32 %v3308_v39  ;;  %v3294_v42 = vand.u32 2147483647, %v10651_v53  ;;  %v3424_v19 = vmul.f32 1.442695, %v3412_v12 }
 0x391   : > { %v3328_v13 = vmul.f32 1.0614054, %v10637_v14  ;;  %9289 = vpow2.f32 %v3416_v6  ;;  %v3303_v58 = vmul.f32 0.3275911, %v3295_v37  ;;  %v3407_v38 = vsub.f32 0.0, %v3295_v37 }
 0x392   : > { %v3337_v0 = vadd.f32 -1.4531521, %v3329_v20  ;;  %9291 = vpow2.f32 %v3422_v43  ;;  %v3302_v4 = vmul.f32 0.3275911, %v3294_v42  ;;  %v3406_v49 = vsub.f32 0.0, %v3294_v42 }
 0x393   : > { %v10648_v21 = vpop.eup %9279  ;;  %v3336_v22 = vadd.f32 -1.4531521, %v3328_v13  ;;  %v3311_v27 = vadd.f32 1.0, %v3303_v58  ;;  %9293 = vpow2.f32 %v3420_v56  ;;  %vm3454_vm3 = vcmp.ge.f32.partialorder %v10651_v53, 0.0 }
 0x394   : > { %v10653_v30 = vpop.eup %9281  ;;  %v3345_v31 = vmul.f32 %v10633_v5, %v3337_v0  ;;  %v3331_v32 = vmul.f32 1.0614054, %v10648_v21  ;;  %v3310_v8 = vadd.f32 1.0, %v3302_v4  ;;  %v3415_v0 = vmul.f32 %v3407_v38, %v3295_v37 }
 0x395   : > { %v3344_v35 = vmul.f32 %v10637_v14, %v3336_v22  ;;  %v3330_v57 = vmul.f32 1.0614054, %v10653_v30  ;;  %v9284_v24 = vpop.eup %9283  ;;  %9295 = vrcp.f32 %v3311_v27 }
 0x396   : > { %v3353_v44 = vadd.f32 1.4214138, %v3345_v31  ;;  %v3339_v45 = vadd.f32 -1.4531521, %v3331_v32  ;;  %9297 = vrcp.f32 %v3310_v8  ;;  %v3430_v27 = vmul.f32 1.442695, %v3415_v0 }
 0x397   : > { %v3352_v47 = vadd.f32 1.4214138, %v3344_v35  ;;  %v3338_v18 = vadd.f32 -1.4531521, %v3330_v57  ;;  %9299 = vpow2.f32 %v3426_v9 }
 0x398   : > { %v3361_v2 = vmul.f32 %v10633_v5, %v3353_v44  ;;  %v3347_v1 = vmul.f32 %v10648_v21, %v3339_v45  ;;  %9301 = vpow2.f32 %v3424_v19 }
 0x399   : > { %v3360_v6 = vmul.f32 %v10637_v14, %v3352_v47  ;;  %v3346_v23 = vmul.f32 %v10653_v30, %v3338_v18  ;;  %v10665_v39 = vpop.eup %9285  ;;  %9303 = vpow2.f32 %v3430_v27 }
 0x39a   : > { %v3369_v11 = vadd.f32 -0.28449672, %v3361_v2  ;;  %v3355_v20 = vadd.f32 1.4214138, %v3347_v1  ;;  %v10667_v43 = vpop.eup %9287  ;;  %v3333_v31 = vmul.f32 1.0614054, %v10665_v39 }
 0x39b   : > { %v3368_v55 = vadd.f32 -0.28449672, %v3360_v6  ;;  %v3354_v13 = vadd.f32 1.4214138, %v3346_v23  ;;  %v9290_v32 = vpop.eup %9289  ;;  %v3332_v57 = vmul.f32 1.0614054, %v10667_v43 }
 0x39c   : > { %v3377_v22 = vmul.f32 %v10633_v5, %v3369_v11  ;;  %v3363_v29 = vmul.f32 %v10648_v21, %v3355_v20  ;;  %v3341_v37 = vadd.f32 -1.4531521, %v3333_v31  ;;  %v9292_v12 = vpop.eup %9291 }
 0x39d   : > { %v3376_v56 = vmul.f32 %v10637_v14, %v3368_v55  ;;  %v3362_v35 = vmul.f32 %v10653_v30, %v3354_v13  ;;  %v3340_v18 = vadd.f32 -1.4531521, %v3332_v57  ;;  %v3414_v55 = vmul.f32 %v3406_v49, %v3294_v42  ;;  %v9294_v13 = vpop.eup %9293 }
 0x39e   : > { %v3385_v44 = vadd.f32 0.2548296, %v3377_v22  ;;  %v3371_v45 = vadd.f32 -0.28449672, %v3363_v29  ;;  %v3349_v1 = vmul.f32 %v10665_v39, %v3341_v37 }
 0x39f   : > { %v3384_v58 = vadd.f32 0.2548296, %v3376_v56  ;;  %v3370_v47 = vadd.f32 -0.28449672, %v3362_v35  ;;  %v3348_v23 = vmul.f32 %v10667_v43, %v3340_v18  ;;  %v10684_v31 = vpop.eup %9295 }
 0x3a0   : > { %v3393_v38 = vmul.f32 %v10633_v5, %v3385_v44  ;;  %v3379_v2 = vmul.f32 %v10648_v21, %v3371_v45  ;;  %v3357_v8 = vadd.f32 1.4214138, %v3349_v1  ;;  %v3335_v56 = vmul.f32 1.0614054, %v10684_v31  ;;  %v10692_v35 = vpop.eup %9297 }
 0x3a1   : > { %v3392_v4 = vmul.f32 %v10637_v14, %v3384_v58  ;;  %v3378_v6 = vmul.f32 %v10653_v30, %v3370_v47  ;;  %v3356_v29 = vadd.f32 1.4214138, %v3348_v23  ;;  %v3428_v44 = vmul.f32 1.442695, %v3414_v55 }
 0x3a2   : > { %v3433_v11 = vmul.f32 %v9284_v24, %v3393_v38  ;;  %v3387_v20 = vadd.f32 0.2548296, %v3379_v2  ;;  %v3365_v9 = vmul.f32 %v10665_v39, %v3357_v8  ;;  %v3343_v58 = vadd.f32 -1.4531521, %v3335_v56 }
 0x3a3   : > { %v3432_v5 = vmul.f32 %v9290_v32, %v3392_v4  ;;  %v3386_v22 = vadd.f32 0.2548296, %v3378_v6  ;;  %v3364_v32 = vmul.f32 %v10667_v43, %v3356_v29  ;;  %v3334_v38 = vmul.f32 1.0614054, %v10692_v35 }
 0x3a4   : > { %v3441_v0 = vsub.f32 1.0, %v3433_v11  ;;  %v3395_v14 = vmul.f32 %v10648_v21, %v3387_v20  ;;  %v3373_v49 = vadd.f32 -0.28449672, %v3365_v9  ;;  %v3351_v11 = vmul.f32 %v10684_v31, %v3343_v58  ;;  %v9300_v20 = vpop.eup %9299 }
 0x3a5   : > { %v3440_v24 = vsub.f32 1.0, %v3432_v5  ;;  %v3394_v42 = vmul.f32 %v10653_v30, %v3386_v22  ;;  %v3372_v37 = vadd.f32 -0.28449672, %v3364_v32  ;;  %9305 = vpow2.f32 %v3428_v44 }
 0x3a6   : > { %v3457_v19 = vsub.f32 0.0, %v3441_v0  ;;  %v3435_v57 = vmul.f32 %v9292_v12, %v3395_v14  ;;  %v3381_v30 = vmul.f32 %v10665_v39, %v3373_v49  ;;  %v3359_v29 = vadd.f32 1.4214138, %v3351_v11 }
 0x3a7   : > { %v3456_v45 = vsub.f32 0.0, %v3440_v24  ;;  %v3434_v21 = vmul.f32 %v9294_v13, %v3394_v42  ;;  %v3380_v12 = vmul.f32 %v10667_v43, %v3372_v37  ;;  %v3342_v13 = vadd.f32 -1.4531521, %v3334_v38 }
 0x3a8   : > { %v3465_v47 = vsel %vm3449_vm11, %v3441_v0, %v3457_v19  ;;  %v3443_v18 = vsub.f32 1.0, %v3435_v57  ;;  %v3389_v23 = vadd.f32 0.2548296, %v3381_v30  ;;  %v9302_v0 = vpop.eup %9301  ;;  %v3367_v41 = vmul.f32 %v10684_v31, %v3359_v29  ;;  %v3678_v30 = vld [vmem:[#allocation8 + $0x58] sm:$0xff] }
 0x3a9   : > { %v3473_v2 = vadd.f32 1.0, %v3465_v47  ;;  %v3464_v1 = vsel %vm3448_vm12, %v3440_v24, %v3456_v45  ;;  %v3442_v27 = vsub.f32 1.0, %v3434_v21  ;;  %v3388_v55 = vadd.f32 0.2548296, %v3380_v12  ;;  %v9304_v42 = vpop.eup %9303 }
 0x3aa   : > { %v3472_v4 = vadd.f32 1.0, %v3464_v1  ;;  %v3459_v6 = vsub.f32 0.0, %v3443_v18  ;;  %v3397_v22 = vmul.f32 %v10665_v39, %v3389_v23  ;;  %v3276_v1 = vmul.f32 0.5, %v10617_v16 }
 0x3ab   : > { %v3481_v28 = vmul.f32 %v3473_v2, %v10627_v62  ;;  %v3458_v8 = vsub.f32 0.0, %v3442_v27  ;;  %v3396_v62 = vmul.f32 %v10667_v43, %v3388_v55  ;;  %v3375_v43 = vadd.f32 -0.28449672, %v3367_v41 }
 0x3ac   : > { %v3480_v5 = vmul.f32 %v3472_v4, %v10629_v33  ;;  %v3467_v15 = vsel %vm3451_vm13, %v3443_v18, %v3459_v6  ;;  %v3437_v33 = vmul.f32 %v9300_v20, %v3397_v22  ;;  %v3677_v18 = vld [vmem:[#allocation8 + $0x50] sm:$0xff] }
 0x3ad   : > { %v3489_v14 = vadd.f32 %v3481_v28, %v10543_v51  ;;  %v3475_v9 = vadd.f32 1.0, %v3467_v15  ;;  %v3466_v24 = vsel %vm3450_vm14, %v3442_v27, %v3458_v8  ;;  %v3436_v19 = vmul.f32 %v9302_v0, %v3396_v62  ;;  %v3680_v8 = vld [vmem:[#allocation8 + $0x68] sm:$0xff]  ;;  %v3681_v0 = vld [vmem:[#allocation8 + $0x70] sm:$0xff] }
 0x3ae   : > { %v3488_v32 = vadd.f32 %v3480_v5, %v10546_v7  ;;  %v3474_v56 = vadd.f32 1.0, %v3466_v24  ;;  %v3350_v51 = vmul.f32 %v10692_v35, %v3342_v13  ;;  %v3445_v57 = vsub.f32 1.0, %v3437_v33 }
 0x3af   : > { %3508 = vst.msk [vmem:[#allocation2 + $0x10] sm:$0xff] %vm644_vm0, %v3489_v14  ;;  %v3483_v39 = vmul.f32 %v3475_v9, %v10631_v3  ;;  %v3444_v7 = vsub.f32 1.0, %v3436_v19  ;;  %v3383_v58 = vmul.f32 %v10684_v31, %v3375_v43  ;;  %v8624_v11 = vpack.c.bf16 %v3678_v30, %v3677_v18  ;;  %v3682_v14 = vld [vmem:[#allocation8 + $0x78] sm:$0xff] }
 0x3b0   : > { %3507 = vst.msk [vmem:[#allocation2 + $0x8] sm:$0xff] %vm644_vm0, %v3488_v32  ;;  %v3482_v59 = vmul.f32 %v3474_v56, %v10643_v17  ;;  %v3358_v45 = vadd.f32 1.4214138, %v3350_v51  ;;  %v3461_v37 = vsub.f32 0.0, %v3445_v57  ;;  %v3278_v30 = vmul.f32 0.5, %v10640_v40 }
 0x3b1   : > { %v3491_v49 = vadd.f32 %v3483_v39, %v10565_v25  ;;  %v3460_v3 = vsub.f32 0.0, %v3444_v7  ;;  %v3391_v25 = vadd.f32 0.2548296, %v3383_v58 }
 0x3b2   : > { %v3490_v21 = vadd.f32 %v3482_v59, %v10562_v63  ;;  %v3366_v47 = vmul.f32 %v10692_v35, %v3358_v45  ;;  %v3469_v17 = vsel %vm3453_vm15, %v3445_v57, %v3461_v37  ;;  %v3277_v63 = vmul.f32 0.5, %v10615_v46  ;;  %v3679_v46 = vld [vmem:[#allocation8 + $0x60] sm:$0xff]  ;;  %v3830_v45 = vld [vmem:[#allocation8 + $0x88] sm:$0xff] }
 0x3b3   : > { %3510 = vst.msk [vmem:[#allocation2 + $0x20] sm:$0xff] %vm644_vm0, %v3491_v49  ;;  %v3477_v38 = vadd.f32 1.0, %v3469_v17  ;;  %v3468_v2 = vsel %vm3452_vm1, %v3444_v7, %v3460_v3  ;;  %v3399_v52 = vmul.f32 %v10684_v31, %v3391_v25  ;;  %v8628_v62 = vpack.c.bf16 %v3680_v8, %v3679_v46  ;;  %v3829_v7 = vld [vmem:[#allocation8 + $0x80] sm:$0xff] }
 0x3b4   : > { %3509 = vst.msk [vmem:[#allocation2 + $0x18] sm:$0xff] %vm644_vm0, %v3490_v21  ;;  %v3374_v44 = vadd.f32 -0.28449672, %v3366_v47  ;;  %v3476_v27 = vadd.f32 1.0, %v3468_v2  ;;  %v3279_v57 = vmul.f32 0.5, %v10635_v10  ;;  %v8632_v49 = vpack.c.bf16 %v3682_v14, %v3681_v0  ;;  %v3834_v14 = vld [vmem:[#allocation8 + $0xa8] sm:$0xff] }
 0x3b5   : > { %v3485_v12 = vmul.f32 %v3477_v38, %v3277_v63  ;;  %v3439_v28 = vmul.f32 %v9304_v42, %v3399_v52  ;;  %v8636_v25 = vpack.c.bf16 %v3830_v45, %v3829_v7  ;;  %v4137_v7 = vld [vmem:[#allocation8 + $0x100] sm:$0xff]  ;;  %v4138_v45 = vld [vmem:[#allocation8 + $0x108] sm:$0xff] }
 0x3b6   : > { %v3382_v4 = vmul.f32 %v10692_v35, %v3374_v44  ;;  %v3484_v20 = vmul.f32 %v3476_v27, %v3276_v1  ;;  %v10753_v32 = vld [vmem:[#allocation2 + $0x10] sm:$0xff] }
 0x3b7   : > { %v3515_v6 = vld [vmem:[#allocation2 + $0x6] sm:$0xff]  ;;  %v3516_v23 = vld [vmem:[#allocation2 + $0xe] sm:$0xff]  ;;  %v3493_v31 = vadd.f32 %v3485_v12, %v10579_v50  ;;  %v3447_v29 = vsub.f32 1.0, %v3439_v28 }
 0x3b8   : > { %v10730_v54 = vld [vmem:[#allocation2 + $0x7] sm:$0xff]  ;;  %8110 = vmatprep.mubr.msk.f32.mxu1 %vm644_vm0, %v3515_v6  ;;  %v10735_v16 = vld [vmem:[#allocation2 + $0xf] sm:$0xff]  ;;  %v3390_v55 = vadd.f32 0.2548296, %v3382_v4  ;;  %v3492_v22 = vadd.f32 %v3484_v20, %v10577_v48  ;;  %v9306_v48 = vpop.eup %9305  ;;  %v3831_v4 = vld [vmem:[#allocation8 + $0x90] sm:$0xff] }
 0x3b9   : > { %5104 = vst.msk [vmem:[#allocation2] sm:$0xff] %vm644_vm0, %v11644_v36  ;;  %8111 = vmatmul.mubr.msk.f32.vlgmr.msra.gmra.mrb[16].mxu1 %vm644_vm0, %v3516_v23  ;;  %v10739_v13 = vld [vmem:[#allocation2 + $0x8] sm:$0xff]  ;;  %3512 = vst.msk [vmem:[#allocation2 + $0x30] sm:$0xff] %vm644_vm0, %v3493_v31 }
 0x3ba   : > { %v10741_v5 = vld [vmem:[#allocation2 + $0x9] sm:$0xff]  ;;  %8623 = vmatpush3.bf16.msra.mxu1 %v10597_v34  ;;  %v3398_v50 = vmul.f32 %v10692_v35, %v3390_v55  ;;  %3511 = vst.msk [vmem:[#allocation2 + $0x28] sm:$0xff] %vm644_vm0, %v3492_v22  ;;  %v3463_v34 = vsub.f32 0.0, %v3447_v29  ;;  %v10778_v10 = vld [vmem:[#allocation2 + $0x20] sm:$0xff] }
 0x3bb   : > { %v10743_v15 = vld [vmem:[#allocation2 + $0xa] sm:$0xff]  ;;  %v3517_v9 = vld [vmem:[#allocation2 + $0x16] sm:$0xff]  ;;  %v3518_v24 = vld [vmem:[#allocation2 + $0x1e] sm:$0xff]  ;;  %8625 = vmatprep.subr.bf16.mxu1 %v8624_v11 }
 0x3bc   : > { %5105 = vst.msk [vmem:[#allocation2 + $0x8] sm:$0xff] %vm644_vm0, %v11644_v36  ;;  %v10751_v42 = vld [vmem:[#allocation2 + $0x17] sm:$0xff]  ;;  %8113 = vmatprep.mubr.msk.f32.mxu1 %vm644_vm0, %v3517_v9  ;;  %v10757_v56 = vld [vmem:[#allocation2 + $0x1f] sm:$0xff]  ;;  %v3438_v35 = vmul.f32 %v9306_v48, %v3398_v50  ;;  %v3471_v59 = vsel %vm3455_vm2, %v3447_v29, %v3463_v34  ;;  %v3983_v48 = vld [vmem:[#allocation8 + $0xc0] sm:$0xff] }
 0x3bd   : > { %v10759_v33 = vld [vmem:[#allocation2 + $0x18] sm:$0xff]  ;;  %8114 = vmatmul.mubr.msk.f32.gmra.mrb[18].mxu1 %vm644_vm0, %v3518_v24  ;;  %v3479_v61 = vadd.f32 1.0, %v3471_v59  ;;  %v3832_v6 = vld [vmem:[#allocation8 + $0x98] sm:$0xff]  ;;  %v3987_v59 = vld [vmem:[#allocation8 + $0xe0] sm:$0xff] }
 0x3be   : > { %v10761_v41 = vld [vmem:[#allocation2 + $0x11] sm:$0xff]  ;;  %v10765_v39 = vld [vmem:[#allocation2 + $0x19] sm:$0xff]  ;;  %8627 = vmatpush3.bf16.msra.mxu1 %v8624_v11  ;;  %v3446_v43 = vsub.f32 1.0, %v3438_v35  ;;  %v8640_v0 = vpack.c.bf16 %v3832_v6, %v3831_v4  ;;  %v3836_v24 = vld [vmem:[#allocation8 + $0xb8] sm:$0xff] }
 0x3bf   : > { %v10767_v19 = vld [vmem:[#allocation2 + $0x12] sm:$0xff]  ;;  %v10769_v51 = vld [vmem:[#allocation2 + $0x1a] sm:$0xff]  ;;  %8629 = vmatprep.subr.bf16.mxu1 %v8628_v62  ;;  %v3487_v21 = vmul.f32 %v3479_v61, %v3279_v57  ;;  %v3986_v35 = vld [vmem:[#allocation8 + $0xd8] sm:$0xff] }
 0x3c0   : > { %5106 = vst.msk [vmem:[#allocation2 + $0x10] sm:$0xff] %vm644_vm0, %v11644_v36  ;;  %5107 = vst.msk [vmem:[#allocation2 + $0x18] sm:$0xff] %vm644_vm0, %v11644_v36  ;;  %v3462_v37 = vsub.f32 0.0, %v3446_v43  ;;  %v3825_v28 = vld [vmem:[#allocation2 + $0x30] sm:$0xff]  ;;  %v3835_v9 = vld [vmem:[#allocation8 + $0xb0] sm:$0xff] }
 0x3c1   : > { %v3495_v58 = vadd.f32 %v3487_v21, %v10591_v26  ;;  %v3519_v47 = vld [vmem:[#allocation2 + $0x26] sm:$0xff]  ;;  %v3520_v17 = vld [vmem:[#allocation2 + $0x2e] sm:$0xff] }
 0x3c2   : > { %8631 = vmatpush3.bf16.msra.mxu1 %v8628_v62  ;;  %v3470_v3 = vsel %vm3454_vm3, %v3446_v43, %v3462_v37  ;;  %v3670_v18 = vld [vmem:[#allocation2 + $0x27] sm:$0xff]  ;;  %8116 = vmatprep.mubr.msk.f32.mxu1 %vm644_vm0, %v3519_v47  ;;  %v3671_v38 = vld [vmem:[#allocation2 + $0x2f] sm:$0xff]  ;;  %v8648_v62 = vpack.c.bf16 %v3836_v24, %v3835_v9  ;;  %v3989_v43 = vld [vmem:[#allocation8 + $0xf0] sm:$0xff] }
 0x3c3   : > { %8633 = vmatprep.subr.bf16.mxu1 %v8632_v49  ;;  %v3478_v63 = vadd.f32 1.0, %v3470_v3  ;;  %v10782_v2 = vld [vmem:[#allocation2 + $0x28] sm:$0xff]  ;;  %3514 = vst.msk [vmem:[#allocation2 + $0x40] sm:$0xff] %vm644_vm0, %v3495_v58  ;;  %8117 = vmatmul.mubr.msk.f32.gmra.mrb[20].mxu1 %vm644_vm0, %v3520_v17  ;;  %v3984_v34 = vld [vmem:[#allocation8 + $0xc8] sm:$0xff]  ;;  %v4143_v17 = vld [vmem:[#allocation8 + $0x130] sm:$0xff] }
 0x3c4   : > { %v10784_v53 = vld [vmem:[#allocation2 + $0x21] sm:$0xff]  ;;  %v10788_v26 = vld [vmem:[#allocation2 + $0x29] sm:$0xff]  ;;  %v3988_v57 = vld [vmem:[#allocation8 + $0xe8] sm:$0xff] }
 0x3c5   : > { %v10790_v44 = vld [vmem:[#allocation2 + $0x22] sm:$0xff]  ;;  %v10792_v1 = vld [vmem:[#allocation2 + $0x2a] sm:$0xff]  ;;  %v3486_v27 = vmul.f32 %v3478_v63, %v3278_v30  ;;  %v8660_v61 = vpack.c.bf16 %v3988_v57, %v3987_v59  ;;  %v4142_v3 = vld [vmem:[#allocation8 + $0x128] sm:$0xff] }
 0x3c6   : > { %8635 = vmatpush3.bf16.msra.mxu1 %v8632_v49  ;;  %5108 = vst.msk [vmem:[#allocation2 + $0x20] sm:$0xff] %vm644_vm0, %v11644_v36  ;;  %5109 = vst.msk [vmem:[#allocation2 + $0x28] sm:$0xff] %vm644_vm0, %v11644_v36  ;;  %v3990_v49 = vld [vmem:[#allocation8 + $0xf8] sm:$0xff]  ;;  %v4141_v58 = vld [vmem:[#allocation8 + $0x120] sm:$0xff] }
 0x3c7   : > { %8637 = vmatprep.subr.bf16.mxu1 %v8636_v25  ;;  %v3494_v40 = vadd.f32 %v3486_v27, %v10589_v60  ;;  %v4140_v21 = vld [vmem:[#allocation8 + $0x118] sm:$0xff]  ;;  %v8676_v47 = vpack.c.bf16 %v4142_v3, %v4141_v58  ;;  %v4504_v30 = vld [vmem:[#allocation9 + $0x28] sm:$0xff] }
 0x3c9   : > { %3513 = vst.msk [vmem:[#allocation2 + $0x38] sm:$0xff] %vm644_vm0, %v3494_v40 }
 0x3ca   : > { %v10800_v52 = vld [vmem:[#allocation2 + $0x41] sm:$0xff] }
 0x3cb   : > { %v10802_v12 = vld [vmem:[#allocation2 + $0x42] sm:$0xff] }
 0x3cc   : > { %5113 = vst.msk [vmem:[#allocation2 + $0x48] sm:$0xff] %vm644_vm0, %v11644_v36  ;;  %v10808_v46 = vld [vmem:[#allocation2 + $0x40] sm:$0xff] }
 0x3cd   : > { %6192 = vst.msk [vmem:[#allocation2 + $0x48] sm:$0xff] %vm644_vm0, %v11644_v36 }
 0x3d0   : > { %v3521_v23 = vld [vmem:[#allocation2 + $0x36] sm:$0xff]  ;;  %v3522_v11 = vld [vmem:[#allocation2 + $0x3e] sm:$0xff] }
 0x3d1   : > { %v3672_v20 = vld [vmem:[#allocation2 + $0x37] sm:$0xff]  ;;  %8119 = vmatprep.mubr.msk.f32.mxu1 %vm644_vm0, %v3521_v23  ;;  %v3673_v60 = vld [vmem:[#allocation2 + $0x3f] sm:$0xff] }
 0x3d2   : > { %v3826_v8 = vld [vmem:[#allocation2 + $0x38] sm:$0xff]  ;;  %8120 = vmatmul.mubr.msk.f32.gmra.mrb[22].mxu1 %vm644_vm0, %v3522_v11 }
 0x3d3   : > { %v10811_v31 = vld [vmem:[#allocation2 + $0x31] sm:$0xff]  ;;  %v10814_v55 = vld [vmem:[#allocation2 + $0x39] sm:$0xff]  ;;  %8138 = vmatprep.mubr.msk.f32.mxu1 %vm644_vm0, %v10730_v54 }
 0x3d4   : > { %v10816_v22 = vld [vmem:[#allocation2 + $0x32] sm:$0xff]  ;;  %v10818_v29 = vld [vmem:[#allocation2 + $0x3a] sm:$0xff] }
 0x3d5   : > { %5110 = vst.msk [vmem:[#allocation2 + $0x30] sm:$0xff] %vm644_vm0, %v11644_v36  ;;  %5111 = vst.msk [vmem:[#allocation2 + $0x38] sm:$0xff] %vm644_vm0, %v11644_v36  ;;  %v3833_v54 = vld [vmem:[#allocation8 + $0xa0] sm:$0xff] }
 0x3d6   : > { %5112 = vst.msk [vmem:[#allocation2 + $0x40] sm:$0xff] %vm644_vm0, %v11644_v36  ;;  %6189 = vst.msk [vmem:[#allocation2 + $0x30] sm:$0xff] %vm644_vm0, %v11644_v36  ;;  %8139 = vmatmul.mubr.msk.f32.vlgmr.msra.gmra.mrb[16].mxu1 %vm644_vm0, %v10735_v16  ;;  %v8644_v50 = vpack.c.bf16 %v3834_v14, %v3833_v54  ;;  %v8652_v16 = vpack.c.bf16 %v3984_v34, %v3983_v48 }
 0x3d7   : > { %6190 = vst.msk [vmem:[#allocation2 + $0x38] sm:$0xff] %vm644_vm0, %v11644_v36  ;;  %6191 = vst.msk [vmem:[#allocation2 + $0x40] sm:$0xff] %vm644_vm0, %v11644_v36  ;;  %8141 = vmatprep.mubr.msk.f32.mxu1 %vm644_vm0, %v10751_v42  ;;  %8639 = vmatpush3.bf16.msra.mxu1 %v8636_v25  ;;  %v3985_v42 = vld [vmem:[#allocation8 + $0xd0] sm:$0xff]  ;;  %v4144_v25 = vld [vmem:[#allocation8 + $0x138] sm:$0xff] }
 0x3d8   : > { %8641 = vmatprep.subr.bf16.mxu1 %v8640_v0 }
 0x3da   : > { %8142 = vmatmul.mubr.msk.f32.gmra.mrb[18].mxu1 %vm644_vm0, %v10757_v56  ;;  %v8656_v56 = vpack.c.bf16 %v3986_v35, %v3985_v42 }
 0x3db   : > { %8144 = vmatprep.mubr.msk.f32.mxu1 %vm644_vm0, %v3670_v18  ;;  %8643 = vmatpush3.bf16.msra.mxu1 %v8640_v0 }
 0x3dc   : > { %8645 = vmatprep.subr.bf16.mxu1 %v8644_v50 }
 0x3de   : > { %8145 = vmatmul.mubr.msk.f32.gmra.mrb[20].mxu1 %vm644_vm0, %v3671_v38  ;;  %v4505_v38 = vld [vmem:[#allocation9 + $0x30] sm:$0xff] }
 0x3df   : > { %8147 = vmatprep.mubr.msk.f32.mxu1 %vm644_vm0, %v3672_v20  ;;  %8647 = vmatpush3.bf16.msra.mxu1 %v8644_v50 }
 0x3e0   : > { %8649 = vmatprep.subr.bf16.mxu1 %v8648_v62 }
 0x3e2   : > { %8148 = vmatmul.mubr.msk.f32.gmra.mrb[22].mxu1 %vm644_vm0, %v3673_v60 }
 0x3e3   : > { %8651 = vmatpush3.bf16.msra.mxu1 %v8648_v62  ;;  %8166 = vmatprep.mubr.msk.f32.mxu1 %vm644_vm0, %v10739_v13  ;;  %v8664_v13 = vpack.c.bf16 %v3990_v49, %v3989_v43 }
 0x3e4   : > { %8653 = vmatprep.subr.bf16.mxu1 %v8652_v16 }
 0x3e6   : > { %8167 = vmatmul.mubr.msk.f32.vlgmr.msra.gmra.mrb[16].mxu1 %vm644_vm0, %v10753_v32  ;;  %v8668_v32 = vpack.c.bf16 %v4138_v45, %v4137_v7 }
 0x3e7   : > { %8169 = vmatprep.mubr.msk.f32.mxu1 %vm644_vm0, %v10759_v33  ;;  %8655 = vmatpush3.bf16.msra.mxu1 %v8652_v16  ;;  %v4139_v33 = vld [vmem:[#allocation8 + $0x110] sm:$0xff] }
 0x3e8   : > { %8657 = vmatprep.subr.bf16.mxu1 %v8656_v56  ;;  %v8672_v37 = vpack.c.bf16 %v4140_v21, %v4139_v33 }
 0x3ea   : > { %8170 = vmatmul.mubr.msk.f32.gmra.mrb[18].mxu1 %vm644_vm0, %v10778_v10  ;;  %v4503_v10 = vld [vmem:[#allocation9 + $0x20] sm:$0xff] }
 0x3eb   : > { %8172 = vmatprep.mubr.msk.f32.mxu1 %vm644_vm0, %v10782_v2  ;;  %8659 = vmatpush3.bf16.msra.mxu1 %v8656_v56  ;;  %v8692_v63 = vpack.c.bf16 %v4504_v30, %v4503_v10  ;;  %v4506_v2 = vld [vmem:[#allocation9 + $0x38] sm:$0xff] }
 0x3ec   : > { %8661 = vmatprep.subr.bf16.mxu1 %v8660_v61 }
 0x3ee   : > { %8173 = vmatmul.mubr.msk.f32.gmra.mrb[20].mxu1 %vm644_vm0, %v3825_v28 }
 0x3ef   : > { %8175 = vmatprep.mubr.msk.f32.mxu1 %vm644_vm0, %v3826_v8  ;;  %8663 = vmatpush3.bf16.msra.mxu1 %v8660_v61 }
 0x3f0   : > { %8665 = vmatprep.subr.bf16.mxu1 %v8664_v13 }
 0x3f2   : > { %8176 = vmatmul.mubr.msk.f32.gmra.mrb[22].mxu1 %vm644_vm0, %v10808_v46 }
 0x3f3   : > { %8667 = vmatpush3.bf16.msra.mxu1 %v8664_v13  ;;  %8194 = vmatprep.mubr.msk.f32.mxu1 %vm644_vm0, %v10741_v5  ;;  %v8680_v5 = vpack.c.bf16 %v4144_v25, %v4143_v17 }
 0x3f4   : > { %8669 = vmatprep.subr.bf16.mxu1 %v8668_v32 }
 0x3f6   : > { %8195 = vmatmul.mubr.msk.f32.vlgmr.msra.gmra.mrb[16].mxu1 %vm644_vm0, %v10761_v41  ;;  %v4500_v41 = vld [vmem:[#allocation9 + $0x8] sm:$0xff] }
 0x3f7   : > { %8197 = vmatprep.mubr.msk.f32.mxu1 %vm644_vm0, %v10765_v39  ;;  %8671 = vmatpush3.bf16.msra.mxu1 %v8668_v32 }
 0x3f8   : > { %8673 = vmatprep.subr.bf16.mxu1 %v8672_v37 }
 0x3fa   : > { %8198 = vmatmul.mubr.msk.f32.gmra.mrb[18].mxu1 %vm644_vm0, %v10784_v53  ;;  %v8696_v53 = vpack.c.bf16 %v4506_v2, %v4505_v38 }
 0x3fb   : > { %8200 = vmatprep.mubr.msk.f32.mxu1 %vm644_vm0, %v10788_v26  ;;  %8675 = vmatpush3.bf16.msra.mxu1 %v8672_v37  ;;  %v7318_v26 = vld [vmem:[%s11566_s6] ss:$0 sm:$0xff] }
 0x3fc   : > { %8677 = vmatprep.subr.bf16.mxu1 %v8676_v47 }
 0x3fe   : > { %8201 = vmatmul.mubr.msk.f32.gmra.mrb[20].mxu1 %vm644_vm0, %v10811_v31 }
 0x3ff   : > { %8203 = vmatprep.mubr.msk.f32.mxu1 %vm644_vm0, %v10814_v55  ;;  %8679 = vmatpush3.bf16.msra.mxu1 %v8676_v47 }
 0x400   : > { %8681 = vmatprep.subr.bf16.mxu1 %v8680_v5 }
 0x402   : > { %8204 = vmatmul.mubr.msk.f32.gmra.mrb[22].mxu1 %vm644_vm0, %v10800_v52 }
 0x403   : > { %8683 = vmatpush3.bf16.msra.mxu1 %v8680_v5  ;;  %8222 = vmatprep.mubr.msk.f32.mxu1 %vm644_vm0, %v10743_v15  ;;  %v4499_v15 = vld [vmem:[#allocation9] sm:$0xff] }
 0x404   : > { %v8684_v39 = vpack.c.bf16 %v4500_v41, %v4499_v15 }
 0x406   : > { %8223 = vmatmul.mubr.msk.f32.vlgmr.msra.gmra.mrb[16].mxu1 %vm644_vm0, %v10767_v19  ;;  %8685 = vmatprep.subr.bf16.mxu1 %v8684_v39  ;;  %v4501_v19 = vld [vmem:[#allocation9 + $0x10] sm:$0xff] }
 0x407   : > { %8225 = vmatprep.mubr.msk.f32.mxu1 %vm644_vm0, %v10769_v51  ;;  %8687 = vmatpush3.bf16.msra.mxu1 %v8684_v39  ;;  %v4502_v51 = vld [vmem:[#allocation9 + $0x18] sm:$0xff] }
 0x408   : > { %v8688_v18 = vpack.c.bf16 %v4502_v51, %v4501_v19 }
 0x40a   : > { %8226 = vmatmul.mubr.msk.f32.gmra.mrb[18].mxu1 %vm644_vm0, %v10790_v44  ;;  %8689 = vmatprep.subr.bf16.mxu1 %v8688_v18 }
 0x40b   : > { %8228 = vmatprep.mubr.msk.f32.mxu1 %vm644_vm0, %v10792_v1  ;;  %8691 = vmatpush3.bf16.msra.mxu1 %v8688_v18 }
 0x40c   : > { %8693 = vmatprep.subr.bf16.mxu1 %v8692_v63 }
 0x40e   : > { %8229 = vmatmul.mubr.msk.f32.gmra.mrb[20].mxu1 %vm644_vm0, %v10816_v22 }
 0x40f   : > { %8231 = vmatprep.mubr.msk.f32.mxu1 %vm644_vm0, %v10818_v29  ;;  %8695 = vmatpush3.bf16.msra.mxu1 %v8692_v63 }
 0x410   : > { %8697 = vmatprep.subr.bf16.mxu1 %v8696_v53 }
 0x412   : > { %8232 = vmatmul.mubr.msk.f32.gmra.mrb[22].mxu1 %vm644_vm0, %v10802_v12 }
 0x413   : > { %8699 = vmatpush3.bf16.msra.mxu1 %v8696_v53 }
 0x4d9   : > { %v8224_v44 = vpop.f32.mrb[16].mxu1 }
 0x4da   : > { %v8962_v1 = vadd.f32 %v8224_v44, %v7318_v26  ;;  %v4235_v27 = vpop.f32.mrb[17].mxu1 }
 0x4db   : > { %v10893_v40 = vadd.f32 %v7318_v26, %v4235_v27 }
 0x4dc   : > { %v10895_v52 = vmul.f32 0.70710677, %v8962_v1  ;;  %v10930_v21 = vmul.f32 0.5, %v8962_v1 }
 0x4dd   : > { %v10898_v12 = vmul.f32 0.70710677, %v10893_v40  ;;  %v8227_v4 = vpop.f32.mrb[18].mxu1 }
 0x4de   : > { %v4299_v6 = vand.u32 2147483647, %v10895_v52  ;;  %v10901_v23 = vadd.f32 %v8227_v4, %v7318_v26  ;;  %v4245_v11 = vpop.f32.mrb[19].mxu1  ;;  %vm4459_vm4 = vcmp.ge.f32.partialorder %v10895_v52, 0.0 }
 0x4df   : > { %v4298_v20 = vand.u32 2147483647, %v10898_v12  ;;  %v10904_v28 = vadd.f32 %v7318_v26, %v4245_v11  ;;  %vm4458_vm5 = vcmp.ge.f32.partialorder %v10898_v12, 0.0 }
 0x4e0   : > { %v4307_v46 = vmul.f32 0.3275911, %v4299_v6  ;;  %v10907_v60 = vmul.f32 0.70710677, %v10901_v23  ;;  %v4411_v9 = vsub.f32 0.0, %v4299_v6 }
 0x4e1   : > { %v4306_v8 = vmul.f32 0.3275911, %v4298_v20  ;;  %v10910_v31 = vmul.f32 0.70710677, %v10904_v28  ;;  %v8230_v29 = vpop.f32.mrb[20].mxu1  ;;  %v4410_v48 = vsub.f32 0.0, %v4298_v20 }
 0x4e2   : > { %v4315_v55 = vadd.f32 1.0, %v4307_v46  ;;  %v4301_v22 = vand.u32 2147483647, %v10907_v60  ;;  %v4255_v14 = vpop.f32.mrb[21].mxu1  ;;  %v10914_v16 = vadd.f32 %v8230_v29, %v7318_v26  ;;  %v4419_v61 = vmul.f32 %v4411_v9, %v4299_v6 }
 0x4e3   : > { %v4314_v0 = vadd.f32 1.0, %v4306_v8  ;;  %v4300_v54 = vand.u32 2147483647, %v10910_v31  ;;  %v10916_v56 = vadd.f32 %v7318_v26, %v4255_v14  ;;  %v4418_v49 = vmul.f32 %v4410_v48, %v4298_v20 }
 0x4e4   : > { %9307 = vrcp.f32 %v4315_v55  ;;  %v4309_v50 = vmul.f32 0.3275911, %v4301_v22  ;;  %v4413_v59 = vsub.f32 0.0, %v4301_v22  ;;  %v10919_v57 = vmul.f32 0.70710677, %v10914_v16 }
 0x4e5   : > { %9309 = vrcp.f32 %v4314_v0  ;;  %v4308_v24 = vmul.f32 0.3275911, %v4300_v54  ;;  %v8233_v62 = vpop.f32.mrb[22].mxu1  ;;  %v10922_v43 = vmul.f32 0.70710677, %v10916_v56  ;;  %v4412_v13 = vsub.f32 0.0, %v4300_v54 }
 0x4e6   : > { %v4317_v34 = vadd.f32 1.0, %v4309_v50  ;;  %v4265_v42 = vpop.f32.mrb[23].mxu1  ;;  %v4303_v7 = vand.u32 2147483647, %v10919_v57  ;;  %v10925_v45 = vadd.f32 %v8233_v62, %v7318_v26  ;;  %v4421_v37 = vmul.f32 %v4413_v59, %v4301_v22 }
 0x4e7   : > { %v4316_v35 = vadd.f32 1.0, %v4308_v24  ;;  %v4302_v32 = vand.u32 2147483647, %v10922_v43  ;;  %v10928_v33 = vadd.f32 %v7318_v26, %v4265_v42  ;;  %v4428_v47 = vmul.f32 1.442695, %v4419_v61 }
 0x4e8   : > { %9311 = vrcp.f32 %v4317_v34  ;;  %v4311_v58 = vmul.f32 0.3275911, %v4303_v7  ;;  %v10933_v3 = vmul.f32 0.70710677, %v10925_v45  ;;  %v4426_v15 = vmul.f32 1.442695, %v4418_v49 }
 0x4e9   : > { %9313 = vrcp.f32 %v4316_v35  ;;  %v4310_v17 = vmul.f32 0.3275911, %v4302_v32  ;;  %v10936_v25 = vmul.f32 0.70710677, %v10928_v33  ;;  %v4420_v41 = vmul.f32 %v4412_v13, %v4300_v54 }
 0x4ea   : > { %v4319_v39 = vadd.f32 1.0, %v4311_v58  ;;  %v4305_v19 = vand.u32 2147483647, %v10933_v3  ;;  %v4415_v10 = vsub.f32 0.0, %v4303_v7  ;;  %v4432_v2 = vmul.f32 1.442695, %v4421_v37 }
 0x4eb   : > { %v4318_v30 = vadd.f32 1.0, %v4310_v17  ;;  %v4304_v63 = vand.u32 2147483647, %v10936_v25  ;;  %v4414_v44 = vsub.f32 0.0, %v4302_v32  ;;  %v4430_v55 = vmul.f32 1.442695, %v4420_v41 }
 0x4ec   : > { %9315 = vrcp.f32 %v4319_v39  ;;  %v4313_v53 = vmul.f32 0.3275911, %v4305_v19  ;;  %v4417_v1 = vsub.f32 0.0, %v4305_v19  ;;  %v4423_v22 = vmul.f32 %v4415_v10, %v4303_v7 }
 0x4ed   : > { %9317 = vrcp.f32 %v4318_v30  ;;  %v4312_v11 = vmul.f32 0.3275911, %v4304_v63  ;;  %v4422_v9 = vmul.f32 %v4414_v44, %v4302_v32  ;;  %v4416_v34 = vsub.f32 0.0, %v4304_v63 }
 0x4ee   : > { %v10938_v5 = vpop.eup %9307  ;;  %9319 = vpow2.f32 %v4428_v47  ;;  %v4321_v6 = vadd.f32 1.0, %v4313_v53  ;;  %v4425_v24 = vmul.f32 %v4417_v1, %v4305_v19  ;;  %v4436_v59 = vmul.f32 1.442695, %v4423_v22 }
 0x4ef   : > { %v10941_v51 = vpop.eup %9309  ;;  %v4339_v18 = vmul.f32 1.0614054, %v10938_v5  ;;  %v4320_v54 = vadd.f32 1.0, %v4312_v11  ;;  %v10957_v61 = vmul.f32 0.5, %v10893_v40  ;;  %v4424_v7 = vmul.f32 %v4416_v34, %v4304_v63 }
 0x4f0   : > { %v4338_v38 = vmul.f32 1.0614054, %v10941_v51  ;;  %9321 = vrcp.f32 %v4321_v6  ;;  %v4434_v58 = vmul.f32 1.442695, %v4422_v9  ;;  %vm4461_vm6 = vcmp.ge.f32.partialorder %v10907_v60, 0.0 }
 0x4f1   : > { %v4347_v26 = vadd.f32 -1.4531521, %v4339_v18  ;;  %9323 = vrcp.f32 %v4320_v54  ;;  %vm4460_vm7 = vcmp.ge.f32.partialorder %v10910_v31, 0.0  ;;  %v4285_v60 = vmul.f32 0.5, %v10901_v23 }
 0x4f2   : > { %v10946_v27 = vpop.eup %9311  ;;  %v4346_v4 = vadd.f32 -1.4531521, %v4338_v38  ;;  %9325 = vpow2.f32 %v4426_v15  ;;  %v4440_v15 = vmul.f32 1.442695, %v4425_v24  ;;  %vm4463_vm8 = vcmp.ge.f32.partialorder %v10919_v57, 0.0 }
 0x4f3   : > { %v10948_v20 = vpop.eup %9313  ;;  %v4355_v46 = vmul.f32 %v10938_v5, %v4347_v26  ;;  %v4341_v8 = vmul.f32 1.0614054, %v10946_v27  ;;  %9327 = vpow2.f32 %v4432_v2  ;;  %v4438_v2 = vmul.f32 1.442695, %v4424_v7 }
 0x4f4   : > { %v4354_v29 = vmul.f32 %v10941_v51, %v4346_v4  ;;  %v4340_v0 = vmul.f32 1.0614054, %v10948_v20  ;;  %9329 = vpow2.f32 %v4430_v55  ;;  %vm4462_vm9 = vcmp.ge.f32.partialorder %v10922_v43, 0.0 }
 0x4f5   : > { %v4363_v14 = vadd.f32 1.4214138, %v4355_v46  ;;  %v4349_v50 = vadd.f32 -1.4531521, %v4341_v8  ;;  %9331 = vpow2.f32 %v4436_v59  ;;  %vm4465_vm10 = vcmp.ge.f32.partialorder %v10933_v3, 0.0 }
 0x4f6   : > { %v4362_v62 = vadd.f32 1.4214138, %v4354_v29  ;;  %v4348_v48 = vadd.f32 -1.4531521, %v4340_v0  ;;  %v10961_v47 = vpop.eup %9315  ;;  %9333 = vpow2.f32 %v4434_v58  ;;  %vm4464_vm11 = vcmp.ge.f32.partialorder %v10936_v25, 0.0 }
 0x4f7   : > { %v4371_v42 = vmul.f32 %v10938_v5, %v4363_v14  ;;  %v4357_v35 = vmul.f32 %v10946_v27, %v4349_v50  ;;  %v10963_v39 = vpop.eup %9317  ;;  %v4343_v18 = vmul.f32 1.0614054, %v10961_v47  ;;  %9335 = vpow2.f32 %v4440_v15 }
 0x4f8   : > { %v4370_v49 = vmul.f32 %v10941_v51, %v4362_v62  ;;  %v4356_v13 = vmul.f32 %v10948_v20, %v4348_v48  ;;  %v9320_v10 = vpop.eup %9319  ;;  %v4342_v38 = vmul.f32 1.0614054, %v10963_v39  ;;  %9337 = vpow2.f32 %v4438_v2 }
 0x4f9   : > { %v4379_v32 = vadd.f32 -0.28449672, %v4371_v42  ;;  %v4365_v37 = vadd.f32 1.4214138, %v4357_v35  ;;  %v4351_v44 = vadd.f32 -1.4531521, %v4343_v18 }
 0x4fa   : > { %v4378_v17 = vadd.f32 -0.28449672, %v4370_v49  ;;  %v4364_v41 = vadd.f32 1.4214138, %v4356_v13  ;;  %v10971_v1 = vpop.eup %9321  ;;  %v4350_v11 = vadd.f32 -1.4531521, %v4342_v38 }
 0x4fb   : > { %v4387_v40 = vmul.f32 %v10938_v5, %v4379_v32  ;;  %v4373_v19 = vmul.f32 %v10946_v27, %v4365_v37  ;;  %v4359_v55 = vmul.f32 %v10961_v47, %v4351_v44  ;;  %v4345_v22 = vmul.f32 1.0614054, %v10971_v1  ;;  %v10979_v29 = vpop.eup %9323 }
 0x4fc   : > { %v4386_v30 = vmul.f32 %v10941_v51, %v4378_v17  ;;  %v4372_v63 = vmul.f32 %v10948_v20, %v4364_v41  ;;  %v4358_v14 = vmul.f32 %v10963_v39, %v4350_v11  ;;  %v9326_v50 = vpop.eup %9325  ;;  %v4344_v35 = vmul.f32 1.0614054, %v10979_v29 }
 0x4fd   : > { %v4395_v53 = vadd.f32 0.2548296, %v4387_v40  ;;  %v4381_v26 = vadd.f32 -0.28449672, %v4373_v19  ;;  %v4367_v24 = vadd.f32 1.4214138, %v4359_v55  ;;  %v9328_v59 = vpop.eup %9327 }
 0x4fe   : > { %v4394_v4 = vadd.f32 0.2548296, %v4386_v30  ;;  %v4380_v6 = vadd.f32 -0.28449672, %v4372_v63  ;;  %v4353_v62 = vadd.f32 -1.4531521, %v4345_v22  ;;  %v9330_v32 = vpop.eup %9329 }
 0x4ff   : > { %v4403_v46 = vmul.f32 %v10938_v5, %v4395_v53  ;;  %v4389_v8 = vmul.f32 %v10946_v27, %v4381_v26  ;;  %v4366_v42 = vadd.f32 1.4214138, %v4358_v14  ;;  %v4375_v13 = vmul.f32 %v10961_v47, %v4367_v24  ;;  %v9332_v15 = vpop.eup %9331 }
 0x500   : > { %v4402_v0 = vmul.f32 %v10941_v51, %v4394_v4  ;;  %v4388_v54 = vmul.f32 %v10948_v20, %v4380_v6  ;;  %v4361_v7 = vmul.f32 %v10971_v1, %v4353_v62  ;;  %v4352_v41 = vadd.f32 -1.4531521, %v4344_v35  ;;  %v9334_v2 = vpop.eup %9333 }
 0x501   : > { %v4443_v9 = vmul.f32 %v9320_v10, %v4403_v46  ;;  %v4397_v5 = vadd.f32 0.2548296, %v4389_v8  ;;  %v4374_v17 = vmul.f32 %v10963_v39, %v4366_v42  ;;  %v4383_v18 = vadd.f32 -0.28449672, %v4375_v13  ;;  %v9336_v4 = vpop.eup %9335 }
 0x502   : > { %v4442_v48 = vmul.f32 %v9326_v50, %v4402_v0  ;;  %v4396_v34 = vadd.f32 0.2548296, %v4388_v54  ;;  %v4369_v10 = vadd.f32 1.4214138, %v4361_v7  ;;  %v4360_v38 = vmul.f32 %v10979_v29, %v4352_v41  ;;  %v9338_v14 = vpop.eup %9337 }
 0x503   : > { %v4451_v49 = vsub.f32 1.0, %v4443_v9  ;;  %v4405_v51 = vmul.f32 %v10946_v27, %v4397_v5  ;;  %v4382_v63 = vadd.f32 -0.28449672, %v4374_v17 }
 0x504   : > { %v4450_v37 = vsub.f32 1.0, %v4442_v48  ;;  %v4404_v58 = vmul.f32 %v10948_v20, %v4396_v34  ;;  %v4391_v20 = vmul.f32 %v10961_v47, %v4383_v18  ;;  %v4377_v44 = vmul.f32 %v10971_v1, %v4369_v10 }
 0x505   : > { %v4467_v40 = vsub.f32 0.0, %v4451_v49  ;;  %v4445_v19 = vmul.f32 %v9328_v59, %v4405_v51  ;;  %v4390_v8 = vmul.f32 %v10963_v39, %v4382_v63  ;;  %v4368_v5 = vadd.f32 1.4214138, %v4360_v38 }
 0x506   : > { %v4466_v30 = vsub.f32 0.0, %v4450_v37  ;;  %v4444_v27 = vmul.f32 %v9330_v32, %v4404_v58  ;;  %v4399_v0 = vadd.f32 0.2548296, %v4391_v20  ;;  %v4385_v54 = vadd.f32 -0.28449672, %v4377_v44 }
 0x507   : > { %v4475_v53 = vsel %vm4459_vm4, %v4451_v49, %v4467_v40  ;;  %v4453_v26 = vsub.f32 1.0, %v4445_v19  ;;  %v4398_v9 = vadd.f32 0.2548296, %v4390_v8  ;;  %v4376_v35 = vmul.f32 %v10979_v29, %v4368_v5 }
 0x508   : > { %v4483_v6 = vadd.f32 1.0, %v4475_v53  ;;  %v4474_v11 = vsel %vm4458_vm5, %v4450_v37, %v4466_v30  ;;  %v4452_v46 = vsub.f32 1.0, %v4444_v27  ;;  %v4407_v62 = vmul.f32 %v10961_v47, %v4399_v0 }
 0x509   : > { %v4482_v55 = vadd.f32 1.0, %v4474_v11  ;;  %v4469_v22 = vsub.f32 0.0, %v4453_v26  ;;  %v4393_v48 = vmul.f32 %v10971_v1, %v4385_v54  ;;  %v4284_v59 = vmul.f32 0.5, %v10904_v28 }
 0x50a   : > { %v11001_v52 = vmul.f32 %v4483_v6, %v10930_v21  ;;  %v4468_v50 = vsub.f32 0.0, %v4452_v46  ;;  %v4406_v21 = vmul.f32 %v10963_v39, %v4398_v9  ;;  %v4384_v13 = vadd.f32 -0.28449672, %v4376_v35 }
 0x50b   : > { %v11004_v24 = vmul.f32 %v4482_v55, %v10957_v61  ;;  %v4477_v12 = vsel %vm4461_vm6, %v4453_v26, %v4469_v22  ;;  %v4447_v61 = vmul.f32 %v9332_v15, %v4407_v62  ;;  %v4401_v51 = vadd.f32 0.2548296, %v4393_v48 }
 0x50c   : > { %v4485_v34 = vadd.f32 1.0, %v4477_v12  ;;  %v4476_v42 = vsel %vm4460_vm7, %v4452_v46, %v4468_v50  ;;  %v4446_v47 = vmul.f32 %v9334_v2, %v4406_v21  ;;  %v4392_v37 = vmul.f32 %v10979_v29, %v4384_v13 }
 0x50d   : > { %v4484_v49 = vadd.f32 1.0, %v4476_v42  ;;  %8250 = vmatprep.mubr.msk.f32.mxu1 %vm644_vm0, %v11004_v24  ;;  %v4455_v39 = vsub.f32 1.0, %v4447_v61  ;;  %v4409_v7 = vmul.f32 %v10971_v1, %v4401_v51  ;;  %v4286_v10 = vmul.f32 0.5, %v10916_v56 }
 0x50e   : > { %8251 = vmatmul.mubr.msk.f32.vlgmr.msra.gmra.mrb[24].mxu1 %vm644_vm0, %v11001_v52  ;;  %v11023_v32 = vmul.f32 %v4485_v34, %v4285_v60  ;;  %v4454_v28 = vsub.f32 1.0, %v4446_v47  ;;  %v4400_v41 = vadd.f32 0.2548296, %v4392_v37  ;;  %v4287_v63 = vmul.f32 0.5, %v10914_v16  ;;  %v7359_v34 = vld [vmem:[%s11568_s8] ss:$0 sm:$0xff] }
 0x50f   : > { %v11020_v31 = vmul.f32 %v4484_v49, %v4284_v59  ;;  %v4471_v58 = vsub.f32 0.0, %v4455_v39  ;;  %v4449_v17 = vmul.f32 %v9336_v4, %v4409_v7  ;;  %v4289_v44 = vmul.f32 0.5, %v10925_v45 }
 0x510   : > { %v4470_v23 = vsub.f32 0.0, %v4454_v28  ;;  %v4408_v18 = vmul.f32 %v10979_v29, %v4400_v41  ;;  %v4288_v29 = vmul.f32 0.5, %v10928_v33  ;;  %v4866_v6 = vlaneseq }
 0x511   : > { %8253 = vmatprep.mubr.msk.f32.mxu1 %vm644_vm0, %v11020_v31  ;;  %v4479_v15 = vsel %vm4463_vm8, %v4455_v39, %v4471_v58  ;;  %v4457_v1 = vsub.f32 1.0, %v4449_v17 }
 0x512   : > { %8254 = vmatmul.mubr.msk.f32.gmra.mrb[26].mxu1 %vm644_vm0, %v11023_v32  ;;  %v4487_v40 = vadd.f32 1.0, %v4479_v15  ;;  %v4478_v19 = vsel %vm4462_vm9, %v4454_v28, %v4470_v23  ;;  %v4448_v57 = vmul.f32 %v9338_v14, %v4408_v18  ;;  %v4867_v11 = vshrl.u32 %v4866_v6, 7 }
 0x513   : > { %v4486_v30 = vadd.f32 1.0, %v4478_v19  ;;  %v4473_v27 = vsub.f32 0.0, %v4457_v1  ;;  %v11055_v25 = vand.u32 127, %v4866_v6 }
 0x514   : > { %v11037_v2 = vmul.f32 %v4487_v40, %v4287_v63  ;;  %v4456_v53 = vsub.f32 1.0, %v4448_v57  ;;  %v4873_v46 = vmul.u32 2, %v4867_v11  ;;  %v4868_v8 = vadd.s32 8, %v4867_v11 }
 0x515   : > { %v11035_v38 = vmul.f32 %v4486_v30, %v4286_v10  ;;  %v4481_v43 = vsel %vm4465_vm10, %v4457_v1, %v4473_v27  ;;  %v4869_v22 = vadd.s32 16, %v4867_v11  ;;  %v4870_v0 = vadd.s32 24, %v4867_v11 }
 0x516   : > { %v4472_v26 = vsub.f32 0.0, %v4456_v53  ;;  %v4489_v56 = vadd.f32 1.0, %v4481_v43  ;;  %vm4877_vm12 = vcmp.eq.s32.totalorder %v11055_v25, %v4873_v46  ;;  %v4874_v33 = vmul.u32 2, %v4868_v8 }
 0x517   : > { %8256 = vmatprep.mubr.msk.f32.mxu1 %vm644_vm0, %v11035_v38  ;;  %v11059_v45 = vsel %vm4877_vm12, 1.0, %v11644_v36  ;;  %v4875_v54 = vmul.u32 2, %v4869_v22  ;;  %v4876_v14 = vmul.u32 2, %v4870_v0  ;;  %v11073_v9 = vadd.s32 1, %v4873_v46 }
 0x518   : > { %8257 = vmatmul.mubr.msk.f32.gmra.mrb[28].mxu1 %vm644_vm0, %v11037_v2  ;;  %v4480_v16 = vsel %vm4464_vm11, %v4456_v53, %v4472_v26  ;;  %v11049_v3 = vmul.f32 %v4489_v56, %v4289_v44  ;;  %11648 = vst [vmem:[#allocation28_spill] sm:$0xff] %v11059_v45  ;;  %vm11064_vm13 = vcmp.eq.s32.totalorder %v11055_v25, %v4874_v33  ;;  %v11075_v5 = vadd.s32 1, %v4874_v33 }
 0x519   : > { %v4488_v20 = vadd.f32 1.0, %v4480_v16  ;;  %vm11069_vm14 = vcmp.eq.s32.totalorder %v11055_v25, %v4875_v54  ;;  %vm11078_vm15 = vcmp.eq.s32.totalorder %v11055_v25, %v4876_v14  ;;  %vm4893_vm1 = vcmp.eq.s32.totalorder %v11055_v25, %v11073_v9 }
 0x51a   : > { %vm4894_vm2 = vcmp.eq.s32.totalorder %v11055_v25, %v11075_v5  ;;  %v11086_v62 = vadd.s32 1, %v4875_v54  ;;  %v11088_v48 = vadd.s32 1, %v4876_v14  ;;  %v5122_v5 = vld [vmem:[#allocation11] sm:$0xff] }
 0x51b   : > { %v11047_v4 = vmul.f32 %v4488_v20, %v4288_v29  ;;  %v11256_v55 = vsel %vm4894_vm2, 1.0, %v11644_v36  ;;  %vm6021_vm2 = vcmask 261120  }
 0x51c   : > { %11655 = vst [vmem:[#allocation29_spill] sm:$0xff] %v11088_v48  ;;  %vm4895_vm3 = vcmp.eq.s32.totalorder %v11055_v25, %v11086_v62  ;;  %vm4896_vm4 = vcmp.eq.s32.totalorder %v11055_v25, %v11088_v48  ;;  %v5125_v62 = vld [vmem:[#allocation11 + $0x18] sm:$0xff]  ;;  %v5238_v25 = vld [vmem:[#allocation11 + $0x40] sm:$0xff] }
 0x51d   : > { %8259 = vmatprep.mubr.msk.f32.mxu1 %vm644_vm0, %v11047_v4  ;;  %v7374_v50 = vsel %vm4895_vm3, 1.0, %v11644_v36  ;;  %v7375_v12 = vsel %vm4896_vm4, 1.0, %v11644_v36 }
 0x51e   : > { %8260 = vmatmul.mubr.msk.f32.gmra.mrb[30].mxu1 %vm644_vm0, %v11049_v3 }
 0x51f   : > { %8278 = vmatprep.mubr.msk.f32.mxu1 %vm644_vm0, %v11059_v45 }
 0x5e1   : > { %v8252_v42 = vpop.f32.mrb[24].mxu1 }
 0x5e2   : > { %v4609_v21 = vadd.f32 %v8252_v42, %v7359_v34  ;;  %v4603_v35 = vpop.f32.mrb[25].mxu1 }
 0x5e3   : > { %v4604_v59 = vadd.f32 %v7359_v34, %v4603_v35 }
 0x5e4   : > { %v11097_v49 = vmul.f32 0.70710677, %v4609_v21  ;;  %v11121_v8 = vmul.f32 0.5, %v4609_v21 }
 0x5e5   : > { %v11099_v61 = vmul.f32 0.70710677, %v4604_v59  ;;  %v8255_v51 = vpop.f32.mrb[26].mxu1  ;;  %v11123_v22 = vmul.f32 0.5, %v4604_v59 }
 0x5e6   : > { %v4659_v60 = vand.u32 2147483647, %v11097_v49  ;;  %v4619_v47 = vadd.f32 %v8255_v51, %v7359_v34  ;;  %v4613_v13 = vpop.f32.mrb[27].mxu1  ;;  %vm4819_vm5 = vcmp.ge.f32.partialorder %v11097_v49, 0.0 }
 0x5e7   : > { %v4658_v39 = vand.u32 2147483647, %v11099_v61  ;;  %v4614_v7 = vadd.f32 %v7359_v34, %v4613_v13  ;;  %vm4818_vm6 = vcmp.ge.f32.partialorder %v11099_v61, 0.0 }
 0x5e8   : > { %v4667_v28 = vmul.f32 0.3275911, %v4659_v60  ;;  %v11103_v37 = vmul.f32 0.70710677, %v4619_v47  ;;  %v4771_v41 = vsub.f32 0.0, %v4659_v60  ;;  %v11125_v0 = vmul.f32 0.5, %v4619_v47 }
 0x5e9   : > { %v4666_v58 = vmul.f32 0.3275911, %v4658_v39  ;;  %v11105_v17 = vmul.f32 0.70710677, %v4614_v7  ;;  %v4770_v27 = vsub.f32 0.0, %v4658_v39 }
 0x5ea   : > { %v4675_v23 = vadd.f32 1.0, %v4667_v28  ;;  %v4661_v15 = vand.u32 2147483647, %v11103_v37  ;;  %v4779_v30 = vmul.f32 %v4771_v41, %v4659_v60  ;;  %v11137_v41 = vmul.f32 0.5, %v4614_v7 }
 0x5eb   : > { %v4674_v1 = vadd.f32 1.0, %v4666_v58  ;;  %v4660_v40 = vand.u32 2147483647, %v11105_v17  ;;  %v8258_v10 = vpop.f32.mrb[28].mxu1  ;;  %v4778_v44 = vmul.f32 %v4770_v27, %v4658_v39  ;;  %vm4821_vm7 = vcmp.ge.f32.partialorder %v11103_v37, 0.0 }
 0x5ec   : > { %9339 = vrcp.f32 %v4675_v23  ;;  %v4669_v19 = vmul.f32 0.3275911, %v4661_v15  ;;  %v11109_v57 = vadd.f32 %v8258_v10, %v7359_v34  ;;  %v4623_v53 = vpop.f32.mrb[29].mxu1  ;;  %v4773_v16 = vsub.f32 0.0, %v4661_v15 }
 0x5ed   : > { %9341 = vrcp.f32 %v4674_v1  ;;  %v4668_v18 = vmul.f32 0.3275911, %v4660_v40  ;;  %v11111_v26 = vadd.f32 %v7359_v34, %v4623_v53  ;;  %v4788_v20 = vmul.f32 1.442695, %v4779_v30 }
 0x5ee   : > { %v4677_v63 = vadd.f32 1.0, %v4669_v19  ;;  %v11114_v56 = vmul.f32 0.70710677, %v11109_v57  ;;  %v4772_v11 = vsub.f32 0.0, %v4660_v40  ;;  %v4781_v54 = vmul.f32 %v4773_v16, %v4661_v15 }
 0x5ef   : > { %v4676_v43 = vadd.f32 1.0, %v4668_v18  ;;  %v11117_v29 = vmul.f32 0.70710677, %v11111_v26  ;;  %v4786_v51 = vmul.f32 1.442695, %v4778_v44  ;;  %vm4820_vm8 = vcmp.ge.f32.partialorder %v11105_v17, 0.0 }
 0x5f0   : > { %9343 = vrcp.f32 %v4677_v63  ;;  %v4663_v6 = vand.u32 2147483647, %v11114_v56  ;;  %v4780_v58 = vmul.f32 %v4772_v11, %v4660_v40  ;;  %v4792_v19 = vmul.f32 1.442695, %v4781_v54 }
 0x5f1   : > { %9345 = vrcp.f32 %v4676_v43  ;;  %v4662_v46 = vand.u32 2147483647, %v11117_v29  ;;  %v8261_v42 = vpop.f32.mrb[30].mxu1  ;;  %vm4823_vm9 = vcmp.ge.f32.partialorder %v11114_v56, 0.0  ;;  %vm4822_vm10 = vcmp.ge.f32.partialorder %v11117_v29, 0.0 }
 0x5f2   : > { %v4671_v33 = vmul.f32 0.3275911, %v4663_v6  ;;  %9347 = vpow2.f32 %v4788_v20  ;;  %v11129_v13 = vadd.f32 %v8261_v42, %v7359_v34  ;;  %v4633_v39 = vpop.f32.mrb[31].mxu1  ;;  %v4775_v15 = vsub.f32 0.0, %v4663_v6 }
 0x5f3   : > { %v4670_v14 = vmul.f32 0.3275911, %v4662_v46  ;;  %v11134_v23 = vadd.f32 %v7359_v34, %v4633_v39  ;;  %v4774_v40 = vsub.f32 0.0, %v4662_v46  ;;  %v4790_v53 = vmul.f32 1.442695, %v4780_v58 }
 0x5f4   : > { %v4679_v60 = vadd.f32 1.0, %v4671_v33  ;;  %v11140_v18 = vmul.f32 0.70710677, %v11129_v13  ;;  %v4783_v44 = vmul.f32 %v4775_v15, %v4663_v6 }
 0x5f5   : > { %v4678_v59 = vadd.f32 1.0, %v4670_v14  ;;  %v11145_v34 = vmul.f32 0.70710677, %v11134_v23 }
 0x5f6   : > { %v11127_v35 = vpop.eup %9339  ;;  %9349 = vrcp.f32 %v4679_v60  ;;  %v4665_v43 = vand.u32 2147483647, %v11140_v18  ;;  %v4782_v60 = vmul.f32 %v4774_v40, %v4662_v46  ;;  %v4796_v15 = vmul.f32 1.442695, %v4783_v44 }
 0x5f7   : > { %v11131_v28 = vpop.eup %9341  ;;  %v4699_v21 = vmul.f32 1.0614054, %v11127_v35  ;;  %9351 = vrcp.f32 %v4678_v59  ;;  %v4664_v11 = vand.u32 2147483647, %v11145_v34  ;;  %vm4825_vm11 = vcmp.ge.f32.partialorder %v11140_v18, 0.0 }
 0x5f8   : > { %v4698_v47 = vmul.f32 1.0614054, %v11131_v28  ;;  %9353 = vpow2.f32 %v4786_v51  ;;  %v4673_v14 = vmul.f32 0.3275911, %v4665_v43  ;;  %v4777_v39 = vsub.f32 0.0, %v4665_v43 }
 0x5f9   : > { %v4707_v1 = vadd.f32 -1.4531521, %v4699_v21  ;;  %9355 = vpow2.f32 %v4792_v19  ;;  %vm4824_vm12 = vcmp.ge.f32.partialorder %v11145_v34, 0.0  ;;  %v7370_v34 = vsel %vm11069_vm14, 1.0, %v11644_v36 }
 0x5fa   : > { %v11142_v10 = vpop.eup %9343  ;;  %v4706_v30 = vadd.f32 -1.4531521, %v4698_v47  ;;  %v4681_v59 = vadd.f32 1.0, %v4673_v14  ;;  %v4672_v47 = vmul.f32 0.3275911, %v4664_v11  ;;  %9357 = vpow2.f32 %v4790_v53 }
 0x5fb   : > { %v11147_v27 = vpop.eup %9345  ;;  %v4715_v7 = vmul.f32 %v11127_v35, %v4707_v1  ;;  %v4701_v63 = vmul.f32 1.0614054, %v11142_v10 }
 0x5fc   : > { %v4714_v16 = vmul.f32 %v11131_v28, %v4706_v30  ;;  %v4700_v20 = vmul.f32 1.0614054, %v11147_v27  ;;  %v9348_v1 = vpop.eup %9347  ;;  %9359 = vrcp.f32 %v4681_v59  ;;  %v4776_v59 = vsub.f32 0.0, %v4664_v11 }
 0x5fd   : > { %v4723_v33 = vadd.f32 1.4214138, %v4715_v7  ;;  %v4709_v54 = vadd.f32 -1.4531521, %v4701_v63  ;;  %v4680_v63 = vadd.f32 1.0, %v4672_v47 }
 0x5fe   : > { %v4722_v42 = vadd.f32 1.4214138, %v4714_v16  ;;  %v4708_v51 = vadd.f32 -1.4531521, %v4700_v20  ;;  %v4794_v20 = vmul.f32 1.442695, %v4782_v60 }
 0x5ff   : > { %v4731_v21 = vmul.f32 %v11127_v35, %v4723_v33  ;;  %v4717_v58 = vmul.f32 %v11142_v10, %v4709_v54  ;;  %v4785_v33 = vmul.f32 %v4777_v39, %v4665_v43  ;;  %9361 = vrcp.f32 %v4680_v63 }
 0x600   : > { %v4730_v30 = vmul.f32 %v11131_v28, %v4722_v42  ;;  %v4716_v6 = vmul.f32 %v11147_v27, %v4708_v51  ;;  %v11159_v16 = vpop.eup %9349  ;;  %9363 = vpow2.f32 %v4796_v15 }
 0x601   : > { %v4739_v7 = vadd.f32 -0.28449672, %v4731_v21  ;;  %v4725_v19 = vadd.f32 1.4214138, %v4717_v58  ;;  %v11161_v54 = vpop.eup %9351  ;;  %v4703_v51 = vmul.f32 1.0614054, %v11159_v16  ;;  %9365 = vpow2.f32 %v4794_v20 }
 0x602   : > { %v4738_v46 = vadd.f32 -0.28449672, %v4730_v30  ;;  %v4724_v40 = vadd.f32 1.4214138, %v4716_v6  ;;  %v9354_v53 = vpop.eup %9353  ;;  %v4702_v58 = vmul.f32 1.0614054, %v11161_v54 }
 0x603   : > { %v4747_v14 = vmul.f32 %v11127_v35, %v4739_v7  ;;  %v4733_v42 = vmul.f32 %v11142_v10, %v4725_v19  ;;  %v4711_v43 = vadd.f32 -1.4531521, %v4703_v51  ;;  %v9356_v7 = vpop.eup %9355 }
 0x604   : > { %v4746_v44 = vmul.f32 %v11131_v28, %v4738_v46  ;;  %v4732_v21 = vmul.f32 %v11147_v27, %v4724_v40  ;;  %v4710_v6 = vadd.f32 -1.4531521, %v4702_v58  ;;  %v4800_v40 = vmul.f32 1.442695, %v4785_v33  ;;  %v9358_v48 = vpop.eup %9357 }
 0x605   : > { %v4755_v47 = vadd.f32 0.2548296, %v4747_v14  ;;  %v4741_v60 = vadd.f32 -0.28449672, %v4733_v42  ;;  %v4719_v46 = vmul.f32 %v11159_v16, %v4711_v43  ;;  %v4784_v58 = vmul.f32 %v4776_v59, %v4664_v11 }
 0x606   : > { %v4754_v39 = vadd.f32 0.2548296, %v4746_v44  ;;  %v4740_v30 = vadd.f32 -0.28449672, %v4732_v21  ;;  %v4718_v42 = vmul.f32 %v11161_v54, %v4710_v6  ;;  %v11178_v43 = vpop.eup %9359  ;;  %9367 = vpow2.f32 %v4800_v40 }
 0x607   : > { %v4763_v19 = vmul.f32 %v11127_v35, %v4755_v47  ;;  %v4749_v63 = vmul.f32 %v11142_v10, %v4741_v60  ;;  %v4727_v21 = vadd.f32 1.4214138, %v4719_v46  ;;  %v4798_v6 = vmul.f32 1.442695, %v4784_v58 }
 0x608   : > { %v4762_v45 = vmul.f32 %v11131_v28, %v4754_v39  ;;  %v4748_v14 = vmul.f32 %v11147_v27, %v4740_v30  ;;  %v4726_v60 = vadd.f32 1.4214138, %v4718_v42 }
 0x609   : > { %v4803_v51 = vmul.f32 %v9348_v1, %v4763_v19  ;;  %v4757_v44 = vadd.f32 0.2548296, %v4749_v63  ;;  %v4735_v15 = vmul.f32 %v11159_v16, %v4727_v21  ;;  %v11186_v59 = vpop.eup %9361  ;;  %9369 = vpow2.f32 %v4798_v6 }
 0x60a   : > { %v4802_v35 = vmul.f32 %v9354_v53, %v4762_v45  ;;  %v4756_v47 = vadd.f32 0.2548296, %v4748_v14  ;;  %v4734_v45 = vmul.f32 %v11161_v54, %v4726_v60  ;;  %v4705_v53 = vmul.f32 1.0614054, %v11178_v43  ;;  %v9364_v60 = vpop.eup %9363 }
 0x60b   : > { %v4811_v33 = vsub.f32 1.0, %v4803_v51  ;;  %v4765_v28 = vmul.f32 %v11142_v10, %v4757_v44  ;;  %v4743_v30 = vadd.f32 -0.28449672, %v4735_v15  ;;  %v4704_v42 = vmul.f32 1.0614054, %v11186_v59 }
 0x60c   : > { %v4810_v1 = vsub.f32 1.0, %v4802_v35  ;;  %v4764_v11 = vmul.f32 %v11147_v27, %v4756_v47  ;;  %v4742_v63 = vadd.f32 -0.28449672, %v4734_v45  ;;  %v4713_v46 = vadd.f32 -1.4531521, %v4705_v53  ;;  %v9366_v53 = vpop.eup %9365 }
 0x60d   : > { %v4827_v20 = vsub.f32 0.0, %v4811_v33  ;;  %v4805_v39 = vmul.f32 %v9356_v7, %v4765_v28  ;;  %v4751_v27 = vmul.f32 %v11159_v16, %v4743_v30  ;;  %v4712_v15 = vadd.f32 -1.4531521, %v4704_v42 }
 0x60e   : > { %v4826_v19 = vsub.f32 0.0, %v4810_v1  ;;  %v4804_v10 = vmul.f32 %v9358_v48, %v4764_v11  ;;  %v4750_v7 = vmul.f32 %v11161_v54, %v4742_v63  ;;  %v4721_v47 = vmul.f32 %v11178_v43, %v4713_v46 }
 0x60f   : > { %v4835_v40 = vsel %vm4819_vm5, %v4811_v33, %v4827_v20  ;;  %v4813_v14 = vsub.f32 1.0, %v4805_v39  ;;  %v4759_v48 = vadd.f32 0.2548296, %v4751_v27 }
 0x610   : > { %v4843_v51 = vadd.f32 1.0, %v4835_v40  ;;  %v4834_v44 = vsel %vm4818_vm6, %v4810_v1, %v4826_v19  ;;  %v4812_v21 = vsub.f32 1.0, %v4804_v10  ;;  %v4758_v28 = vadd.f32 0.2548296, %v4750_v7  ;;  %v9368_v19 = vpop.eup %9367 }
 0x611   : > { %v4842_v58 = vadd.f32 1.0, %v4834_v44  ;;  %v4829_v35 = vsub.f32 0.0, %v4813_v14  ;;  %v4767_v1 = vmul.f32 %v11159_v16, %v4759_v48  ;;  %v4729_v45 = vadd.f32 1.4214138, %v4721_v47 }
 0x612   : > { %v4851_v49 = vmul.f32 %v4843_v51, %v11121_v8  ;;  %v4828_v33 = vsub.f32 0.0, %v4812_v21  ;;  %v4766_v8 = vmul.f32 %v11161_v54, %v4758_v28  ;;  %v4720_v40 = vmul.f32 %v11186_v59, %v4712_v15 }
 0x613   : > { %v4850_v11 = vmul.f32 %v4842_v58, %v11123_v22  ;;  %v4837_v61 = vsel %vm4821_vm7, %v4813_v14, %v4829_v35  ;;  %v4807_v22 = vmul.f32 %v9364_v60, %v4767_v1  ;;  %v4737_v37 = vmul.f32 %v11178_v43, %v4729_v45  ;;  %v9370_v45 = vpop.eup %9369 }
 0x614   : > { %v4859_v20 = vadd.f32 %v4851_v49, %v11001_v52  ;;  %v4845_v39 = vadd.f32 1.0, %v4837_v61  ;;  %v4836_v30 = vsel %vm4820_vm8, %v4812_v21, %v4828_v33  ;;  %v4806_v16 = vmul.f32 %v9366_v53, %v4766_v8 }
 0x615   : > { %v4858_v10 = vadd.f32 %v4850_v11, %v11004_v24  ;;  %v4844_v63 = vadd.f32 1.0, %v4836_v30  ;;  %v4815_v14 = vsub.f32 1.0, %v4807_v22  ;;  %v4745_v27 = vadd.f32 -0.28449672, %v4737_v37 }
 0x616   : > { %v4853_v46 = vmul.f32 %v4845_v39, %v11125_v0  ;;  %v4814_v54 = vsub.f32 1.0, %v4806_v16  ;;  %v4728_v51 = vadd.f32 1.4214138, %v4720_v40  ;;  %v4647_v35 = vmul.f32 0.5, %v11109_v57  ;;  %v5124_v16 = vld [vmem:[#allocation11 + $0x10] sm:$0xff] }
 0x617   : > { %v4852_v52 = vmul.f32 %v4844_v63, %v11137_v41  ;;  %v8700_v17 = vpack.c.bf16 %v4859_v20, %v4858_v10  ;;  %v4831_v44 = vsub.f32 0.0, %v4815_v14  ;;  %v4753_v21 = vmul.f32 %v11178_v43, %v4745_v27 }
 0x618   : > { %v4861_v42 = vadd.f32 %v4853_v46, %v11023_v32  ;;  %v4830_v0 = vsub.f32 0.0, %v4814_v54  ;;  %v4736_v7 = vmul.f32 %v11186_v59, %v4728_v51  ;;  %v4646_v60 = vmul.f32 0.5, %v11111_v26  ;;  %v5239_v51 = vld [vmem:[#allocation11 + $0x48] sm:$0xff] }
 0x619   : > { %v4860_v24 = vadd.f32 %v4852_v52, %v11020_v31  ;;  %8701 = vmatprep.subr.bf16.mxu1 %v8700_v17  ;;  %v4839_v41 = vsel %vm4823_vm9, %v4815_v14, %v4831_v44  ;;  %v4761_v58 = vadd.f32 0.2548296, %v4753_v21  ;;  %v4649_v8 = vmul.f32 0.5, %v11129_v13  ;;  %v5126_v52 = vld [vmem:[#allocation11 + $0x20] sm:$0xff]  ;;  %v5127_v14 = vld [vmem:[#allocation11 + $0x28] sm:$0xff] }
 0x61a   : > { %8703 = vmatpush3.bf16.msra.mxu1 %v8700_v17  ;;  %v4847_v48 = vadd.f32 1.0, %v4839_v41  ;;  %v4838_v31 = vsel %vm4822_vm10, %v4814_v54, %v4830_v0  ;;  %v4744_v47 = vadd.f32 -0.28449672, %v4736_v7  ;;  %v11232_v13 = vsel %vm11064_vm13, 1.0, %v11644_v36 }
 0x61b   : > { %v8704_v32 = vpack.c.bf16 %v4861_v42, %v4860_v24  ;;  %v4846_v6 = vadd.f32 1.0, %v4838_v31  ;;  %v4769_v49 = vmul.f32 %v11178_v43, %v4761_v58  ;;  %v8736_v40 = vpack.c.bf16 %v5125_v62, %v5124_v16  ;;  %v5129_v42 = vld [vmem:[#allocation11 + $0x38] sm:$0xff]  ;;  %v5357_v16 = vld [vmem:[#allocation11 + $0xa8] sm:$0xff] }
 0x61c   : > { %v4855_v56 = vmul.f32 %v4847_v48, %v4647_v35  ;;  %v4752_v33 = vmul.f32 %v11186_v59, %v4744_v47  ;;  %v8740_v27 = vpack.c.bf16 %v5127_v14, %v5126_v52  ;;  %v8748_v24 = vpack.c.bf16 %v5239_v51, %v5238_v25  ;;  %v5359_v52 = vld [vmem:[#allocation11 + $0xb8] sm:$0xff] }
 0x61d   : > { %8705 = vmatprep.subr.bf16.mxu1 %v8704_v32  ;;  %v4854_v28 = vmul.f32 %v4846_v6, %v4646_v60  ;;  %v4809_v15 = vmul.f32 %v9368_v19, %v4769_v49  ;;  %v5240_v6 = vld [vmem:[#allocation11 + $0x50] sm:$0xff]  ;;  %v5241_v49 = vld [vmem:[#allocation11 + $0x58] sm:$0xff]  ;;  %vm9679_vm9 = vmmov 0  }
 0x61e   : > { %8707 = vmatpush3.bf16.msra.mxu1 %v8704_v32  ;;  %v4863_v29 = vadd.f32 %v4855_v56, %v11037_v2  ;;  %v4760_v11 = vadd.f32 0.2548296, %v4752_v33  ;;  %v5469_v25 = vld [vmem:[#allocation11 + $0xd8] sm:$0xff] }
 0x61f   : > { %v4862_v57 = vadd.f32 %v4854_v28, %v11035_v38  ;;  %v4817_v61 = vsub.f32 1.0, %v4809_v15  ;;  %v8752_v28 = vpack.c.bf16 %v5241_v49, %v5240_v6  ;;  %v5585_v6 = vld [vmem:[#allocation11 + $0x128] sm:$0xff] }
 0x620   : > { %v4768_v1 = vmul.f32 %v11186_v59, %v4760_v11  ;;  %v4648_v59 = vmul.f32 0.5, %v11134_v23  ;;  %v5123_v23 = vld [vmem:[#allocation11 + $0x8] sm:$0xff] }
 0x621   : > { %v4833_v26 = vsub.f32 0.0, %v4817_v61  ;;  %v8708_v53 = vpack.c.bf16 %v4863_v29, %v4862_v57  ;;  %v8732_v46 = vpack.c.bf16 %v5123_v23, %v5122_v5  ;;  %v5242_v29 = vld [vmem:[#allocation11 + $0x60] sm:$0xff]  ;;  %v5243_v11 = vld [vmem:[#allocation11 + $0x68] sm:$0xff]  ;;  %v5355_v5 = vld [vmem:[#allocation11 + $0x98] sm:$0xff] }
 0x622   : > { %v4808_v43 = vmul.f32 %v9370_v45, %v4768_v1 }
 0x623   : > { %v4841_v20 = vsel %vm4825_vm11, %v4817_v61, %v4833_v26  ;;  %8709 = vmatprep.subr.bf16.mxu1 %v8708_v53  ;;  %v5244_v26 = vld [vmem:[#allocation11 + $0x70] sm:$0xff] }
 0x624   : > { %v4849_v39 = vadd.f32 1.0, %v4841_v20  ;;  %v4816_v30 = vsub.f32 1.0, %v4808_v43  ;;  %8711 = vmatpush3.bf16.msra.mxu1 %v8708_v53 }
 0x626   : > { %v4832_v2 = vsub.f32 0.0, %v4816_v30  ;;  %v4857_v19 = vmul.f32 %v4849_v39, %v4649_v8  ;;  %v8756_v8 = vpack.c.bf16 %v5243_v11, %v5242_v29  ;;  %v5799_v29 = vld [vmem:[%s11571_s11 + $0x8] sm:$0xff] }
 0x628   : > { %v4840_v38 = vsel %vm4824_vm12, %v4816_v30, %v4832_v2  ;;  %v4865_v63 = vadd.f32 %v4857_v19, %v11049_v3  ;;  %v11247_v3 = vsel %vm4893_vm1, 1.0, %v11644_v36  ;;  %vm6874_vm12 = vcmask 130048  }
 0x629   : > { %v4848_v10 = vadd.f32 1.0, %v4840_v38 }
 0x62b   : > { %v4856_v22 = vmul.f32 %v4848_v10, %v4648_v59 }
 0x62d   : > { %v4864_v18 = vadd.f32 %v4856_v22, %v11047_v4  ;;  %v7371_v4 = vsel %vm11078_vm15, 1.0, %v11644_v36 }
 0x62f   : > { %v8712_v37 = vpack.c.bf16 %v4865_v63, %v4864_v18 }
 0x631   : > { %8713 = vmatprep.subr.bf16.mxu1 %v8712_v37 }
 0x632   : > { %8715 = vmatpush3.bf16.msra.mxu1 %v8712_v37 }
 0x633   : > { %8717 = vmatprep.subr.bf16.mxu1 %v8700_v17 }
 0x635   : > { %8279 = vmatmul.mubr.msk.f32.vlgmr.msra.gmra.mrb[32].mxu1 %vm644_vm0, %v11232_v13 }
 0x636   : > { %8719 = vmatpush3.bf16.msra.mxu1 %v8700_v17  ;;  %8281 = vmatprep.mubr.msk.f32.mxu1 %vm644_vm0, %v7370_v34  ;;  %v5128_v17 = vld [vmem:[#allocation11 + $0x30] sm:$0xff] }
 0x637   : > { %8721 = vmatprep.subr.bf16.mxu1 %v8704_v32  ;;  %v8744_v54 = vpack.c.bf16 %v5129_v42, %v5128_v17  ;;  %v5467_v17 = vld [vmem:[#allocation11 + $0xc8] sm:$0xff] }
 0x639   : > { %8282 = vmatmul.mubr.msk.f32.gmra.mrb[34].mxu1 %vm644_vm0, %v7371_v4  ;;  %v5352_v4 = vld [vmem:[#allocation11 + $0x80] sm:$0xff] }
 0x63a   : > { %8723 = vmatpush3.bf16.msra.mxu1 %v8704_v32  ;;  %8300 = vmatprep.mubr.msk.f32.mxu1 %vm644_vm0, %v11247_v3 }
 0x63b   : > { %8725 = vmatprep.subr.bf16.mxu1 %v8708_v53 }
 0x63e   : > { %8727 = vmatpush3.bf16.msra.mxu1 %v8708_v53  ;;  %v5245_v53 = vld [vmem:[#allocation11 + $0x78] sm:$0xff] }
 0x63f   : > { %8729 = vmatprep.subr.bf16.mxu1 %v8712_v37  ;;  %v8760_v34 = vpack.c.bf16 %v5245_v53, %v5244_v26  ;;  %v5803_v26 = vld [vmem:[%s11571_s11 + $0x28] sm:$0xff] }
 0x642   : > { %8731 = vmatpush3.bf16.msra.mxu1 %v8712_v37 }
 0x643   : > { %8733 = vmatprep.subr.bf16.mxu1 %v8732_v46 }
 0x645   : > { %8301 = vmatmul.mubr.msk.f32.vlgmr.msra.gmra.mrb[36].mxu1 %vm644_vm0, %v11256_v55 }
 0x646   : > { %8303 = vmatprep.mubr.msk.f32.mxu1 %vm644_vm0, %v7374_v50  ;;  %8735 = vmatpush3.bf16.msra.mxu1 %v8732_v46  ;;  %v5353_v50 = vld [vmem:[#allocation11 + $0x88] sm:$0xff]  ;;  %v5356_v46 = vld [vmem:[#allocation11 + $0xa0] sm:$0xff] }
 0x647   : > { %8737 = vmatprep.subr.bf16.mxu1 %v8736_v40  ;;  %v8764_v9 = vpack.c.bf16 %v5353_v50, %v5352_v4  ;;  %v8772_v62 = vpack.c.bf16 %v5357_v16, %v5356_v46 }
 0x649   : > { %8304 = vmatmul.mubr.msk.f32.gmra.mrb[38].mxu1 %vm644_vm0, %v7375_v12  ;;  %v5354_v12 = vld [vmem:[#allocation11 + $0x90] sm:$0xff] }
 0x64a   : > { %8739 = vmatpush3.bf16.msra.mxu1 %v8736_v40  ;;  %v8768_v23 = vpack.c.bf16 %v5355_v5, %v5354_v12  ;;  %v5358_v40 = vld [vmem:[#allocation11 + $0xb0] sm:$0xff] }
 0x64b   : > { %8741 = vmatprep.subr.bf16.mxu1 %v8740_v27  ;;  %v8776_v14 = vpack.c.bf16 %v5359_v52, %v5358_v40 }
 0x64e   : > { %8743 = vmatpush3.bf16.msra.mxu1 %v8740_v27  ;;  %v5466_v27 = vld [vmem:[#allocation11 + $0xc0] sm:$0xff] }
 0x64f   : > { %8745 = vmatprep.subr.bf16.mxu1 %v8744_v54  ;;  %v8780_v42 = vpack.c.bf16 %v5467_v17, %v5466_v27 }
 0x652   : > { %8747 = vmatpush3.bf16.msra.mxu1 %v8744_v54  ;;  %v5468_v54 = vld [vmem:[#allocation11 + $0xd0] sm:$0xff] }
 0x653   : > { %8749 = vmatprep.subr.bf16.mxu1 %v8748_v24  ;;  %v8784_v51 = vpack.c.bf16 %v5469_v25, %v5468_v54 }
 0x708   : > { %v8280_v44 = vpop.f32.mrb[32].mxu1 }
 0x709   : > { %v4983_v21 = vpop.f32.mrb[33].mxu1 }
 0x70c   : > { %v8283_v0 = vpop.f32.mrb[34].mxu1 }
 0x70d   : > { %v4993_v7 = vpop.f32.mrb[35].mxu1 }
 0x718   : > { %v8302_v41 = vpop.f32.mrb[36].mxu1 }
 0x719   : > { %v5100_v58 = vmax.f32 %v8280_v44, %v8302_v41  ;;  %v5080_v32 = vpop.f32.mrb[37].mxu1  ;;  %v5471_v44 = vld [vmem:[#allocation11 + $0xe8] sm:$0xff] }
 0x71a   : > { %v5099_v35 = vmax.f32 %v4983_v21, %v5080_v32  ;;  %v5581_v32 = vld [vmem:[#allocation11 + $0x108] sm:$0xff] }
 0x71b   : > { %5115 = vst.msk [vmem:[#allocation2 + $0x10] sm:$0xff] %vm644_vm0, %v5100_v58  ;;  %v5580_v58 = vld [vmem:[#allocation11 + $0x100] sm:$0xff] }
 0x71c   : > { %5114 = vst.msk [vmem:[#allocation2 + $0x8] sm:$0xff] %vm644_vm0, %v5099_v35  ;;  %v8305_v48 = vpop.f32.mrb[38].mxu1  ;;  %v8796_v35 = vpack.c.bf16 %v5581_v32, %v5580_v58 }
 0x71d   : > { %v5102_v31 = vmax.f32 %v8283_v0, %v8305_v48  ;;  %v5090_v47 = vpop.f32.mrb[39].mxu1  ;;  %v5472_v0 = vld [vmem:[#allocation11 + $0xf0] sm:$0xff] }
 0x71e   : > { %v5101_v60 = vmax.f32 %v4993_v7, %v5090_v47  ;;  %v5473_v7 = vld [vmem:[#allocation11 + $0xf8] sm:$0xff]  ;;  %v5582_v48 = vld [vmem:[#allocation11 + $0x110] sm:$0xff] }
 0x71f   : > { %5117 = vst.msk [vmem:[#allocation2 + $0x20] sm:$0xff] %vm644_vm0, %v5102_v31  ;;  %v8792_v41 = vpack.c.bf16 %v5473_v7, %v5472_v0  ;;  %v5583_v31 = vld [vmem:[#allocation11 + $0x118] sm:$0xff] }
 0x720   : > { %5116 = vst.msk [vmem:[#allocation2 + $0x18] sm:$0xff] %vm644_vm0, %v5101_v60  ;;  %v8800_v47 = vpack.c.bf16 %v5583_v31, %v5582_v48  ;;  %v5584_v60 = vld [vmem:[#allocation11 + $0x120] sm:$0xff] }
 0x721   : > { %v8804_v49 = vpack.c.bf16 %v5585_v6, %v5584_v60 }
 0x722   : > { %v5348_v19 = vld [vmem:[#allocation2 + $0x10] sm:$0xff] }
 0x723   : > { %v5118_v56 = vld [vmem:[#allocation2 + $0x6] sm:$0xff]  ;;  %v5119_v33 = vld [vmem:[#allocation2 + $0xe] sm:$0xff] }
 0x724   : > { %v5233_v15 = vld [vmem:[#allocation2 + $0x7] sm:$0xff]  ;;  %8322 = vmatprep.mubr.msk.f32.mxu1 %vm644_vm0, %v5118_v56  ;;  %v5234_v57 = vld [vmem:[#allocation2 + $0xf] sm:$0xff]  ;;  %v5586_v56 = vld [vmem:[#allocation11 + $0x130] sm:$0xff] }
 0x725   : > { %6183 = vst.msk [vmem:[#allocation2] sm:$0xff] %vm644_vm0, %v11644_v36  ;;  %8323 = vmatmul.mubr.msk.f32.vlgmr.msra.gmra.mrb[40].mxu1 %vm644_vm0, %v5119_v33  ;;  %v5347_v61 = vld [vmem:[#allocation2 + $0x8] sm:$0xff] }
 0x726   : > { %v11278_v1 = vld [vmem:[#allocation2 + $0x9] sm:$0xff]  ;;  %8751 = vmatpush3.bf16.msra.mxu1 %v8748_v24  ;;  %v11282_v43 = vld [vmem:[#allocation2 + $0x21] sm:$0xff] }
 0x727   : > { %v11280_v45 = vld [vmem:[#allocation2 + $0xa] sm:$0xff]  ;;  %v11286_v20 = vld [vmem:[#allocation2 + $0x22] sm:$0xff]  ;;  %v5120_v39 = vld [vmem:[#allocation2 + $0x16] sm:$0xff]  ;;  %8753 = vmatprep.subr.bf16.mxu1 %v8752_v28 }
 0x728   : > { %6184 = vst.msk [vmem:[#allocation2 + $0x8] sm:$0xff] %vm644_vm0, %v11644_v36  ;;  %v5121_v30 = vld [vmem:[#allocation2 + $0x1e] sm:$0xff]  ;;  %6188 = vst.msk [vmem:[#allocation2 + $0x28] sm:$0xff] %vm644_vm0, %v11644_v36  ;;  %8325 = vmatprep.mubr.msk.f32.mxu1 %vm644_vm0, %v5120_v39  ;;  %v11291_v63 = vld [vmem:[#allocation2 + $0x11] sm:$0xff] }
 0x729   : > { %v5235_v2 = vld [vmem:[#allocation2 + $0x17] sm:$0xff]  ;;  %v5350_v38 = vld [vmem:[#allocation2 + $0x20] sm:$0xff]  ;;  %8326 = vmatmul.mubr.msk.f32.gmra.mrb[42].mxu1 %vm644_vm0, %v5121_v30  ;;  %v5470_v24 = vld [vmem:[#allocation11 + $0xe0] sm:$0xff] }
 0x72a   : > { %v5236_v59 = vld [vmem:[#allocation2 + $0x1f] sm:$0xff]  ;;  %v11296_v18 = vld [vmem:[#allocation2 + $0x12] sm:$0xff]  ;;  %8755 = vmatpush3.bf16.msra.mxu1 %v8752_v28  ;;  %8344 = vmatprep.mubr.msk.f32.mxu1 %vm644_vm0, %v5233_v15  ;;  %v8788_v21 = vpack.c.bf16 %v5471_v44, %v5470_v24 }
 0x72b   : > { %v5349_v10 = vld [vmem:[#allocation2 + $0x18] sm:$0xff]  ;;  %6185 = vst.msk [vmem:[#allocation2 + $0x10] sm:$0xff] %vm644_vm0, %v11644_v36  ;;  %8757 = vmatprep.subr.bf16.mxu1 %v8756_v8  ;;  %v5587_v33 = vld [vmem:[#allocation11 + $0x138] sm:$0xff]  ;;  %v7384_v30 = vld [vmem:[%s11570_s10] ss:$0 sm:$0xff] }
 0x72c   : > { %v11294_v22 = vld [vmem:[#allocation2 + $0x19] sm:$0xff]  ;;  %v8808_v28 = vpack.c.bf16 %v5587_v33, %v5586_v56 }
 0x72d   : > { %v11298_v37 = vld [vmem:[#allocation2 + $0x1a] sm:$0xff] }
 0x72e   : > { %6186 = vst.msk [vmem:[#allocation2 + $0x18] sm:$0xff] %vm644_vm0, %v11644_v36  ;;  %6187 = vst.msk [vmem:[#allocation2 + $0x20] sm:$0xff] %vm644_vm0, %v11644_v36  ;;  %8759 = vmatpush3.bf16.msra.mxu1 %v8756_v8  ;;  %v5798_v15 = vld [vmem:[%s11571_s11] sm:$0xff] }
 0x72f   : > { %8761 = vmatprep.subr.bf16.mxu1 %v8760_v34  ;;  %v8812_v11 = vpack.c.bf16 %v5799_v29, %v5798_v15 }
 0x732   : > { %8763 = vmatpush3.bf16.msra.mxu1 %v8760_v34 }
 0x733   : > { %8765 = vmatprep.subr.bf16.mxu1 %v8764_v9 }
 0x735   : > { %8345 = vmatmul.mubr.msk.f32.vlgmr.msra.gmra.mrb[40].mxu1 %vm644_vm0, %v5234_v57  ;;  %v5800_v57 = vld [vmem:[%s11571_s11 + $0x10] sm:$0xff] }
 0x736   : > { %8347 = vmatprep.mubr.msk.f32.mxu1 %vm644_vm0, %v5235_v2  ;;  %8767 = vmatpush3.bf16.msra.mxu1 %v8764_v9 }
 0x737   : > { %8769 = vmatprep.subr.bf16.mxu1 %v8768_v23 }
 0x739   : > { %8348 = vmatmul.mubr.msk.f32.gmra.mrb[42].mxu1 %vm644_vm0, %v5236_v59 }
 0x73a   : > { %8771 = vmatpush3.bf16.msra.mxu1 %v8768_v23  ;;  %8366 = vmatprep.mubr.msk.f32.mxu1 %vm644_vm0, %v5347_v61  ;;  %v5801_v61 = vld [vmem:[%s11571_s11 + $0x18] sm:$0xff] }
 0x73b   : > { %8773 = vmatprep.subr.bf16.mxu1 %v8772_v62 }
 0x73e   : > { %8775 = vmatpush3.bf16.msra.mxu1 %v8772_v62 }
 0x73f   : > { %8777 = vmatprep.subr.bf16.mxu1 %v8776_v14 }
 0x742   : > { %8779 = vmatpush3.bf16.msra.mxu1 %v8776_v14 }
 0x743   : > { %8781 = vmatprep.subr.bf16.mxu1 %v8780_v42 }
 0x745   : > { %8367 = vmatmul.mubr.msk.f32.vlgmr.msra.gmra.mrb[40].mxu1 %vm644_vm0, %v5348_v19 }
 0x746   : > { %8369 = vmatprep.mubr.msk.f32.mxu1 %vm644_vm0, %v5349_v10  ;;  %8783 = vmatpush3.bf16.msra.mxu1 %v8780_v42 }
 0x747   : > { %8785 = vmatprep.subr.bf16.mxu1 %v8784_v51 }
 0x749   : > { %8370 = vmatmul.mubr.msk.f32.gmra.mrb[42].mxu1 %vm644_vm0, %v5350_v38 }
 0x74a   : > { %8787 = vmatpush3.bf16.msra.mxu1 %v8784_v51  ;;  %8388 = vmatprep.mubr.msk.f32.mxu1 %vm644_vm0, %v11278_v1  ;;  %v8816_v1 = vpack.c.bf16 %v5801_v61, %v5800_v57 }
 0x74b   : > { %8789 = vmatprep.subr.bf16.mxu1 %v8788_v21 }
 0x74e   : > { %8791 = vmatpush3.bf16.msra.mxu1 %v8788_v21 }
 0x74f   : > { %8793 = vmatprep.subr.bf16.mxu1 %v8792_v41 }
 0x752   : > { %8795 = vmatpush3.bf16.msra.mxu1 %v8792_v41 }
 0x753   : > { %8797 = vmatprep.subr.bf16.mxu1 %v8796_v35 }
 0x755   : > { %8389 = vmatmul.mubr.msk.f32.vlgmr.msra.gmra.mrb[40].mxu1 %vm644_vm0, %v11291_v63 }
 0x756   : > { %8391 = vmatprep.mubr.msk.f32.mxu1 %vm644_vm0, %v11294_v22  ;;  %8799 = vmatpush3.bf16.msra.mxu1 %v8796_v35 }
 0x757   : > { %8801 = vmatprep.subr.bf16.mxu1 %v8800_v47 }
 0x759   : > { %8392 = vmatmul.mubr.msk.f32.gmra.mrb[42].mxu1 %vm644_vm0, %v11282_v43  ;;  %v5804_v43 = vld [vmem:[%s11571_s11 + $0x30] sm:$0xff] }
 0x75a   : > { %8803 = vmatpush3.bf16.msra.mxu1 %v8800_v47  ;;  %8410 = vmatprep.mubr.msk.f32.mxu1 %vm644_vm0, %v11280_v45  ;;  %v5802_v45 = vld [vmem:[%s11571_s11 + $0x20] sm:$0xff] }
 0x75b   : > { %8805 = vmatprep.subr.bf16.mxu1 %v8804_v49  ;;  %v8820_v53 = vpack.c.bf16 %v5803_v26, %v5802_v45 }
 0x75e   : > { %8807 = vmatpush3.bf16.msra.mxu1 %v8804_v49 }
 0x75f   : > { %8809 = vmatprep.subr.bf16.mxu1 %v8808_v28 }
 0x762   : > { %8811 = vmatpush3.bf16.msra.mxu1 %v8808_v28 }
 0x763   : > { %8813 = vmatprep.subr.bf16.mxu1 %v8812_v11 }
 0x765   : > { %8411 = vmatmul.mubr.msk.f32.vlgmr.msra.gmra.mrb[40].mxu1 %vm644_vm0, %v11296_v18 }
 0x766   : > { %8413 = vmatprep.mubr.msk.f32.mxu1 %vm644_vm0, %v11298_v37  ;;  %8815 = vmatpush3.bf16.msra.mxu1 %v8812_v11 }
 0x767   : > { %8817 = vmatprep.subr.bf16.mxu1 %v8816_v1 }
 0x769   : > { %8414 = vmatmul.mubr.msk.f32.gmra.mrb[42].mxu1 %vm644_vm0, %v11286_v20  ;;  %v5805_v20 = vld [vmem:[%s11571_s11 + $0x38] sm:$0xff] }
 0x76a   : > { %8819 = vmatpush3.bf16.msra.mxu1 %v8816_v1  ;;  %v8824_v39 = vpack.c.bf16 %v5805_v20, %v5804_v43 }
 0x76b   : > { %8821 = vmatprep.subr.bf16.mxu1 %v8820_v53 }
 0x76e   : > { %8823 = vmatpush3.bf16.msra.mxu1 %v8820_v53 }
 0x76f   : > { %8825 = vmatprep.subr.bf16.mxu1 %v8824_v39 }
 0x772   : > { %8827 = vmatpush3.bf16.msra.mxu1 %v8824_v39 }
 0x838   : > { %v8412_v8 = vpop.f32.mrb[40].mxu1 }
 0x839   : > { %v11357_v2 = vadd.f32 %v8412_v8, %v7384_v30  ;;  %v5666_v19 = vpop.f32.mrb[41].mxu1 }
 0x83a   : > { %v11359_v38 = vadd.f32 %v7384_v30, %v5666_v19 }
 0x83b   : > { %v11362_v59 = vmul.f32 0.70710677, %v11357_v2 }
 0x83c   : > { %v11365_v10 = vmul.f32 0.70710677, %v11359_v38  ;;  %v8415_v63 = vpop.f32.mrb[42].mxu1 }
 0x83d   : > { %v5698_v22 = vand.u32 2147483647, %v11362_v59  ;;  %v11368_v18 = vadd.f32 %v8415_v63, %v7384_v30  ;;  %v5676_v37 = vpop.f32.mrb[43].mxu1  ;;  %vm5778_vm13 = vcmp.ge.f32.partialorder %v11362_v59, 0.0 }
 0x83e   : > { %v5697_v34 = vand.u32 2147483647, %v11365_v10  ;;  %v11371_v4 = vadd.f32 %v7384_v30, %v5676_v37  ;;  %vm5777_vm14 = vcmp.ge.f32.partialorder %v11365_v10, 0.0 }
 0x83f   : > { %v5702_v50 = vmul.f32 0.3275911, %v5698_v22  ;;  %v11374_v9 = vmul.f32 0.70710677, %v11368_v18  ;;  %v5754_v17 = vsub.f32 0.0, %v5698_v22 }
 0x840   : > { %v5701_v12 = vmul.f32 0.3275911, %v5697_v34  ;;  %v11377_v5 = vmul.f32 0.70710677, %v11371_v4  ;;  %v5753_v42 = vsub.f32 0.0, %v5697_v34 }
 0x841   : > { %v5706_v23 = vadd.f32 1.0, %v5702_v50  ;;  %v5700_v46 = vand.u32 2147483647, %v11374_v9  ;;  %v5758_v25 = vmul.f32 %v5754_v17, %v5698_v22  ;;  %vm5780_vm15 = vcmp.ge.f32.partialorder %v11374_v9, 0.0 }
 0x842   : > { %v5705_v16 = vadd.f32 1.0, %v5701_v12  ;;  %v5699_v62 = vand.u32 2147483647, %v11377_v5  ;;  %v5757_v21 = vmul.f32 %v5753_v42, %v5697_v34  ;;  %vm5779_vm1 = vcmp.ge.f32.partialorder %v11377_v5, 0.0 }
 0x843   : > { %9371 = vrcp.f32 %v5706_v23  ;;  %v5704_v40 = vmul.f32 0.3275911, %v5700_v46  ;;  %v5756_v51 = vsub.f32 0.0, %v5700_v46  ;;  %v5763_v32 = vmul.f32 1.442695, %v5758_v25 }
 0x844   : > { %9373 = vrcp.f32 %v5705_v16  ;;  %v5703_v52 = vmul.f32 0.3275911, %v5699_v62  ;;  %v5755_v0 = vsub.f32 0.0, %v5699_v62  ;;  %v5761_v60 = vmul.f32 1.442695, %v5757_v21 }
 0x845   : > { %v5708_v14 = vadd.f32 1.0, %v5704_v40  ;;  %v5760_v48 = vmul.f32 %v5756_v51, %v5700_v46 }
 0x846   : > { %v5707_v27 = vadd.f32 1.0, %v5703_v52  ;;  %v5759_v49 = vmul.f32 %v5755_v0, %v5699_v62 }
 0x847   : > { %9375 = vrcp.f32 %v5708_v14  ;;  %v5767_v11 = vmul.f32 1.442695, %v5760_v48 }
 0x848   : > { %9377 = vrcp.f32 %v5707_v27  ;;  %v5765_v45 = vmul.f32 1.442695, %v5759_v49  ;;  %v5689_v49 = vmul.f32 0.5, %v11359_v38 }
 0x849   : > { %9379 = vpow2.f32 %v5763_v32 }
 0x84a   : > { %9381 = vpow2.f32 %v5761_v60 }
 0x84b   : > { %9383 = vpow2.f32 %v5767_v11  ;;  %v5691_v11 = vmul.f32 0.5, %v11371_v4  ;;  %v11657_v4 = vld [vmem:[#allocation28_spill] sm:$0xff] }
 0x84c   : > { %9385 = vpow2.f32 %v5765_v45  ;;  %8446 = vmatprep.mubr.msk.f32.mxu0 %vm6021_vm2, %v11657_v4 }
 0x84d   : > { %v9372_v54 = vpop.eup %9371 }
 0x84e   : > { %v9374_v24 = vpop.eup %9373  ;;  %v5718_v44 = vmul.f32 1.0614054, %v9372_v54 }
 0x84f   : > { %v5717_v7 = vmul.f32 1.0614054, %v9374_v24 }
 0x850   : > { %v5722_v41 = vadd.f32 -1.4531521, %v5718_v44 }
 0x851   : > { %v9376_v58 = vpop.eup %9375  ;;  %v5721_v35 = vadd.f32 -1.4531521, %v5717_v7 }
 0x852   : > { %v9378_v31 = vpop.eup %9377  ;;  %v5726_v47 = vmul.f32 %v9372_v54, %v5722_v41  ;;  %v5720_v6 = vmul.f32 1.0614054, %v9376_v58 }
 0x853   : > { %v5725_v56 = vmul.f32 %v9374_v24, %v5721_v35  ;;  %v5719_v33 = vmul.f32 1.0614054, %v9378_v31  ;;  %v9380_v16 = vpop.eup %9379 }
 0x854   : > { %v5730_v28 = vadd.f32 1.4214138, %v5726_v47  ;;  %v5724_v15 = vadd.f32 -1.4531521, %v5720_v6  ;;  %v9382_v52 = vpop.eup %9381 }
 0x855   : > { %v5729_v29 = vadd.f32 1.4214138, %v5725_v56  ;;  %v5723_v57 = vadd.f32 -1.4531521, %v5719_v33  ;;  %v9384_v44 = vpop.eup %9383 }
 0x856   : > { %v5734_v61 = vmul.f32 %v9372_v54, %v5730_v28  ;;  %v5728_v1 = vmul.f32 %v9376_v58, %v5724_v15  ;;  %v9386_v7 = vpop.eup %9385 }
 0x857   : > { %v5733_v26 = vmul.f32 %v9374_v24, %v5729_v29  ;;  %v5727_v53 = vmul.f32 %v9378_v31, %v5723_v57 }
 0x858   : > { %v5738_v43 = vadd.f32 -0.28449672, %v5734_v61  ;;  %v5732_v20 = vadd.f32 1.4214138, %v5728_v1 }
 0x859   : > { %v5737_v39 = vadd.f32 -0.28449672, %v5733_v26  ;;  %v5731_v30 = vadd.f32 1.4214138, %v5727_v53 }
 0x85a   : > { %v5742_v8 = vmul.f32 %v9372_v54, %v5738_v43  ;;  %v5736_v19 = vmul.f32 %v9376_v58, %v5732_v20 }
 0x85b   : > { %v5741_v63 = vmul.f32 %v9374_v24, %v5737_v39  ;;  %v5735_v22 = vmul.f32 %v9378_v31, %v5731_v30 }
 0x85c   : > { %v5746_v37 = vadd.f32 0.2548296, %v5742_v8  ;;  %v5740_v34 = vadd.f32 -0.28449672, %v5736_v19 }
 0x85d   : > { %v5745_v50 = vadd.f32 0.2548296, %v5741_v63  ;;  %v5739_v12 = vadd.f32 -0.28449672, %v5735_v22 }
 0x85e   : > { %v5750_v23 = vmul.f32 %v9372_v54, %v5746_v37  ;;  %v5744_v46 = vmul.f32 %v9376_v58, %v5740_v34 }
 0x85f   : > { %v5749_v62 = vmul.f32 %v9374_v24, %v5745_v50  ;;  %v5743_v40 = vmul.f32 %v9378_v31, %v5739_v12 }
 0x860   : > { %v5770_v14 = vmul.f32 %v9380_v16, %v5750_v23  ;;  %v5748_v27 = vadd.f32 0.2548296, %v5744_v46 }
 0x861   : > { %v5769_v17 = vmul.f32 %v9382_v52, %v5749_v62  ;;  %v5747_v42 = vadd.f32 0.2548296, %v5743_v40 }
 0x862   : > { %v5774_v25 = vsub.f32 1.0, %v5770_v14  ;;  %v5752_v51 = vmul.f32 %v9376_v58, %v5748_v27 }
 0x863   : > { %v5773_v21 = vsub.f32 1.0, %v5769_v17  ;;  %v5751_v0 = vmul.f32 %v9378_v31, %v5747_v42  ;;  %v5690_v31 = vmul.f32 0.5, %v11357_v2  ;;  %v5692_v2 = vmul.f32 0.5, %v11368_v18  ;;  %v7405_v18 = vld [vmem:[%s11572_s12] ss:$0 sm:$0xff] }
 0x864   : > { %v5782_v41 = vsub.f32 0.0, %v5774_v25  ;;  %v5772_v32 = vmul.f32 %v9384_v44, %v5752_v51 }
 0x865   : > { %v5781_v54 = vsub.f32 0.0, %v5773_v21  ;;  %v5771_v35 = vmul.f32 %v9386_v7, %v5751_v0 }
 0x866   : > { %v5786_v48 = vsel %vm5778_vm13, %v5774_v25, %v5782_v41  ;;  %v5776_v24 = vsub.f32 1.0, %v5772_v32 }
 0x867   : > { %v5790_v47 = vadd.f32 1.0, %v5786_v48  ;;  %v5785_v60 = vsel %vm5777_vm14, %v5773_v21, %v5781_v54  ;;  %v5775_v6 = vsub.f32 1.0, %v5771_v35 }
 0x868   : > { %v5789_v58 = vadd.f32 1.0, %v5785_v60  ;;  %v5784_v56 = vsub.f32 0.0, %v5776_v24 }
 0x869   : > { %v5783_v33 = vsub.f32 0.0, %v5775_v6  ;;  %v11389_v15 = vmul.f32 %v5790_v47, %v5690_v31 }
 0x86a   : > { %v11386_v28 = vmul.f32 %v5789_v58, %v5689_v49  ;;  %v5788_v59 = vsel %vm5780_vm15, %v5776_v24, %v5784_v56 }
 0x86b   : > { %v5792_v10 = vadd.f32 1.0, %v5788_v59  ;;  %v5787_v29 = vsel %vm5779_vm1, %v5775_v6, %v5783_v33 }
 0x86c   : > { %v5791_v57 = vadd.f32 1.0, %v5787_v29  ;;  %8432 = vmatprep.mubr.msk.f32.mxu1 %vm644_vm0, %v11386_v28 }
 0x86d   : > { %8433 = vmatmul.mubr.msk.f32.vlgmr.msra.gmra.mrb[44].mxu1 %vm644_vm0, %v11389_v15  ;;  %v11399_v9 = vmul.f32 %v5792_v10, %v5692_v2 }
 0x86e   : > { %v11397_v38 = vmul.f32 %v5791_v57, %v5691_v11 }
 0x870   : > { %8435 = vmatprep.mubr.msk.f32.mxu1 %vm644_vm0, %v11397_v38 }
 0x871   : > { %8436 = vmatmul.mubr.msk.f32.gmra.mrb[46].mxu1 %vm644_vm0, %v11399_v9 }
 0x872   : > { %8457 = vmatprep.mubr.msk.f32.mxu1 %vm6021_vm2, %v11247_v3 }
 0x940   : > { %v8434_v5 = vpop.f32.mrb[44].mxu1 }
 0x941   : > { %v11412_v61 = vadd.f32 %v8434_v5, %v7405_v18  ;;  %v5890_v1 = vpop.f32.mrb[45].mxu1 }
 0x942   : > { %v11414_v45 = vadd.f32 %v7405_v18, %v5890_v1 }
 0x943   : > { %v11417_v26 = vmul.f32 0.70710677, %v11412_v61 }
 0x944   : > { %v11420_v53 = vmul.f32 0.70710677, %v11414_v45  ;;  %v8437_v43 = vpop.f32.mrb[46].mxu1 }
 0x945   : > { %v5918_v20 = vand.u32 2147483647, %v11417_v26  ;;  %v11423_v39 = vadd.f32 %v8437_v43, %v7405_v18  ;;  %v5900_v30 = vpop.f32.mrb[47].mxu1  ;;  %vm5998_vm3 = vcmp.ge.f32.partialorder %v11417_v26, 0.0 }
 0x946   : > { %v5917_v8 = vand.u32 2147483647, %v11420_v53  ;;  %v11426_v19 = vadd.f32 %v7405_v18, %v5900_v30  ;;  %vm5997_vm4 = vcmp.ge.f32.partialorder %v11420_v53, 0.0 }
 0x947   : > { %v5922_v63 = vmul.f32 0.3275911, %v5918_v20  ;;  %v11429_v22 = vmul.f32 0.70710677, %v11423_v39  ;;  %v5974_v14 = vsub.f32 0.0, %v5918_v20 }
 0x948   : > { %v5921_v37 = vmul.f32 0.3275911, %v5917_v8  ;;  %v11432_v34 = vmul.f32 0.70710677, %v11426_v19  ;;  %v5973_v27 = vsub.f32 0.0, %v5917_v8 }
 0x949   : > { %v5926_v50 = vadd.f32 1.0, %v5922_v63  ;;  %v5920_v12 = vand.u32 2147483647, %v11429_v22  ;;  %v5978_v42 = vmul.f32 %v5974_v14, %v5918_v20  ;;  %vm6000_vm5 = vcmp.ge.f32.partialorder %v11429_v22, 0.0 }
 0x94a   : > { %v5925_v23 = vadd.f32 1.0, %v5921_v37  ;;  %v5919_v46 = vand.u32 2147483647, %v11432_v34  ;;  %v5977_v21 = vmul.f32 %v5973_v27, %v5917_v8  ;;  %vm5999_vm6 = vcmp.ge.f32.partialorder %v11432_v34, 0.0 }
 0x94b   : > { %9387 = vrcp.f32 %v5926_v50  ;;  %v5924_v16 = vmul.f32 0.3275911, %v5920_v12  ;;  %v5976_v25 = vsub.f32 0.0, %v5920_v12  ;;  %v5983_v54 = vmul.f32 1.442695, %v5978_v42 }
 0x94c   : > { %9389 = vrcp.f32 %v5925_v23  ;;  %v5923_v62 = vmul.f32 0.3275911, %v5919_v46  ;;  %v5975_v0 = vsub.f32 0.0, %v5919_v46  ;;  %v5981_v60 = vmul.f32 1.442695, %v5977_v21 }
 0x94d   : > { %v5928_v40 = vadd.f32 1.0, %v5924_v16  ;;  %v5980_v48 = vmul.f32 %v5976_v25, %v5920_v12 }
 0x94e   : > { %v5927_v52 = vadd.f32 1.0, %v5923_v62  ;;  %v5979_v49 = vmul.f32 %v5975_v0, %v5919_v46 }
 0x94f   : > { %9391 = vrcp.f32 %v5928_v40  ;;  %v5987_v10 = vmul.f32 1.442695, %v5980_v48 }
 0x950   : > { %9393 = vrcp.f32 %v5927_v52  ;;  %v5985_v2 = vmul.f32 1.442695, %v5979_v49 }
 0x951   : > { %9395 = vpow2.f32 %v5983_v54 }
 0x952   : > { %9397 = vpow2.f32 %v5981_v60 }
 0x953   : > { %9399 = vpow2.f32 %v5987_v10 }
 0x954   : > { %9401 = vpow2.f32 %v5985_v2  ;;  %v5912_v2 = vmul.f32 0.5, %v11423_v39 }
 0x955   : > { %v9388_v17 = vpop.eup %9387 }
 0x956   : > { %v9390_v51 = vpop.eup %9389  ;;  %v5938_v44 = vmul.f32 1.0614054, %v9388_v17 }
 0x957   : > { %v5937_v7 = vmul.f32 1.0614054, %v9390_v51 }
 0x958   : > { %v5942_v41 = vadd.f32 -1.4531521, %v5938_v44 }
 0x959   : > { %v9392_v32 = vpop.eup %9391  ;;  %v5941_v35 = vadd.f32 -1.4531521, %v5937_v7 }
 0x95a   : > { %v9394_v24 = vpop.eup %9393  ;;  %v5946_v47 = vmul.f32 %v9388_v17, %v5942_v41  ;;  %v5940_v6 = vmul.f32 1.0614054, %v9392_v32 }
 0x95b   : > { %v5945_v58 = vmul.f32 %v9390_v51, %v5941_v35  ;;  %v5939_v56 = vmul.f32 1.0614054, %v9394_v24  ;;  %v9396_v52 = vpop.eup %9395 }
 0x95c   : > { %v5950_v31 = vadd.f32 1.4214138, %v5946_v47  ;;  %v5944_v33 = vadd.f32 -1.4531521, %v5940_v6  ;;  %v9398_v42 = vpop.eup %9397 }
 0x95d   : > { %v5949_v59 = vadd.f32 1.4214138, %v5945_v58  ;;  %v5943_v29 = vadd.f32 -1.4531521, %v5939_v56  ;;  %v9400_v54 = vpop.eup %9399  ;;  %v5910_v56 = vmul.f32 0.5, %v11412_v61 }
 0x95e   : > { %v5954_v11 = vmul.f32 %v9388_v17, %v5950_v31  ;;  %v5948_v57 = vmul.f32 %v9392_v32, %v5944_v33  ;;  %v9402_v47 = vpop.eup %9401 }
 0x95f   : > { %v5953_v18 = vmul.f32 %v9390_v51, %v5949_v59  ;;  %v5947_v5 = vmul.f32 %v9394_v24, %v5943_v29 }
 0x960   : > { %v5958_v1 = vadd.f32 -0.28449672, %v5954_v11  ;;  %v5952_v43 = vadd.f32 1.4214138, %v5948_v57 }
 0x961   : > { %v5957_v20 = vadd.f32 -0.28449672, %v5953_v18  ;;  %v5951_v30 = vadd.f32 1.4214138, %v5947_v5 }
 0x962   : > { %v5962_v8 = vmul.f32 %v9388_v17, %v5958_v1  ;;  %v5956_v63 = vmul.f32 %v9392_v32, %v5952_v43 }
 0x963   : > { %v5961_v37 = vmul.f32 %v9390_v51, %v5957_v20  ;;  %v5955_v50 = vmul.f32 %v9394_v24, %v5951_v30 }
 0x964   : > { %v5966_v12 = vadd.f32 0.2548296, %v5962_v8  ;;  %v5960_v23 = vadd.f32 -0.28449672, %v5956_v63  ;;  %v6197_v8 = vld [vmem:[#allocation12] sm:$0xff]  ;;  %v6198_v63 = vld [vmem:[#allocation12 + $0x8] sm:$0xff] }
 0x965   : > { %v5965_v46 = vadd.f32 0.2548296, %v5961_v37  ;;  %v5959_v16 = vadd.f32 -0.28449672, %v5955_v50  ;;  %v8844_v39 = vpack.c.bf16 %v6198_v63, %v6197_v8  ;;  %v6202_v37 = vld [vmem:[#allocation12 + $0x28] sm:$0xff]  ;;  %v6490_v8 = vld [vmem:[#allocation12 + $0xf8] sm:$0xff] }
 0x966   : > { %v5970_v62 = vmul.f32 %v9388_v17, %v5966_v12  ;;  %v5964_v40 = vmul.f32 %v9392_v32, %v5960_v23  ;;  %v6203_v12 = vld [vmem:[#allocation12 + $0x30] sm:$0xff]  ;;  %v6204_v23 = vld [vmem:[#allocation12 + $0x38] sm:$0xff] }
 0x967   : > { %v5969_v14 = vmul.f32 %v9390_v51, %v5965_v46  ;;  %v5963_v27 = vmul.f32 %v9394_v24, %v5959_v16  ;;  %v8856_v46 = vpack.c.bf16 %v6204_v23, %v6203_v12  ;;  %v6295_v16 = vld [vmem:[#allocation12 + $0x40] sm:$0xff] }
 0x968   : > { %v5990_v25 = vmul.f32 %v9396_v52, %v5970_v62  ;;  %v5968_v44 = vadd.f32 0.2548296, %v5964_v40 }
 0x969   : > { %v5989_v21 = vmul.f32 %v9398_v42, %v5969_v14  ;;  %v5967_v0 = vadd.f32 0.2548296, %v5963_v27 }
 0x96a   : > { %v5994_v7 = vsub.f32 1.0, %v5990_v25  ;;  %v5972_v41 = vmul.f32 %v9392_v32, %v5968_v44  ;;  %v5909_v32 = vmul.f32 0.5, %v11414_v45  ;;  %v5911_v45 = vmul.f32 0.5, %v11426_v19  ;;  %v6201_v19 = vld [vmem:[#allocation12 + $0x20] sm:$0xff]  ;;  %v6297_v25 = vld [vmem:[#allocation12 + $0x50] sm:$0xff]  ;;  %v6298_v44 = vld [vmem:[#allocation12 + $0x58] sm:$0xff] }
 0x96b   : > { %v5993_v35 = vsub.f32 1.0, %v5989_v21  ;;  %v5971_v48 = vmul.f32 %v9394_v24, %v5967_v0  ;;  %v8852_v50 = vpack.c.bf16 %v6202_v37, %v6201_v19  ;;  %v6581_v37 = vld [vmem:[#allocation12 + $0x120] sm:$0xff] }
 0x96c   : > { %v6002_v60 = vsub.f32 0.0, %v5994_v7  ;;  %v5992_v6 = vmul.f32 %v9400_v54, %v5972_v41  ;;  %v6299_v41 = vld [vmem:[#allocation12 + $0x60] sm:$0xff]  ;;  %v6300_v54 = vld [vmem:[#allocation12 + $0x68] sm:$0xff] }
 0x96d   : > { %v6001_v17 = vsub.f32 0.0, %v5993_v35  ;;  %v5991_v49 = vmul.f32 %v9402_v47, %v5971_v48  ;;  %v8868_v48 = vpack.c.bf16 %v6300_v54, %v6299_v41  ;;  %v6301_v47 = vld [vmem:[#allocation12 + $0x70] sm:$0xff] }
 0x96e   : > { %v6006_v58 = vsel %vm5998_vm3, %v5994_v7, %v6002_v60  ;;  %v5996_v51 = vsub.f32 1.0, %v5992_v6  ;;  %v8864_v7 = vpack.c.bf16 %v6298_v44, %v6297_v25  ;;  %v6302_v60 = vld [vmem:[#allocation12 + $0x78] sm:$0xff]  ;;  %v7414_v54 = vld [vmem:[%s11659_s22] ss:$0 sm:$0xff]  ;;  %s9593_s22 = scalar_lea.vmem %s9592_s1, 256 }
 0x96f   : > { %v6010_v31 = vadd.f32 1.0, %v6006_v58  ;;  %v6005_v33 = vsel %vm5997_vm4, %v5993_v35, %v6001_v17  ;;  %v5995_v59 = vsub.f32 1.0, %v5991_v49  ;;  %v8872_v6 = vpack.c.bf16 %v6302_v60, %v6301_v47  ;;  %v6389_v17 = vld [vmem:[#allocation12 + $0x80] sm:$0xff]  ;;  %v6390_v49 = vld [vmem:[#allocation12 + $0x88] sm:$0xff]  ;;  %v6727_v25 = vld [vmem:[%s11658_s19 + $0x20] sm:$0xff]  ;;  %p9595_p0 = scmp.lt.s32.totalorder %s9593_s22, %s9587_s25 }
 0x970   : > { %v6009_v10 = vadd.f32 1.0, %v6005_v33  ;;  %v6004_v24 = vsub.f32 0.0, %v5996_v51  ;;  %v8876_v58 = vpack.c.bf16 %v6390_v49, %v6389_v17  ;;  %v6728_v44 = vld [vmem:[%s11658_s19 + $0x28] sm:$0xff] }
 0x971   : > { %v6014_v29 = vmul.f32 %v6010_v31, %v5910_v56  ;;  %v6003_v11 = vsub.f32 0.0, %v5995_v59  ;;  %v6392_v56 = vld [vmem:[#allocation12 + $0x98] sm:$0xff]  ;;  %p9596_p10 = por %p9595_p0, %p9594_p5 }
 0x972   : > { %v6013_v26 = vmul.f32 %v6009_v10, %v5909_v32  ;;  %v6008_v57 = vsel %vm6000_vm5, %v5996_v51, %v6004_v24  ;;  %v6391_v51 = vld [vmem:[#allocation12 + $0x90] sm:$0xff]  ;;  %v6394_v32 = vld [vmem:[#allocation12 + $0xa8] sm:$0xff] }
 0x973   : > { %v6018_v53 = vadd.f32 %v6014_v29, %v11389_v15  ;;  %v6012_v61 = vadd.f32 1.0, %v6008_v57  ;;  %v6007_v18 = vsel %vm5999_vm6, %v5995_v59, %v6003_v11  ;;  %v8880_v31 = vpack.c.bf16 %v6392_v56, %v6391_v51  ;;  %v6393_v59 = vld [vmem:[#allocation12 + $0xa0] sm:$0xff]  ;;  %v6395_v29 = vld [vmem:[#allocation12 + $0xb0] sm:$0xff]  ;;  %v6396_v11 = vld [vmem:[#allocation12 + $0xb8] sm:$0xff]  ;;  %p9597_p2 = pnand %p9596_p10, %p9590_p9 }
 0x974   : > { %v6017_v5 = vadd.f32 %v6013_v26, %v11386_v28  ;;  %v6011_v1 = vadd.f32 1.0, %v6007_v18  ;;  %v6199_v28 = vld [vmem:[#allocation12 + $0x10] sm:$0xff]  ;;  %v8884_v24 = vpack.c.bf16 %v6394_v32, %v6393_v59  ;;  %v8888_v26 = vpack.c.bf16 %v6396_v11, %v6395_v29  ;;  %v6483_v57 = vld [vmem:[#allocation12 + $0xc0] sm:$0xff]  ;;  %v6486_v18 = vld [vmem:[#allocation12 + $0xd8] sm:$0xff] }
 0x975   : > { %v6016_v43 = vmul.f32 %v6012_v61, %v5912_v2  ;;  %v6485_v61 = vld [vmem:[#allocation12 + $0xd0] sm:$0xff] }
 0x976   : > { %v6015_v20 = vmul.f32 %v6011_v1, %v5911_v45  ;;  %v8828_v30 = vpack.c.bf16 %v6018_v53, %v6017_v5  ;;  %v6484_v53 = vld [vmem:[#allocation12 + $0xc8] sm:$0xff]  ;;  %v8896_v5 = vpack.c.bf16 %v6486_v18, %v6485_v61  ;;  %v6487_v1 = vld [vmem:[#allocation12 + $0xe0] sm:$0xff] }
 0x977   : > { %v6020_v22 = vadd.f32 %v6016_v43, %v11399_v9  ;;  %v8892_v2 = vpack.c.bf16 %v6484_v53, %v6483_v57  ;;  %v6488_v43 = vld [vmem:[#allocation12 + $0xe8] sm:$0xff] }
 0x978   : > { %v6019_v34 = vadd.f32 %v6015_v20, %v11397_v38  ;;  %8829 = vmatprep.subr.bf16.mxu0 %v8828_v30  ;;  %8837 = vmatprep.subr.bf16.mxu1 %v8828_v30  ;;  %v6200_v38 = vld [vmem:[#allocation12 + $0x18] sm:$0xff] }
 0x979   : > { %8831 = vmatpush3.bf16.msra.mxu0 %v8828_v30  ;;  %8839 = vmatpush3.bf16.msra.mxu1 %v8828_v30  ;;  %v8848_v9 = vpack.c.bf16 %v6200_v38, %v6199_v28  ;;  %v8900_v30 = vpack.c.bf16 %v6488_v43, %v6487_v1  ;;  %v6579_v28 = vld [vmem:[#allocation12 + $0x110] sm:$0xff]  ;;  %v6580_v38 = vld [vmem:[#allocation12 + $0x118] sm:$0xff] }
 0x97a   : > { %v8832_v15 = vpack.c.bf16 %v6020_v22, %v6019_v34  ;;  %v6489_v22 = vld [vmem:[#allocation12 + $0xf0] sm:$0xff]  ;;  %v6577_v34 = vld [vmem:[#allocation12 + $0x100] sm:$0xff] }
 0x97b   : > { %v8904_v63 = vpack.c.bf16 %v6490_v8, %v6489_v22 }
 0x97c   : > { %8833 = vmatprep.subr.bf16.mxu0 %v8832_v15  ;;  %8841 = vmatprep.subr.bf16.mxu1 %v8832_v15 }
 0x97d   : > { %8835 = vmatpush3.bf16.msra.mxu0 %v8832_v15  ;;  %8843 = vmatpush3.bf16.msra.mxu1 %v8832_v15  ;;  %v6578_v15 = vld [vmem:[#allocation12 + $0x108] sm:$0xff] }
 0x97e   : > { %8845 = vmatprep.subr.bf16.mxu0 %v8844_v39 }
 0x980   : > { %8447 = vmatmul.mubr.msk.f32.vlgmr.msra.gmra.mrb[8].mxu0 %vm6021_vm2, %v11232_v13  ;;  %8458 = vmatmul.mubr.msk.f32.vlgmr.msra.gmra.mrb[48].mxu1 %vm6021_vm2, %v11256_v55  ;;  %v6296_v13 = vld [vmem:[#allocation12 + $0x48] sm:$0xff] }
 0x981   : > { %8847 = vmatpush3.bf16.msra.mxu0 %v8844_v39  ;;  %v8860_v62 = vpack.c.bf16 %v6296_v13, %v6295_v16  ;;  %v8908_v39 = vpack.c.bf16 %v6578_v15, %v6577_v34  ;;  %v6584_v16 = vld [vmem:[#allocation12 + $0x138] sm:$0xff] }
 0x982   : > { %8849 = vmatprep.subr.bf16.mxu0 %v8848_v9 }
 0x985   : > { %8851 = vmatpush3.bf16.msra.mxu0 %v8848_v9  ;;  %v8912_v9 = vpack.c.bf16 %v6580_v38, %v6579_v28 }
 0x986   : > { %8853 = vmatprep.subr.bf16.mxu0 %v8852_v50 }
 0x989   : > { %8855 = vmatpush3.bf16.msra.mxu0 %v8852_v50  ;;  %v6582_v50 = vld [vmem:[#allocation12 + $0x128] sm:$0xff] }
 0x98a   : > { %8857 = vmatprep.subr.bf16.mxu0 %v8856_v46  ;;  %v8916_v23 = vpack.c.bf16 %v6582_v50, %v6581_v37 }
 0x98d   : > { %8859 = vmatpush3.bf16.msra.mxu0 %v8856_v46  ;;  %v6583_v46 = vld [vmem:[#allocation12 + $0x130] sm:$0xff] }
 0x98e   : > { %8861 = vmatprep.subr.bf16.mxu0 %v8860_v62  ;;  %v8920_v13 = vpack.c.bf16 %v6584_v16, %v6583_v46 }
 0xa53   : > { %v8448_v55 = vpop.f32.mrb[8].mxu0  ;;  %v8459_v40 = vpop.f32.mrb[48].mxu1 }
 0xa54   : > { %v6181_v52 = vmax.f32 %v8448_v55, %v8459_v40  ;;  %v6092_v14 = vpop.f32.mrb[9].mxu0  ;;  %v6171_v27 = vpop.f32.mrb[49].mxu1  ;;  %v6723_v55 = vld [vmem:[%s11658_s19] sm:$0xff]  ;;  %v6724_v40 = vld [vmem:[%s11658_s19 + $0x8] sm:$0xff] }
 0xa55   : > { %v6180_v42 = vmax.f32 %v6092_v14, %v6171_v27  ;;  %v6725_v14 = vld [vmem:[%s11658_s19 + $0x10] sm:$0xff]  ;;  %v6726_v27 = vld [vmem:[%s11658_s19 + $0x18] sm:$0xff] }
 0xa56   : > { %6194 = vst.msk [vmem:[#allocation2 + $0x10] sm:$0xff] %vm644_vm0, %v6181_v52  ;;  %v8924_v52 = vpack.c.bf16 %v6724_v40, %v6723_v55 }
 0xa57   : > { %6193 = vst.msk [vmem:[#allocation2 + $0x8] sm:$0xff] %vm644_vm0, %v6180_v42  ;;  %v8928_v42 = vpack.c.bf16 %v6726_v27, %v6725_v14 }
 0xa58   : > { %8925 = vmatprep.subr.bf16.mxu1 %v8924_v52 }
 0xa59   : > { %8927 = vmatpush3.bf16.msra.mxu1 %v8924_v52 }
 0xa5a   : > { %8929 = vmatprep.subr.bf16.mxu1 %v8928_v42 }
 0xa5d   : > { %v6387_v45 = vld [vmem:[#allocation2 + $0x10] sm:$0xff]  ;;  %8931 = vmatpush3.bf16.msra.mxu1 %v8928_v42 }
 0xa5e   : > { %v6195_v21 = vld [vmem:[#allocation2 + $0x6] sm:$0xff]  ;;  %v6196_v0 = vld [vmem:[#allocation2 + $0xe] sm:$0xff] }
 0xa5f   : > { %8476 = vmatprep.mubr.msk.f32.mxu0 %vm644_vm0, %v6195_v21  ;;  %v6292_v35 = vld [vmem:[#allocation2 + $0x7] sm:$0xff]  ;;  %v6293_v33 = vld [vmem:[#allocation2 + $0xf] sm:$0xff]  ;;  %v8932_v21 = vpack.c.bf16 %v6728_v44, %v6727_v25  ;;  %v9678_v25 = vmov 0.0|0.0   ;;  %v7425_v44 = vld [vmem:[%s11660_s17] ss:$0 sm:$0xff] }
 0xa60   : > { %8477 = vmatmul.mubr.msk.f32.vlgmr.msra.gmra.mrb[10].mxu0 %vm644_vm0, %v6196_v0  ;;  %v6386_v10 = vld [vmem:[#allocation2 + $0x8] sm:$0xff]  ;;  %v6481_v19 = vld [vmem:[#allocation2 + $0x11] sm:$0xff] }
 0xa61   : > { %8863 = vmatpush3.bf16.msra.mxu0 %v8860_v62  ;;  %8495 = vmatprep.mubr.msk.f32.mxu0 %vm644_vm0, %v6292_v35  ;;  %v6480_v20 = vld [vmem:[#allocation2 + $0x9] sm:$0xff]  ;;  %v6575_v62 = vld [vmem:[#allocation2 + $0x12] sm:$0xff] }
 0xa62   : > { %8865 = vmatprep.subr.bf16.mxu0 %v8864_v7  ;;  %v6574_v12 = vld [vmem:[#allocation2 + $0xa] sm:$0xff]  ;;  %8933 = vmatprep.subr.bf16.mxu1 %v8932_v21 }
 0xa63   : > { %v6729_v0 = vld [vmem:[%s11658_s19 + $0x30] sm:$0xff]  ;;  %8935 = vmatpush3.bf16.msra.mxu1 %v8932_v21 }
 0xa65   : > { %8867 = vmatpush3.bf16.msra.mxu0 %v8864_v7  ;;  %v6730_v7 = vld [vmem:[%s11658_s19 + $0x38] sm:$0xff] }
 0xa66   : > { %8869 = vmatprep.subr.bf16.mxu0 %v8868_v48  ;;  %v8936_v41 = vpack.c.bf16 %v6730_v7, %v6729_v0 }
 0xa68   : > { %8937 = vmatprep.subr.bf16.mxu1 %v8936_v41 }
 0xa69   : > { %8871 = vmatpush3.bf16.msra.mxu0 %v8868_v48  ;;  %8939 = vmatpush3.bf16.msra.mxu1 %v8936_v41 }
 0xa6a   : > { %8873 = vmatprep.subr.bf16.mxu0 %v8872_v6  ;;  %8940 = vmatprep.subr.bf16.mxu1 %v9678_v25 }
 0xa6d   : > { %8875 = vmatpush3.bf16.msra.mxu0 %v8872_v6 }
 0xa6e   : > { %8877 = vmatprep.subr.bf16.mxu0 %v8876_v58 }
 0xa70   : > { %8496 = vmatmul.mubr.msk.f32.vlgmr.msra.gmra.mrb[10].mxu0 %vm644_vm0, %v6293_v33 }
 0xa71   : > { %8879 = vmatpush3.bf16.msra.mxu0 %v8876_v58  ;;  %8514 = vmatprep.mubr.msk.f32.mxu0 %vm644_vm0, %v6386_v10 }
 0xa72   : > { %8881 = vmatprep.subr.bf16.mxu0 %v8880_v31 }
 0xa75   : > { %8883 = vmatpush3.bf16.msra.mxu0 %v8880_v31 }
 0xa76   : > { %8885 = vmatprep.subr.bf16.mxu0 %v8884_v24 }
 0xa79   : > { %8887 = vmatpush3.bf16.msra.mxu0 %v8884_v24 }
 0xa7a   : > { %8889 = vmatprep.subr.bf16.mxu0 %v8888_v26 }
 0xa7d   : > { %8891 = vmatpush3.bf16.msra.mxu0 %v8888_v26 }
 0xa7e   : > { %8893 = vmatprep.subr.bf16.mxu0 %v8892_v2 }
 0xa80   : > { %8515 = vmatmul.mubr.msk.f32.vlgmr.msra.gmra.mrb[10].mxu0 %vm644_vm0, %v6387_v45 }
 0xa81   : > { %8895 = vmatpush3.bf16.msra.mxu0 %v8892_v2  ;;  %8533 = vmatprep.mubr.msk.f32.mxu0 %vm644_vm0, %v6480_v20 }
 0xa82   : > { %8897 = vmatprep.subr.bf16.mxu0 %v8896_v5 }
 0xa85   : > { %8899 = vmatpush3.bf16.msra.mxu0 %v8896_v5 }
 0xa86   : > { %8901 = vmatprep.subr.bf16.mxu0 %v8900_v30 }
 0xa89   : > { %8903 = vmatpush3.bf16.msra.mxu0 %v8900_v30 }
 0xa8a   : > { %8905 = vmatprep.subr.bf16.mxu0 %v8904_v63 }
 0xa8d   : > { %8907 = vmatpush3.bf16.msra.mxu0 %v8904_v63 }
 0xa8e   : > { %8909 = vmatprep.subr.bf16.mxu0 %v8908_v39 }
 0xa90   : > { %8534 = vmatmul.mubr.msk.f32.vlgmr.msra.gmra.mrb[10].mxu0 %vm644_vm0, %v6481_v19 }
 0xa91   : > { %8911 = vmatpush3.bf16.msra.mxu0 %v8908_v39  ;;  %8552 = vmatprep.mubr.msk.f32.mxu0 %vm644_vm0, %v6574_v12 }
 0xa92   : > { %8913 = vmatprep.subr.bf16.mxu0 %v8912_v9 }
 0xa95   : > { %8915 = vmatpush3.bf16.msra.mxu0 %v8912_v9 }
 0xa96   : > { %8917 = vmatprep.subr.bf16.mxu0 %v8916_v23 }
 0xa99   : > { %8919 = vmatpush3.bf16.msra.mxu0 %v8916_v23 }
 0xa9a   : > { %8921 = vmatprep.subr.bf16.mxu0 %v8920_v13 }
 0xa9d   : > { %8923 = vmatpush3.bf16.msra.mxu0 %v8920_v13 }
 0xaa0   : > { %8553 = vmatmul.mubr.msk.f32.vlgmr.msra.gmra.mrb[10].mxu0 %vm644_vm0, %v6575_v62 }
 0xb73   : > { %v8554_v35 = vpop.f32.mrb[10].mxu0 }
 0xb74   : > { %v8974_v48 = vadd.f32 %v8554_v35, %v7414_v54  ;;  %v6657_v47 = vpop.f32.mrb[11].mxu0 }
 0xb75   : > { %v8975_v60 = vadd.f32 %v7414_v54, %v6657_v47 }
 0xb76   : > { %v6671_v6 = vmul.f32 0.70710677, %v8974_v48  ;;  %v6669_v14 = vmul.f32 0.5, %v8974_v48 }
 0xb77   : > { %v6670_v17 = vmul.f32 0.70710677, %v8975_v60  ;;  %v6668_v40 = vmul.f32 0.5, %v8975_v60 }
 0xb78   : > { %v6673_v49 = vand.u32 2147483647, %v6671_v6  ;;  %vm6713_vm7 = vcmp.ge.f32.partialorder %v6671_v6, 0.0 }
 0xb79   : > { %v6672_v58 = vand.u32 2147483647, %v6670_v17  ;;  %vm6712_vm8 = vcmp.ge.f32.partialorder %v6670_v17, 0.0 }
 0xb7a   : > { %v6675_v51 = vmul.f32 0.3275911, %v6673_v49  ;;  %v6701_v59 = vsub.f32 0.0, %v6673_v49 }
 0xb7b   : > { %v6674_v56 = vmul.f32 0.3275911, %v6672_v58  ;;  %v6700_v32 = vsub.f32 0.0, %v6672_v58 }
 0xb7c   : > { %v6677_v31 = vadd.f32 1.0, %v6675_v51  ;;  %v6703_v24 = vmul.f32 %v6701_v59, %v6673_v49 }
 0xb7d   : > { %v6676_v33 = vadd.f32 1.0, %v6674_v56  ;;  %v6702_v26 = vmul.f32 %v6700_v32, %v6672_v58 }
 0xb7e   : > { %9403 = vrcp.f32 %v6677_v31  ;;  %v6706_v2 = vmul.f32 1.442695, %v6703_v24 }
 0xb7f   : > { %9405 = vrcp.f32 %v6676_v33  ;;  %v6704_v5 = vmul.f32 1.442695, %v6702_v26 }
 0xb80   : > { %9407 = vpow2.f32 %v6706_v2 }
 0xb81   : > { %9409 = vpow2.f32 %v6704_v5 }
 0xb88   : > { %v9404_v10 = vpop.eup %9403 }
 0xb89   : > { %v9406_v29 = vpop.eup %9405  ;;  %v6683_v11 = vmul.f32 1.0614054, %v9404_v10 }
 0xb8a   : > { %v6682_v57 = vmul.f32 1.0614054, %v9406_v29  ;;  %v9408_v38 = vpop.eup %9407 }
 0xb8b   : > { %v6685_v53 = vadd.f32 -1.4531521, %v6683_v11  ;;  %v9410_v19 = vpop.eup %9409 }
 0xb8c   : > { %v6684_v61 = vadd.f32 -1.4531521, %v6682_v57 }
 0xb8d   : > { %v6687_v18 = vmul.f32 %v9404_v10, %v6685_v53 }
 0xb8e   : > { %v6686_v45 = vmul.f32 %v9406_v29, %v6684_v61 }
 0xb8f   : > { %v6689_v1 = vadd.f32 1.4214138, %v6687_v18 }
 0xb90   : > { %v6688_v43 = vadd.f32 1.4214138, %v6686_v45 }
 0xb91   : > { %v6691_v20 = vmul.f32 %v9404_v10, %v6689_v1 }
 0xb92   : > { %v6690_v30 = vmul.f32 %v9406_v29, %v6688_v43 }
 0xb93   : > { %v6693_v22 = vadd.f32 -0.28449672, %v6691_v20 }
 0xb94   : > { %v6692_v8 = vadd.f32 -0.28449672, %v6690_v30 }
 0xb95   : > { %v6695_v63 = vmul.f32 %v9404_v10, %v6693_v22 }
 0xb96   : > { %v6694_v34 = vmul.f32 %v9406_v29, %v6692_v8 }
 0xb97   : > { %v6697_v15 = vadd.f32 0.2548296, %v6695_v63 }
 0xb98   : > { %v6696_v39 = vadd.f32 0.2548296, %v6694_v34 }
 0xb99   : > { %v6699_v28 = vmul.f32 %v9404_v10, %v6697_v15 }
 0xb9a   : > { %v6698_v9 = vmul.f32 %v9406_v29, %v6696_v39 }
 0xb9b   : > { %v6709_v37 = vmul.f32 %v9408_v38, %v6699_v28 }
 0xb9c   : > { %v6708_v50 = vmul.f32 %v9410_v19, %v6698_v9 }
 0xb9d   : > { %v6711_v12 = vsub.f32 1.0, %v6709_v37 }
 0xb9e   : > { %v6710_v23 = vsub.f32 1.0, %v6708_v50 }
 0xb9f   : > { %v6715_v46 = vsub.f32 0.0, %v6711_v12 }
 0xba0   : > { %v6714_v16 = vsub.f32 0.0, %v6710_v23 }
 0xba1   : > { %v6717_v13 = vsel %vm6713_vm7, %v6711_v12, %v6715_v46 }
 0xba2   : > { %v6719_v62 = vadd.f32 1.0, %v6717_v13  ;;  %v6716_v55 = vsel %vm6712_vm8, %v6710_v23, %v6714_v16 }
 0xba3   : > { %v6718_v52 = vadd.f32 1.0, %v6716_v55 }
 0xba4   : > { %v11493_v42 = vmul.f32 %v6719_v62, %v6669_v14 }
 0xba5   : > { %v11491_v27 = vmul.f32 %v6718_v52, %v6668_v40 }
 0xba7   : > { %8571 = vmatprep.mubr.msk.f32.mxu1 %vm644_vm0, %v11491_v27 }
 0xba8   : > { %8572 = vmatmul.mubr.msk.f32.vlgmr.msra.gmra.mrb[50].mxu1 %vm644_vm0, %v11493_v42 }
 0xba9   : > { %8578 = vmatprep.mubr.msk.f32.mxu1 %vm9679_vm9, %v11644_v36 }
 0xc7b   : > { %v8573_v21 = vpop.f32.mrb[50].mxu1 }
 0xc7c   : > { %v6815_v0 = vadd.f32 %v8573_v21, %v7425_v44  ;;  %v6809_v7 = vpop.f32.mrb[51].mxu1 }
 0xc7d   : > { %v6810_v41 = vadd.f32 %v7425_v44, %v6809_v7 }
 0xc7e   : > { %v6821_v54 = vmul.f32 0.70710677, %v6815_v0  ;;  %v6819_v12 = vmul.f32 0.5, %v6815_v0 }
 0xc7f   : > { %v6820_v35 = vmul.f32 0.70710677, %v6810_v41  ;;  %v6818_v16 = vmul.f32 0.5, %v6810_v41 }
 0xc80   : > { %v6823_v48 = vand.u32 2147483647, %v6821_v54  ;;  %vm6863_vm10 = vcmp.ge.f32.partialorder %v6821_v54, 0.0 }
 0xc81   : > { %v6822_v47 = vand.u32 2147483647, %v6820_v35  ;;  %vm6862_vm11 = vcmp.ge.f32.partialorder %v6820_v35, 0.0 }
 0xc82   : > { %v6825_v60 = vmul.f32 0.3275911, %v6823_v48  ;;  %v6851_v58 = vsub.f32 0.0, %v6823_v48 }
 0xc83   : > { %v6824_v6 = vmul.f32 0.3275911, %v6822_v47  ;;  %v6850_v51 = vsub.f32 0.0, %v6822_v47 }
 0xc84   : > { %v6827_v17 = vadd.f32 1.0, %v6825_v60  ;;  %v6853_v31 = vmul.f32 %v6851_v58, %v6823_v48 }
 0xc85   : > { %v6826_v49 = vadd.f32 1.0, %v6824_v6  ;;  %v6852_v32 = vmul.f32 %v6850_v51, %v6822_v47 }
 0xc86   : > { %9411 = vrcp.f32 %v6827_v17  ;;  %v6856_v29 = vmul.f32 1.442695, %v6853_v31 }
 0xc87   : > { %9413 = vrcp.f32 %v6826_v49  ;;  %v6854_v57 = vmul.f32 1.442695, %v6852_v32 }
 0xc88   : > { %9415 = vpow2.f32 %v6856_v29 }
 0xc89   : > { %9417 = vpow2.f32 %v6854_v57 }
 0xc90   : > { %v9412_v56 = vpop.eup %9411 }
 0xc91   : > { %v9414_v33 = vpop.eup %9413  ;;  %v6833_v59 = vmul.f32 1.0614054, %v9412_v56 }
 0xc92   : > { %v6832_v10 = vmul.f32 1.0614054, %v9414_v33  ;;  %v9416_v63 = vpop.eup %9415 }
 0xc93   : > { %v6835_v24 = vadd.f32 -1.4531521, %v6833_v59  ;;  %v9418_v15 = vpop.eup %9417 }
 0xc94   : > { %v6834_v11 = vadd.f32 -1.4531521, %v6832_v10 }
 0xc95   : > { %v6837_v26 = vmul.f32 %v9412_v56, %v6835_v24 }
 0xc96   : > { %v6836_v53 = vmul.f32 %v9414_v33, %v6834_v11 }
 0xc97   : > { %v6839_v2 = vadd.f32 1.4214138, %v6837_v26 }
 0xc98   : > { %v6838_v61 = vadd.f32 1.4214138, %v6836_v53 }
 0xc99   : > { %v6841_v18 = vmul.f32 %v9412_v56, %v6839_v2 }
 0xc9a   : > { %v6840_v5 = vmul.f32 %v9414_v33, %v6838_v61 }
 0xc9b   : > { %v6843_v45 = vadd.f32 -0.28449672, %v6841_v18 }
 0xc9c   : > { %v6842_v1 = vadd.f32 -0.28449672, %v6840_v5 }
 0xc9d   : > { %v6845_v43 = vmul.f32 %v9412_v56, %v6843_v45 }
 0xc9e   : > { %v6844_v20 = vmul.f32 %v9414_v33, %v6842_v1 }
 0xc9f   : > { %v6847_v30 = vadd.f32 0.2548296, %v6845_v43 }
 0xca0   : > { %v6846_v22 = vadd.f32 0.2548296, %v6844_v20 }
 0xca1   : > { %v6849_v8 = vmul.f32 %v9412_v56, %v6847_v30 }
 0xca2   : > { %v6848_v34 = vmul.f32 %v9414_v33, %v6846_v22 }
 0xca3   : > { %v6859_v39 = vmul.f32 %v9416_v63, %v6849_v8 }
 0xca4   : > { %v6858_v28 = vmul.f32 %v9418_v15, %v6848_v34 }
 0xca5   : > { %v6861_v38 = vsub.f32 1.0, %v6859_v39 }
 0xca6   : > { %v6860_v9 = vsub.f32 1.0, %v6858_v28 }
 0xca7   : > { %v6865_v19 = vsub.f32 0.0, %v6861_v38 }
 0xca8   : > { %v6864_v37 = vsub.f32 0.0, %v6860_v9 }
 0xca9   : > { %v6867_v50 = vsel %vm6863_vm10, %v6861_v38, %v6865_v19 }
 0xcaa   : > { %v6869_v23 = vadd.f32 1.0, %v6867_v50  ;;  %v6866_v46 = vsel %vm6862_vm11, %v6860_v9, %v6864_v37 }
 0xcab   : > { %v6868_v13 = vadd.f32 1.0, %v6866_v46 }
 0xcac   : > { %v6871_v62 = vmul.f32 %v6869_v23, %v6819_v12 }
 0xcad   : > { %v6870_v55 = vmul.f32 %v6868_v13, %v6818_v16 }
 0xcae   : > { %v6873_v40 = vadd.f32 %v6871_v62, %v11493_v42 }
 0xcaf   : > { %v6872_v52 = vadd.f32 %v6870_v55, %v11491_v27 }
 0xcb1   : > { %v8941_v14 = vpack.c.bf16 %v6873_v40, %v6872_v52 }
 0xcb3   : > { %8942 = vmatpush3.bf16.msra.mxu1 %v8941_v14 }
 0xcb4   : > { %8943 = vmatprep.subr.bf16.mxu1 %v9678_v25 }
 0xcb6   : > { %8579 = vmatmul.mubr.msk.f32.vlgmr.msra.gmra.mrb[52].mxu1 %vm6874_vm12, %v11657_v4 }
 0xcb7   : > { %8945 = vmatpush3.bf16.msra.mxu1 %v8941_v14  ;;  %8585 = vmatprep.mubr.msk.f32.mxu1 %vm9679_vm9, %v11644_v36 }
 0xcba   : > { %8586 = vmatmul.mubr.msk.f32.vlgmr.msra.gmra.mrb[54].mxu1 %vm6874_vm12, %v11247_v3 }
 0xd89   : > { %v6943_v44 = vpop.f32.mrb[52].mxu1 }
 0xd8a   : > { %v8580_v42 = vpop.f32.mrb[53].mxu1 }
 0xd8d   : > { %v7015_v27 = vpop.f32.mrb[54].mxu1 }
 0xd8e   : > { %v7019_v21 = vmax.f32 %v6943_v44, %v7015_v27  ;;  %v8587_v0 = vpop.f32.mrb[55].mxu1 }
 0xd90   : > { %7020 = vst.msk [vmem:[%s629_s14] sm:$0xff] %vm644_vm0, %v7019_v21 }
 0xd91   : > { %9600 = shalt.err (!%p9597_p2)
}
 0xd92   : > { %s9601_s24 = scalar_lea.hbm %s11517_s18, 128  ;;  %s9605_s21 = scalar_lea.hbm %s11663_s0, 256 }
 0xd93   : > { %p9602_p3 = scmp.ne.s32.totalorder %s11517_s18, %s9601_s24  ;;  %p9606_p7 = scmp.lt.u32.totalorder %s11517_s18, %s11663_s0 }
 0xd94   : > { %p9607_p8 = scmp.lt.u32.totalorder %s9605_s21, %s9601_s24  ;;  %p9609_p13 = scmp.lt.u32.totalorder %s9601_s24, %s11517_s18 }
 0xd95   : > { %p9603_p4 = pnand %p9602_p3, %p11664_p1 }
 0xd96   : > { %p9608_p11 = por %p9607_p8, %p9606_p7 }
 0xd97   : > { %p9604_p12 = pneg %p9603_p4 }
 0xd98   : > { %p9610_p6 = por %p9609_p13, %p9608_p11 }
 0xd9a   : > { %p9611_p9 = pnand %p9610_p6, %p9604_p12 }
 0xd9c   : > { %9614 = shalt.err (!%p9611_p9)
}
 0xd9d   : > { %9160 = dma.vmem_to_hbm [thread:$0]  (%p11664_p1), %s11519_s26, 128, %s11517_s18, %s7022_s16  }
 0xd9e PF: > { %s11665_s30 = sld [smem:[#allocation23_spill]]  ;;  %s11666_s14 = sld [smem:[#allocation20_spill]] }
 0xd9f   : > { %s11667_s7 = sld [smem:[#allocation27_spill]] }
 0xda4   : > { %p9197_p5 = scmp.ge.s32.totalorder %s11665_s30, 2  ;;  %s7047_s15 = sand.u32 1, %s11666_s14  }
 0xda5   : > { %p11668_p0 = scmp.ne.s32.totalorder %s11667_s7, 0  ;;  %s7048_s25 = scalar_lea.sflag [#allocation5], %s7047_s15 }
 0xda7   : > { %p9182_p10 = pnand %p9197_p5, %p11668_p0 }
 0xda9   : > { %9648 = dma.done.wait (!%p9182_p10), %s7048_s25, 128  }
 0xdaa   : > { %9650 = vsyncadd (!%p9182_p10), %s7048_s25, 4294967168  ;;  %s11669_s27 = sld [smem:[#allocation24_spill]]  ;;  %s11670_s24 = sld [smem:[#allocation21_spill]] }
 0xdab   : > { %s11671_s25 = sld [smem:[#allocation22_spill]]  ;;  %s11672_s26 = sld [smem:[#allocation25_spill]] }
 0xdb0   : > { %p31_p2 = scmp.ge.s32.totalorder %s11669_s27, 4  }
 0xdb2   :  { %33 = sbr.rel (!%p31_p2) target bundleno = 16 (0x10), region = 174 }
 0xdb9   :  { %7053 = vsyncpa [#allocation4], 1 }
 0xdba   :  { %7055 = vsyncpa [#allocation4 + $0x1], 1 }
 0xdbb   :  { %7056 = vsyncpa [#allocation7], 1 }
 0xdbc   :  { %7057 = vsyncpa [#allocation10], 1 }
 0xdbd   :  { %7058 = vsyncpa [#allocation13], 1 }
 0xdbe   :  { %7059 = vsyncpa [#allocation5], 1 }
 0xdbf   :  { %7061 = vsyncpa [#allocation5 + $0x1], 1 }

</bundles_post_ra>
